<compile_context>
chip_gen: v7x
topology: tpu7x:2x2x1
jax: 0.10.0
libtpu: 0.0.40
codegen_flags: <defaults>
</compile_context>

<pallas_src>
import numpy as np
import jax
import jax.numpy as jnp
from jax import lax
from jax.experimental import pallas as pl
from jax.experimental.pallas import tpu as pltpu


# ----------------------------------------------------------------------------
# Pallas kernel: fused BN(eval) + ReLU + KxK strided conv (no bias)
#                [+ residual add]  [+ fused 1x1 shortcut conv output]
# One grid step processes one batch image.
# ----------------------------------------------------------------------------
def _make_conv_kernel(H, W, Cin, Cout, ksize, stride, pad,
                      fuse_residual, fuse_shortcut, mxu_dtype):
    Hp, Wp = H + 2 * pad, W + 2 * pad
    Ho = (Hp - ksize) // stride + 1
    Wo = (Wp - ksize) // stride + 1
    M = Ho * Wo

    def kernel(*refs):
        it = iter(refs)
        x_ref = next(it)
        scale_ref = next(it)
        shift_ref = next(it)
        w_ref = next(it)
        wsc_ref = next(it) if fuse_shortcut else None
        res_ref = next(it) if fuse_residual else None
        o_ref = next(it)
        sc_ref = next(it) if fuse_shortcut else None
        pad_ref = next(it)

        # Fused BatchNorm (folded scale/shift) + ReLU, f32 elementwise.
        y = jnp.maximum(x_ref[0] * scale_ref[...] + shift_ref[...], 0.0)

        # Padded-activation scratch: zero only the halo border (the interior is
        # fully overwritten every grid step).  Done every step so the kernel is
        # correct when the batch axis is sharded across cores ("parallel").
        if pad > 0:
            zrow = jnp.zeros((pad, Wp, Cin), jnp.float32)
            zcol = jnp.zeros((Hp, pad, Cin), jnp.float32)
            pad_ref[0:pad, :, :] = zrow
            pad_ref[Hp - pad:Hp, :, :] = zrow
            pad_ref[:, 0:pad, :] = zcol
            pad_ref[:, Wp - pad:Wp, :] = zcol
        pad_ref[pad:pad + H, pad:pad + W, :] = y

        def tap(ky, kx):
            # (Ho, Wo, Cin) window of the padded activation for tap (ky, kx),
            # subsampled by `stride` directly at load time.
            if stride == 1:
                v = pad_ref[ky:ky + Ho, kx:kx + Wo, :]
            else:
                v = pad_ref[pl.ds(ky, Ho, stride), pl.ds(kx, Wo, stride), :]
            return v.reshape(M, Cin).astype(mxu_dtype)

        # K*K whole-image tap matmuls into a single f32 accumulator (M = Ho*Wo).
        acc = jnp.zeros((M, Cout), jnp.float32)
        for ky in range(ksize):
            for kx in range(ksize):
                acc = acc + jnp.dot(tap(ky, kx), w_ref[ky * ksize + kx],
                                    preferred_element_type=jnp.float32)

        if fuse_residual:
            acc = acc + res_ref[0].reshape(M, Cout).astype(jnp.float32)

        # Single bulk store of the whole output tile.
        o_ref[0] = acc.reshape(Ho, Wo, Cout).astype(o_ref.dtype)

        if fuse_shortcut:
            # Fused 1x1 shortcut conv on relu(bn1(x)) with the same stride:
            # it is just one more tap, anchored at the unpadded origin.
            v = tap(pad, pad)
            sc = jnp.dot(v, wsc_ref[0], preferred_element_type=jnp.float32)
            sc_ref[0] = sc.reshape(Ho, Wo, Cout).astype(sc_ref.dtype)

    return kernel, Ho, Wo, Hp, Wp


def _conv_call(x, scale, shift, w, *, ksize, stride, pad,
               residual=None, w_shortcut=None, mxu_dtype=jnp.float32):
    """One fused pallas_call: conv(relu(x*scale+shift)) [+residual | +1x1 shortcut out]."""
    N, H, W, Cin = x.shape
    Cout = w.shape[-1]
    fuse_residual = residual is not None
    fuse_shortcut = w_shortcut is not None
    assert not (fuse_residual and fuse_shortcut)

    kernel, Ho, Wo, Hp, Wp = _make_conv_kernel(
        H, W, Cin, Cout, ksize, stride, pad, fuse_residual, fuse_shortcut,
        mxu_dtype)

    scale3 = scale.reshape(1, 1, Cin).astype(jnp.float32)
    shift3 = shift.reshape(1, 1, Cin).astype(jnp.float32)
    w_flat = w.reshape(ksize * ksize, Cin, Cout).astype(mxu_dtype)

    # NOTE: weight/scale/shift blocks have constant index maps; for real WRN
    # channel counts on v7x they should also be single-buffered to save VMEM.
    in_specs = [
        pl.BlockSpec((1, H, W, Cin), lambda n: (n, 0, 0, 0)),
        pl.BlockSpec((1, 1, Cin), lambda n: (0, 0, 0)),
        pl.BlockSpec((1, 1, Cin), lambda n: (0, 0, 0)),
        pl.BlockSpec((ksize * ksize, Cin, Cout), lambda n: (0, 0, 0)),
    ]
    args = [x, scale3, shift3, w_flat]
    if fuse_shortcut:
        in_specs.append(pl.BlockSpec((1, Cin, Cout), lambda n: (0, 0, 0)))
        args.append(w_shortcut.reshape(1, Cin, Cout).astype(mxu_dtype))
    if fuse_residual:
        assert residual.shape == (N, Ho, Wo, Cout)
        in_specs.append(pl.BlockSpec((1, Ho, Wo, Cout), lambda n: (n, 0, 0, 0)))
        args.append(residual)

    out_block = pl.BlockSpec((1, Ho, Wo, Cout), lambda n: (n, 0, 0, 0))
    if fuse_shortcut:
        out_shape = (jax.ShapeDtypeStruct((N, Ho, Wo, Cout), x.dtype),
                     jax.ShapeDtypeStruct((N, Ho, Wo, Cout), x.dtype))
        out_specs = (out_block, out_block)
    else:
        out_shape = jax.ShapeDtypeStruct((N, Ho, Wo, Cout), x.dtype)
        out_specs = out_block

    act_isz = np.dtype(x.dtype).itemsize
    mxu_isz = np.dtype(mxu_dtype).itemsize
    flops = 2 * N * Ho * Wo * ksize * ksize * Cin * Cout
    bytes_accessed = (N * H * W * Cin + 2 * Cin) * 4 \
        + ksize * ksize * Cin * Cout * mxu_isz + N * Ho * Wo * Cout * act_isz
    if fuse_shortcut:
        flops += 2 * N * Ho * Wo * Cin * Cout
        bytes_accessed += N * Ho * Wo * Cout * act_isz + Cin * Cout * mxu_isz
    if fuse_residual:
        bytes_accessed += N * Ho * Wo * Cout * act_isz

    return pl.pallas_call(
        kernel,
        out_shape=out_shape,
        grid=(N,),
        in_specs=in_specs,
        out_specs=out_specs,
        scratch_shapes=[pltpu.VMEM((Hp, Wp, Cin), jnp.float32)],
        compiler_params=pltpu.CompilerParams(
            dimension_semantics=("parallel",)),   # batch axis -> v7x 2-TC sharding
        cost_estimate=pl.CostEstimate(flops=int(flops), transcendentals=0,
                                      bytes_accessed=int(bytes_accessed)),
    )(*args)


def bnrelu_conv2d(x, scale, shift, w, *, ksize, stride, pad,
                  residual=None, w_shortcut=None, mxu_dtype=jnp.float32):
    """y = conv_{KxK,stride,pad}(relu(x*scale+shift)) [+ residual], NHWC.

    If `w_shortcut` is given, also returns the fused 1x1 (same-stride, pad=0)
    shortcut conv of relu(x*scale+shift) as a second output.
    """
    assert residual is None or stride == 1
    if stride == 1:
        return _conv_call(x, scale, shift, w, ksize=ksize, stride=1, pad=pad,
                          residual=residual, w_shortcut=w_shortcut,
                          mxu_dtype=mxu_dtype)
    try:
        # Preferred path: strided output computed directly inside the kernel.
        return _conv_call(x, scale, shift, w, ksize=ksize, stride=stride,
                          pad=pad, residual=residual, w_shortcut=w_shortcut,
                          mxu_dtype=mxu_dtype)
    except Exception:
        # TODO(synk): portability fallback for jax/Mosaic versions lacking
        # strided VMEM loads: unit-stride kernel + subsample in XLA (slower).
        out = _conv_call(x, scale, shift, w, ksize=ksize, stride=1, pad=pad,
                         residual=residual, w_shortcut=w_shortcut,
                         mxu_dtype=mxu_dtype)
        if isinstance(out, tuple):
            return tuple(o[:, ::stride, ::stride, :] for o in out)
        return out[:, ::stride, ::stride, :]


# ----------------------------------------------------------------------------
# Parameter init (deterministic, synthetic) and block forward passes
# ----------------------------------------------------------------------------
def init_bn_folded(key, c, eps=1e-5):
    k1, k2, k3, k4 = jax.random.split(key, 4)
    gamma = 1.0 + 0.1 * jax.random.normal(k1, (c,), jnp.float32)
    beta = 0.1 * jax.random.normal(k2, (c,), jnp.float32)
    running_mean = 0.1 * jax.random.normal(k3, (c,), jnp.float32)
    running_var = 1.0 + 0.1 * jax.random.uniform(k4, (c,), jnp.float32)
    scale = gamma / jnp.sqrt(running_var + eps)
    shift = beta - running_mean * scale
    return scale, shift


def init_conv_w(key, ksize, cin, cout):
    fan_in = ksize * ksize * cin
    return jax.random.normal(key, (ksize, ksize, cin, cout), jnp.float32) / np.sqrt(fan_in)


def init_basic_block(key, in_planes, out_planes, stride):
    ks = jax.random.split(key, 5)
    p = {
        "bn1": init_bn_folded(ks[0], in_planes),
        "w1": init_conv_w(ks[1], 3, in_planes, out_planes),
        "bn2": init_bn_folded(ks[2], out_planes),
        "w2": init_conv_w(ks[3], 3, out_planes, out_planes),
        "stride": stride,
        "equal": in_planes == out_planes,
    }
    if not p["equal"]:
        p["w_sc"] = init_conv_w(ks[4], 1, in_planes, out_planes)
    return p


def init_network_block(key, nb_layers, in_planes, out_planes, stride):
    keys = jax.random.split(key, int(nb_layers))
    layers = []
    for i in range(int(nb_layers)):
        layers.append(init_basic_block(
            keys[i],
            in_planes if i == 0 else out_planes,
            out_planes,
            stride if i == 0 else 1))
    return layers


def basic_block_forward(x, p, mxu_dtype=jnp.float32):
    s = p["stride"]
    s1, b1 = p["bn1"]
    s2, b2 = p["bn2"]
    if p["equal"]:
        # Identity shortcut (PyTorch would also fail shape-wise if stride > 1).
        assert s == 1, "identity shortcut requires stride == 1"
        o = bnrelu_conv2d(x, s1, b1, p["w1"], ksize=3, stride=s, pad=1,
                          mxu_dtype=mxu_dtype)
        shortcut = x
    else:
        # conv1 and the 1x1 shortcut share one kernel: relu(bn1(x)) is computed
        # once and x is read from HBM once.
        o, shortcut = bnrelu_conv2d(x, s1, b1, p["w1"], ksize=3, stride=s,
                                    pad=1, w_shortcut=p["w_sc"],
                                    mxu_dtype=mxu_dtype)
    # conv2(relu(bn2(o))) + shortcut, all fused in one kernel.
    return bnrelu_conv2d(o, s2, b2, p["w2"], ksize=3, stride=1, pad=1,
                         residual=shortcut, mxu_dtype=mxu_dtype)


def network_block_forward(x, layers, mxu_dtype=jnp.float32):
    for p in layers:
        x = basic_block_forward(x, p, mxu_dtype=mxu_dtype)
    return x


# ----------------------------------------------------------------------------
# Pure-JAX reference (for correctness check)
# ----------------------------------------------------------------------------
def _ref_bnrelu(x, scale, shift):
    return jnp.maximum(x * scale.reshape(1, 1, 1, -1) + shift.reshape(1, 1, 1, -1), 0.0)


def _ref_conv(x, w, stride, pad):
    return lax.conv_general_dilated(
        x, w, window_strides=(stride, stride),
        padding=[(pad, pad), (pad, pad)],
        dimension_numbers=("NHWC", "HWIO", "NHWC"))


def ref_basic_block(x, p):
    s = p["stride"]
    s1, b1 = p["bn1"]
    s2, b2 = p["bn2"]
    a = _ref_bnrelu(x, s1, b1)
    o = _ref_conv(a, p["w1"], s, 1)
    o = _ref_conv(_ref_bnrelu(o, s2, b2), p["w2"], 1, 1)
    shortcut = x if p["equal"] else _ref_conv(a, p["w_sc"], s, 0)
    return o + shortcut


def ref_network_block(x, layers):
    for p in layers:
        x = ref_basic_block(x, p)
    return x


if __name__ == "__main__":
    key = jax.random.PRNGKey(0)
    k_x, k_p = jax.random.split(key)

    # NetworkBlock(nb_layers=2, in_planes=4, out_planes=8, block=BasicBlock, stride=2)
    N, Cin, H, W = 2, 4, 16, 16
    Cout, nb_layers, stride = 8, 2, 2

    x_nchw = jax.random.normal(k_x, (N, Cin, H, W), jnp.float32)  # PyTorch NCHW input
    layers = init_network_block(k_p, nb_layers, Cin, Cout, stride)

    x_nhwc = jnp.transpose(x_nchw, (0, 2, 3, 1))                  # NCHW -> NHWC
    ref_nhwc = ref_network_block(x_nhwc, layers)

    # f32 MXU path: tight check against the XLA reference.
    out_nhwc = jax.block_until_ready(network_block_forward(x_nhwc, layers))
    out_nchw = jnp.transpose(out_nhwc, (0, 3, 1, 2))              # NHWC -> NCHW
    ref_nchw = jnp.transpose(ref_nhwc, (0, 3, 1, 2))
    np.testing.assert_allclose(np.asarray(out_nchw), np.asarray(ref_nchw),
                               rtol=2e-2, atol=2e-2)

    # bf16 MXU inputs (recommended on v6e/v7x), f32 accumulation: loose check.
    out_bf16 = jax.block_until_ready(
        network_block_forward(x_nhwc, layers, mxu_dtype=jnp.bfloat16))
    err = float(jnp.max(jnp.abs(out_bf16 - ref_nhwc)))
    assert err < 0.25, f"bf16 MXU path error too large: {err}"

    print("KERNEL_OK")
</pallas_src>

<mosaic_0001>
module attributes {stable_mosaic.version = 11 : i64} {
  func.func @kernel(%arg0: i32, %arg1: memref<1x16x16x4xf32, #tpu.memory_space<vmem>>, %arg2: memref<1x1x4xf32, #tpu.memory_space<vmem>>, %arg3: memref<1x1x4xf32, #tpu.memory_space<vmem>>, %arg4: memref<9x4x8xf32, #tpu.memory_space<vmem>>, %arg5: memref<1x4x8xf32, #tpu.memory_space<vmem>>, %arg6: memref<1x8x8x8xf32, #tpu.memory_space<vmem>>, %arg7: memref<1x8x8x8xf32, #tpu.memory_space<vmem>>, %arg8: memref<18x18x4xf32, #tpu.memory_space<vmem>>) attributes {dimension_semantics = [#tpu.dimension_semantics<parallel>], iteration_bounds = array<i64: 2>, scalar_prefetch = 0 : i64, scratch_operands = 1 : i64, tpu.core_type = #tpu.core_type<tc>, window_params = [{transform_indices = @transform_0, window_bounds = array<i64: 1, 16, 16, 4>}, {pipeline_mode = #tpu.pipeline_mode<synchronous>, transform_indices = @transform_1, window_bounds = array<i64: 1, 1, 4>}, {pipeline_mode = #tpu.pipeline_mode<synchronous>, transform_indices = @transform_2, window_bounds = array<i64: 1, 1, 4>}, {pipeline_mode = #tpu.pipeline_mode<synchronous>, transform_indices = @transform_3, window_bounds = array<i64: 9, 4, 8>}, {pipeline_mode = #tpu.pipeline_mode<synchronous>, transform_indices = @transform_4, window_bounds = array<i64: 1, 4, 8>}, {transform_indices = @transform_5, window_bounds = array<i64: 1, 8, 8, 8>}, {transform_indices = @transform_6, window_bounds = array<i64: 1, 8, 8, 8>}]} {
    %c0 = arith.constant 0 : index
    %c0_0 = arith.constant 0 : index
    %c0_1 = arith.constant 0 : index
    %c0_2 = arith.constant 0 : index
    %0 = vector.load %arg1[%c0, %c0_0, %c0_1, %c0_2] : memref<1x16x16x4xf32, #tpu.memory_space<vmem>>, vector<1x16x16x4xf32>
    %1 = vector.shape_cast %0 : vector<1x16x16x4xf32> to vector<16x16x4xf32>
    %c0_3 = arith.constant 0 : index
    %c0_4 = arith.constant 0 : index
    %c0_5 = arith.constant 0 : index
    %2 = vector.load %arg2[%c0_3, %c0_4, %c0_5] : memref<1x1x4xf32, #tpu.memory_space<vmem>>, vector<1x1x4xf32>
    %3 = vector.broadcast %2 : vector<1x1x4xf32> to vector<16x16x4xf32>
    %4 = arith.mulf %1, %3 : vector<16x16x4xf32>
    %c0_6 = arith.constant 0 : index
    %c0_7 = arith.constant 0 : index
    %c0_8 = arith.constant 0 : index
    %5 = vector.load %arg3[%c0_6, %c0_7, %c0_8] : memref<1x1x4xf32, #tpu.memory_space<vmem>>, vector<1x1x4xf32>
    %6 = vector.broadcast %5 : vector<1x1x4xf32> to vector<16x16x4xf32>
    %7 = arith.addf %4, %6 : vector<16x16x4xf32>
    %cst = arith.constant 0.000000e+00 : f32
    %8 = vector.broadcast %cst : f32 to vector<16x16x4xf32>
    %9 = arith.maximumf %7, %8 : vector<16x16x4xf32>
    %cst_9 = arith.constant 0.000000e+00 : f32
    %10 = vector.broadcast %cst_9 : f32 to vector<1x18x4xf32>
    %cst_10 = arith.constant 0.000000e+00 : f32
    %11 = vector.broadcast %cst_10 : f32 to vector<18x1x4xf32>
    %c0_11 = arith.constant 0 : index
    %c0_12 = arith.constant 0 : index
    %c0_13 = arith.constant 0 : index
    %12 = vector.load %arg8[%c0_11, %c0_12, %c0_13] : memref<18x18x4xf32, #tpu.memory_space<vmem>>, vector<1x18x4xf32>
    tpu.vector_store %arg8[%c0_11, %c0_12, %c0_13], %10 {strides = array<i32>} : memref<18x18x4xf32, #tpu.memory_space<vmem>>, vector<1x18x4xf32>,
    %c17 = arith.constant 17 : index
    %c0_14 = arith.constant 0 : index
    %c0_15 = arith.constant 0 : index
    %13 = vector.load %arg8[%c17, %c0_14, %c0_15] : memref<18x18x4xf32, #tpu.memory_space<vmem>>, vector<1x18x4xf32>
    tpu.vector_store %arg8[%c17, %c0_14, %c0_15], %10 {strides = array<i32>} : memref<18x18x4xf32, #tpu.memory_space<vmem>>, vector<1x18x4xf32>,
    %c0_16 = arith.constant 0 : index
    %c0_17 = arith.constant 0 : index
    %c0_18 = arith.constant 0 : index
    %14 = vector.load %arg8[%c0_16, %c0_17, %c0_18] : memref<18x18x4xf32, #tpu.memory_space<vmem>>, vector<18x1x4xf32>
    tpu.vector_store %arg8[%c0_16, %c0_17, %c0_18], %11 {strides = array<i32>} : memref<18x18x4xf32, #tpu.memory_space<vmem>>, vector<18x1x4xf32>,
    %c0_19 = arith.constant 0 : index
    %c17_20 = arith.constant 17 : index
    %c0_21 = arith.constant 0 : index
    %15 = vector.load %arg8[%c0_19, %c17_20, %c0_21] : memref<18x18x4xf32, #tpu.memory_space<vmem>>, vector<18x1x4xf32>
    tpu.vector_store %arg8[%c0_19, %c17_20, %c0_21], %11 {strides = array<i32>} : memref<18x18x4xf32, #tpu.memory_space<vmem>>, vector<18x1x4xf32>,
    %c1 = arith.constant 1 : index
    %c1_22 = arith.constant 1 : index
    %c0_23 = arith.constant 0 : index
    %16 = vector.load %arg8[%c1, %c1_22, %c0_23] : memref<18x18x4xf32, #tpu.memory_space<vmem>>, vector<16x16x4xf32>
    tpu.vector_store %arg8[%c1, %c1_22, %c0_23], %9 {strides = array<i32>} : memref<18x18x4xf32, #tpu.memory_space<vmem>>, vector<16x16x4xf32>,
    %cst_24 = arith.constant 0.000000e+00 : f32
    %17 = vector.broadcast %cst_24 : f32 to vector<64x8xf32>
    %c0_25 = arith.constant 0 : index
    %c0_26 = arith.constant 0 : index
    %c0_27 = arith.constant 0 : index
    %18 = tpu.strided_load %arg8[%c0_25, %c0_26, %c0_27] {strides = array<i32: 2, 2, 1>} : memref<18x18x4xf32, #tpu.memory_space<vmem>>, vector<8x8x4xf32>
    %19 = vector.shape_cast %18 : vector<8x8x4xf32> to vector<64x4xf32>
    %c0_28 = arith.constant 0 : index
    %c0_29 = arith.constant 0 : index
    %c0_30 = arith.constant 0 : index
    %20 = vector.load %arg4[%c0_28, %c0_29, %c0_30] : memref<9x4x8xf32, #tpu.memory_space<vmem>>, vector<1x4x8xf32>
    %21 = vector.shape_cast %20 : vector<1x4x8xf32> to vector<4x8xf32>
    %cst_31 = arith.constant dense<0.000000e+00> : vector<64x8xf32>
    %22 = tpu.matmul %19, %21, %cst_31 {dimension_numbers = #tpu.dot_dimension_numbers<[1], [0], [0], [1], [0, 0, 1, 1], [], []>} : vector<64x4xf32>, vector<4x8xf32>, vector<64x8xf32> -> vector<64x8xf32>
    %23 = arith.addf %17, %22 : vector<64x8xf32>
    %c0_32 = arith.constant 0 : index
    %c1_33 = arith.constant 1 : index
    %c0_34 = arith.constant 0 : index
    %24 = tpu.strided_load %arg8[%c0_32, %c1_33, %c0_34] {strides = array<i32: 2, 2, 1>} : memref<18x18x4xf32, #tpu.memory_space<vmem>>, vector<8x8x4xf32>
    %25 = vector.shape_cast %24 : vector<8x8x4xf32> to vector<64x4xf32>
    %c1_35 = arith.constant 1 : index
    %c0_36 = arith.constant 0 : index
    %c0_37 = arith.constant 0 : index
    %26 = vector.load %arg4[%c1_35, %c0_36, %c0_37] : memref<9x4x8xf32, #tpu.memory_space<vmem>>, vector<1x4x8xf32>
    %27 = vector.shape_cast %26 : vector<1x4x8xf32> to vector<4x8xf32>
    %cst_38 = arith.constant dense<0.000000e+00> : vector<64x8xf32>
    %28 = tpu.matmul %25, %27, %cst_38 {dimension_numbers = #tpu.dot_dimension_numbers<[1], [0], [0], [1], [0, 0, 1, 1], [], []>} : vector<64x4xf32>, vector<4x8xf32>, vector<64x8xf32> -> vector<64x8xf32>
    %29 = arith.addf %23, %28 : vector<64x8xf32>
    %c0_39 = arith.constant 0 : index
    %c2 = arith.constant 2 : index
    %c0_40 = arith.constant 0 : index
    %30 = tpu.strided_load %arg8[%c0_39, %c2, %c0_40] {strides = array<i32: 2, 2, 1>} : memref<18x18x4xf32, #tpu.memory_space<vmem>>, vector<8x8x4xf32>
    %31 = vector.shape_cast %30 : vector<8x8x4xf32> to vector<64x4xf32>
    %c2_41 = arith.constant 2 : index
    %c0_42 = arith.constant 0 : index
    %c0_43 = arith.constant 0 : index
    %32 = vector.load %arg4[%c2_41, %c0_42, %c0_43] : memref<9x4x8xf32, #tpu.memory_space<vmem>>, vector<1x4x8xf32>
    %33 = vector.shape_cast %32 : vector<1x4x8xf32> to vector<4x8xf32>
    %cst_44 = arith.constant dense<0.000000e+00> : vector<64x8xf32>
    %34 = tpu.matmul %31, %33, %cst_44 {dimension_numbers = #tpu.dot_dimension_numbers<[1], [0], [0], [1], [0, 0, 1, 1], [], []>} : vector<64x4xf32>, vector<4x8xf32>, vector<64x8xf32> -> vector<64x8xf32>
    %35 = arith.addf %29, %34 : vector<64x8xf32>
    %c1_45 = arith.constant 1 : index
    %c0_46 = arith.constant 0 : index
    %c0_47 = arith.constant 0 : index
    %36 = tpu.strided_load %arg8[%c1_45, %c0_46, %c0_47] {strides = array<i32: 2, 2, 1>} : memref<18x18x4xf32, #tpu.memory_space<vmem>>, vector<8x8x4xf32>
    %37 = vector.shape_cast %36 : vector<8x8x4xf32> to vector<64x4xf32>
    %c3 = arith.constant 3 : index
    %c0_48 = arith.constant 0 : index
    %c0_49 = arith.constant 0 : index
    %38 = vector.load %arg4[%c3, %c0_48, %c0_49] : memref<9x4x8xf32, #tpu.memory_space<vmem>>, vector<1x4x8xf32>
    %39 = vector.shape_cast %38 : vector<1x4x8xf32> to vector<4x8xf32>
    %cst_50 = arith.constant dense<0.000000e+00> : vector<64x8xf32>
    %40 = tpu.matmul %37, %39, %cst_50 {dimension_numbers = #tpu.dot_dimension_numbers<[1], [0], [0], [1], [0, 0, 1, 1], [], []>} : vector<64x4xf32>, vector<4x8xf32>, vector<64x8xf32> -> vector<64x8xf32>
    %41 = arith.addf %35, %40 : vector<64x8xf32>
    %c1_51 = arith.constant 1 : index
    %c1_52 = arith.constant 1 : index
    %c0_53 = arith.constant 0 : index
    %42 = tpu.strided_load %arg8[%c1_51, %c1_52, %c0_53] {strides = array<i32: 2, 2, 1>} : memref<18x18x4xf32, #tpu.memory_space<vmem>>, vector<8x8x4xf32>
    %43 = vector.shape_cast %42 : vector<8x8x4xf32> to vector<64x4xf32>
    %c4 = arith.constant 4 : index
    %c0_54 = arith.constant 0 : index
    %c0_55 = arith.constant 0 : index
    %44 = vector.load %arg4[%c4, %c0_54, %c0_55] : memref<9x4x8xf32, #tpu.memory_space<vmem>>, vector<1x4x8xf32>
    %45 = vector.shape_cast %44 : vector<1x4x8xf32> to vector<4x8xf32>
    %cst_56 = arith.constant dense<0.000000e+00> : vector<64x8xf32>
    %46 = tpu.matmul %43, %45, %cst_56 {dimension_numbers = #tpu.dot_dimension_numbers<[1], [0], [0], [1], [0, 0, 1, 1], [], []>} : vector<64x4xf32>, vector<4x8xf32>, vector<64x8xf32> -> vector<64x8xf32>
    %47 = arith.addf %41, %46 : vector<64x8xf32>
    %c1_57 = arith.constant 1 : index
    %c2_58 = arith.constant 2 : index
    %c0_59 = arith.constant 0 : index
    %48 = tpu.strided_load %arg8[%c1_57, %c2_58, %c0_59] {strides = array<i32: 2, 2, 1>} : memref<18x18x4xf32, #tpu.memory_space<vmem>>, vector<8x8x4xf32>
    %49 = vector.shape_cast %48 : vector<8x8x4xf32> to vector<64x4xf32>
    %c5 = arith.constant 5 : index
    %c0_60 = arith.constant 0 : index
    %c0_61 = arith.constant 0 : index
    %50 = vector.load %arg4[%c5, %c0_60, %c0_61] : memref<9x4x8xf32, #tpu.memory_space<vmem>>, vector<1x4x8xf32>
    %51 = vector.shape_cast %50 : vector<1x4x8xf32> to vector<4x8xf32>
    %cst_62 = arith.constant dense<0.000000e+00> : vector<64x8xf32>
    %52 = tpu.matmul %49, %51, %cst_62 {dimension_numbers = #tpu.dot_dimension_numbers<[1], [0], [0], [1], [0, 0, 1, 1], [], []>} : vector<64x4xf32>, vector<4x8xf32>, vector<64x8xf32> -> vector<64x8xf32>
    %53 = arith.addf %47, %52 : vector<64x8xf32>
    %c2_63 = arith.constant 2 : index
    %c0_64 = arith.constant 0 : index
    %c0_65 = arith.constant 0 : index
    %54 = tpu.strided_load %arg8[%c2_63, %c0_64, %c0_65] {strides = array<i32: 2, 2, 1>} : memref<18x18x4xf32, #tpu.memory_space<vmem>>, vector<8x8x4xf32>
    %55 = vector.shape_cast %54 : vector<8x8x4xf32> to vector<64x4xf32>
    %c6 = arith.constant 6 : index
    %c0_66 = arith.constant 0 : index
    %c0_67 = arith.constant 0 : index
    %56 = vector.load %arg4[%c6, %c0_66, %c0_67] : memref<9x4x8xf32, #tpu.memory_space<vmem>>, vector<1x4x8xf32>
    %57 = vector.shape_cast %56 : vector<1x4x8xf32> to vector<4x8xf32>
    %cst_68 = arith.constant dense<0.000000e+00> : vector<64x8xf32>
    %58 = tpu.matmul %55, %57, %cst_68 {dimension_numbers = #tpu.dot_dimension_numbers<[1], [0], [0], [1], [0, 0, 1, 1], [], []>} : vector<64x4xf32>, vector<4x8xf32>, vector<64x8xf32> -> vector<64x8xf32>
    %59 = arith.addf %53, %58 : vector<64x8xf32>
    %c2_69 = arith.constant 2 : index
    %c1_70 = arith.constant 1 : index
    %c0_71 = arith.constant 0 : index
    %60 = tpu.strided_load %arg8[%c2_69, %c1_70, %c0_71] {strides = array<i32: 2, 2, 1>} : memref<18x18x4xf32, #tpu.memory_space<vmem>>, vector<8x8x4xf32>
    %61 = vector.shape_cast %60 : vector<8x8x4xf32> to vector<64x4xf32>
    %c7 = arith.constant 7 : index
    %c0_72 = arith.constant 0 : index
    %c0_73 = arith.constant 0 : index
    %62 = vector.load %arg4[%c7, %c0_72, %c0_73] : memref<9x4x8xf32, #tpu.memory_space<vmem>>, vector<1x4x8xf32>
    %63 = vector.shape_cast %62 : vector<1x4x8xf32> to vector<4x8xf32>
    %cst_74 = arith.constant dense<0.000000e+00> : vector<64x8xf32>
    %64 = tpu.matmul %61, %63, %cst_74 {dimension_numbers = #tpu.dot_dimension_numbers<[1], [0], [0], [1], [0, 0, 1, 1], [], []>} : vector<64x4xf32>, vector<4x8xf32>, vector<64x8xf32> -> vector<64x8xf32>
    %65 = arith.addf %59, %64 : vector<64x8xf32>
    %c2_75 = arith.constant 2 : index
    %c2_76 = arith.constant 2 : index
    %c0_77 = arith.constant 0 : index
    %66 = tpu.strided_load %arg8[%c2_75, %c2_76, %c0_77] {strides = array<i32: 2, 2, 1>} : memref<18x18x4xf32, #tpu.memory_space<vmem>>, vector<8x8x4xf32>
    %67 = vector.shape_cast %66 : vector<8x8x4xf32> to vector<64x4xf32>
    %c8 = arith.constant 8 : index
    %c0_78 = arith.constant 0 : index
    %c0_79 = arith.constant 0 : index
    %68 = vector.load %arg4[%c8, %c0_78, %c0_79] : memref<9x4x8xf32, #tpu.memory_space<vmem>>, vector<1x4x8xf32>
    %69 = vector.shape_cast %68 : vector<1x4x8xf32> to vector<4x8xf32>
    %cst_80 = arith.constant dense<0.000000e+00> : vector<64x8xf32>
    %70 = tpu.matmul %67, %69, %cst_80 {dimension_numbers = #tpu.dot_dimension_numbers<[1], [0], [0], [1], [0, 0, 1, 1], [], []>} : vector<64x4xf32>, vector<4x8xf32>, vector<64x8xf32> -> vector<64x8xf32>
    %71 = arith.addf %65, %70 : vector<64x8xf32>
    %72 = vector.shape_cast %71 : vector<64x8xf32> to vector<8x8x8xf32>
    %c0_81 = arith.constant 0 : index
    %c0_82 = arith.constant 0 : index
    %c0_83 = arith.constant 0 : index
    %c0_84 = arith.constant 0 : index
    %73 = vector.load %arg6[%c0_81, %c0_82, %c0_83, %c0_84] : memref<1x8x8x8xf32, #tpu.memory_space<vmem>>, vector<1x8x8x8xf32>
    %74 = vector.shape_cast %73 : vector<1x8x8x8xf32> to vector<8x8x8xf32>
    %75 = vector.shape_cast %72 : vector<8x8x8xf32> to vector<1x8x8x8xf32>
    tpu.vector_store %arg6[%c0_81, %c0_82, %c0_83, %c0_84], %75 {strides = array<i32>} : memref<1x8x8x8xf32, #tpu.memory_space<vmem>>, vector<1x8x8x8xf32>,
    %c1_85 = arith.constant 1 : index
    %c1_86 = arith.constant 1 : index
    %c0_87 = arith.constant 0 : index
    %76 = tpu.strided_load %arg8[%c1_85, %c1_86, %c0_87] {strides = array<i32: 2, 2, 1>} : memref<18x18x4xf32, #tpu.memory_space<vmem>>, vector<8x8x4xf32>
    %77 = vector.shape_cast %76 : vector<8x8x4xf32> to vector<64x4xf32>
    %c0_88 = arith.constant 0 : index
    %c0_89 = arith.constant 0 : index
    %c0_90 = arith.constant 0 : index
    %78 = vector.load %arg5[%c0_88, %c0_89, %c0_90] : memref<1x4x8xf32, #tpu.memory_space<vmem>>, vector<1x4x8xf32>
    %79 = vector.shape_cast %78 : vector<1x4x8xf32> to vector<4x8xf32>
    %cst_91 = arith.constant dense<0.000000e+00> : vector<64x8xf32>
    %80 = tpu.matmul %77, %79, %cst_91 {dimension_numbers = #tpu.dot_dimension_numbers<[1], [0], [0], [1], [0, 0, 1, 1], [], []>} : vector<64x4xf32>, vector<4x8xf32>, vector<64x8xf32> -> vector<64x8xf32>
    %81 = vector.shape_cast %80 : vector<64x8xf32> to vector<8x8x8xf32>
    %c0_92 = arith.constant 0 : index
    %c0_93 = arith.constant 0 : index
    %c0_94 = arith.constant 0 : index
    %c0_95 = arith.constant 0 : index
    %82 = vector.load %arg7[%c0_92, %c0_93, %c0_94, %c0_95] : memref<1x8x8x8xf32, #tpu.memory_space<vmem>>, vector<1x8x8x8xf32>
    %83 = vector.shape_cast %82 : vector<1x8x8x8xf32> to vector<8x8x8xf32>
    %84 = vector.shape_cast %81 : vector<8x8x8xf32> to vector<1x8x8x8xf32>
    tpu.vector_store %arg7[%c0_92, %c0_93, %c0_94, %c0_95], %84 {strides = array<i32>} : memref<1x8x8x8xf32, #tpu.memory_space<vmem>>, vector<1x8x8x8xf32>,
    return
  }
  func.func @transform_0(%arg0: i32) -> (i32, i32, i32, i32) {
    %c0_i32 = arith.constant 0 : i32
    %c0_i32_0 = arith.constant 0 : i32
    %c0_i32_1 = arith.constant 0 : i32
    %c0_i32_2 = arith.constant 0 : i32
    return %arg0, %c0_i32, %c0_i32_0, %c0_i32_1 : i32, i32, i32, i32
  }
  func.func @transform_1(%arg0: i32) -> (i32, i32, i32) {
    %c0_i32 = arith.constant 0 : i32
    %c0_i32_0 = arith.constant 0 : i32
    %c0_i32_1 = arith.constant 0 : i32
    %c0_i32_2 = arith.constant 0 : i32
    return %c0_i32, %c0_i32_0, %c0_i32_1 : i32, i32, i32
  }
  func.func @transform_2(%arg0: i32) -> (i32, i32, i32) {
    %c0_i32 = arith.constant 0 : i32
    %c0_i32_0 = arith.constant 0 : i32
    %c0_i32_1 = arith.constant 0 : i32
    %c0_i32_2 = arith.constant 0 : i32
    return %c0_i32, %c0_i32_0, %c0_i32_1 : i32, i32, i32
  }
  func.func @transform_3(%arg0: i32) -> (i32, i32, i32) {
    %c0_i32 = arith.constant 0 : i32
    %c0_i32_0 = arith.constant 0 : i32
    %c0_i32_1 = arith.constant 0 : i32
    %c0_i32_2 = arith.constant 0 : i32
    return %c0_i32, %c0_i32_0, %c0_i32_1 : i32, i32, i32
  }
  func.func @transform_4(%arg0: i32) -> (i32, i32, i32) {
    %c0_i32 = arith.constant 0 : i32
    %c0_i32_0 = arith.constant 0 : i32
    %c0_i32_1 = arith.constant 0 : i32
    %c0_i32_2 = arith.constant 0 : i32
    return %c0_i32, %c0_i32_0, %c0_i32_1 : i32, i32, i32
  }
  func.func @transform_5(%arg0: i32) -> (i32, i32, i32, i32) {
    %c0_i32 = arith.constant 0 : i32
    %c0_i32_0 = arith.constant 0 : i32
    %c0_i32_1 = arith.constant 0 : i32
    %c0_i32_2 = arith.constant 0 : i32
    return %arg0, %c0_i32, %c0_i32_0, %c0_i32_1 : i32, i32, i32, i32
  }
  func.func @transform_6(%arg0: i32) -> (i32, i32, i32, i32) {
    %c0_i32 = arith.constant 0 : i32
    %c0_i32_0 = arith.constant 0 : i32
    %c0_i32_1 = arith.constant 0 : i32
    %c0_i32_2 = arith.constant 0 : i32
    return %arg0, %c0_i32, %c0_i32_0, %c0_i32_1 : i32, i32, i32, i32
  }
}

module attributes {stable_mosaic.version = 11 : i64} {
  func.func @kernel(%arg0: i32, %arg1: memref<1x16x16x4xf32, #tpu.memory_space<vmem>>, %arg2: memref<1x1x4xf32, #tpu.memory_space<vmem>>, %arg3: memref<1x1x4xf32, #tpu.memory_space<vmem>>, %arg4: memref<9x4x8xf32, #tpu.memory_space<vmem>>, %arg5: memref<1x4x8xf32, #tpu.memory_space<vmem>>, %arg6: memref<1x16x16x8xf32, #tpu.memory_space<vmem>>, %arg7: memref<1x16x16x8xf32, #tpu.memory_space<vmem>>, %arg8: memref<18x18x4xf32, #tpu.memory_space<vmem>>) attributes {dimension_semantics = [#tpu.dimension_semantics<parallel>], iteration_bounds = array<i64: 2>, scalar_prefetch = 0 : i64, scratch_operands = 1 : i64, tpu.core_type = #tpu.core_type<tc>, window_params = [{transform_indices = @transform_0, window_bounds = array<i64: 1, 16, 16, 4>}, {pipeline_mode = #tpu.pipeline_mode<synchronous>, transform_indices = @transform_1, window_bounds = array<i64: 1, 1, 4>}, {pipeline_mode = #tpu.pipeline_mode<synchronous>, transform_indices = @transform_2, window_bounds = array<i64: 1, 1, 4>}, {pipeline_mode = #tpu.pipeline_mode<synchronous>, transform_indices = @transform_3, window_bounds = array<i64: 9, 4, 8>}, {pipeline_mode = #tpu.pipeline_mode<synchronous>, transform_indices = @transform_4, window_bounds = array<i64: 1, 4, 8>}, {transform_indices = @transform_5, window_bounds = array<i64: 1, 16, 16, 8>}, {transform_indices = @transform_6, window_bounds = array<i64: 1, 16, 16, 8>}]} {
    %c0 = arith.constant 0 : index
    %c0_0 = arith.constant 0 : index
    %c0_1 = arith.constant 0 : index
    %c0_2 = arith.constant 0 : index
    %0 = vector.load %arg1[%c0, %c0_0, %c0_1, %c0_2] : memref<1x16x16x4xf32, #tpu.memory_space<vmem>>, vector<1x16x16x4xf32>
    %1 = vector.shape_cast %0 : vector<1x16x16x4xf32> to vector<16x16x4xf32>
    %c0_3 = arith.constant 0 : index
    %c0_4 = arith.constant 0 : index
    %c0_5 = arith.constant 0 : index
    %2 = vector.load %arg2[%c0_3, %c0_4, %c0_5] : memref<1x1x4xf32, #tpu.memory_space<vmem>>, vector<1x1x4xf32>
    %3 = vector.broadcast %2 : vector<1x1x4xf32> to vector<16x16x4xf32>
    %4 = arith.mulf %1, %3 : vector<16x16x4xf32>
    %c0_6 = arith.constant 0 : index
    %c0_7 = arith.constant 0 : index
    %c0_8 = arith.constant 0 : index
    %5 = vector.load %arg3[%c0_6, %c0_7, %c0_8] : memref<1x1x4xf32, #tpu.memory_space<vmem>>, vector<1x1x4xf32>
    %6 = vector.broadcast %5 : vector<1x1x4xf32> to vector<16x16x4xf32>
    %7 = arith.addf %4, %6 : vector<16x16x4xf32>
    %cst = arith.constant 0.000000e+00 : f32
    %8 = vector.broadcast %cst : f32 to vector<16x16x4xf32>
    %9 = arith.maximumf %7, %8 : vector<16x16x4xf32>
    %cst_9 = arith.constant 0.000000e+00 : f32
    %10 = vector.broadcast %cst_9 : f32 to vector<1x18x4xf32>
    %cst_10 = arith.constant 0.000000e+00 : f32
    %11 = vector.broadcast %cst_10 : f32 to vector<18x1x4xf32>
    %c0_11 = arith.constant 0 : index
    %c0_12 = arith.constant 0 : index
    %c0_13 = arith.constant 0 : index
    %12 = vector.load %arg8[%c0_11, %c0_12, %c0_13] : memref<18x18x4xf32, #tpu.memory_space<vmem>>, vector<1x18x4xf32>
    tpu.vector_store %arg8[%c0_11, %c0_12, %c0_13], %10 {strides = array<i32>} : memref<18x18x4xf32, #tpu.memory_space<vmem>>, vector<1x18x4xf32>,
    %c17 = arith.constant 17 : index
    %c0_14 = arith.constant 0 : index
    %c0_15 = arith.constant 0 : index
    %13 = vector.load %arg8[%c17, %c0_14, %c0_15] : memref<18x18x4xf32, #tpu.memory_space<vmem>>, vector<1x18x4xf32>
    tpu.vector_store %arg8[%c17, %c0_14, %c0_15], %10 {strides = array<i32>} : memref<18x18x4xf32, #tpu.memory_space<vmem>>, vector<1x18x4xf32>,
    %c0_16 = arith.constant 0 : index
    %c0_17 = arith.constant 0 : index
    %c0_18 = arith.constant 0 : index
    %14 = vector.load %arg8[%c0_16, %c0_17, %c0_18] : memref<18x18x4xf32, #tpu.memory_space<vmem>>, vector<18x1x4xf32>
    tpu.vector_store %arg8[%c0_16, %c0_17, %c0_18], %11 {strides = array<i32>} : memref<18x18x4xf32, #tpu.memory_space<vmem>>, vector<18x1x4xf32>,
    %c0_19 = arith.constant 0 : index
    %c17_20 = arith.constant 17 : index
    %c0_21 = arith.constant 0 : index
    %15 = vector.load %arg8[%c0_19, %c17_20, %c0_21] : memref<18x18x4xf32, #tpu.memory_space<vmem>>, vector<18x1x4xf32>
    tpu.vector_store %arg8[%c0_19, %c17_20, %c0_21], %11 {strides = array<i32>} : memref<18x18x4xf32, #tpu.memory_space<vmem>>, vector<18x1x4xf32>,
    %c1 = arith.constant 1 : index
    %c1_22 = arith.constant 1 : index
    %c0_23 = arith.constant 0 : index
    %16 = vector.load %arg8[%c1, %c1_22, %c0_23] : memref<18x18x4xf32, #tpu.memory_space<vmem>>, vector<16x16x4xf32>
    tpu.vector_store %arg8[%c1, %c1_22, %c0_23], %9 {strides = array<i32>} : memref<18x18x4xf32, #tpu.memory_space<vmem>>, vector<16x16x4xf32>,
    %cst_24 = arith.constant 0.000000e+00 : f32
    %17 = vector.broadcast %cst_24 : f32 to vector<256x8xf32>
    %c0_25 = arith.constant 0 : index
    %c0_26 = arith.constant 0 : index
    %c0_27 = arith.constant 0 : index
    %18 = vector.load %arg8[%c0_25, %c0_26, %c0_27] : memref<18x18x4xf32, #tpu.memory_space<vmem>>, vector<16x16x4xf32>
    %19 = vector.shape_cast %18 : vector<16x16x4xf32> to vector<256x4xf32>
    %c0_28 = arith.constant 0 : index
    %c0_29 = arith.constant 0 : index
    %c0_30 = arith.constant 0 : index
    %20 = vector.load %arg4[%c0_28, %c0_29, %c0_30] : memref<9x4x8xf32, #tpu.memory_space<vmem>>, vector<1x4x8xf32>
    %21 = vector.shape_cast %20 : vector<1x4x8xf32> to vector<4x8xf32>
    %cst_31 = arith.constant dense<0.000000e+00> : vector<256x8xf32>
    %22 = tpu.matmul %19, %21, %cst_31 {dimension_numbers = #tpu.dot_dimension_numbers<[1], [0], [0], [1], [0, 0, 1, 1], [], []>} : vector<256x4xf32>, vector<4x8xf32>, vector<256x8xf32> -> vector<256x8xf32>
    %23 = arith.addf %17, %22 : vector<256x8xf32>
    %c0_32 = arith.constant 0 : index
    %c1_33 = arith.constant 1 : index
    %c0_34 = arith.constant 0 : index
    %24 = vector.load %arg8[%c0_32, %c1_33, %c0_34] : memref<18x18x4xf32, #tpu.memory_space<vmem>>, vector<16x16x4xf32>
    %25 = vector.shape_cast %24 : vector<16x16x4xf32> to vector<256x4xf32>
    %c1_35 = arith.constant 1 : index
    %c0_36 = arith.constant 0 : index
    %c0_37 = arith.constant 0 : index
    %26 = vector.load %arg4[%c1_35, %c0_36, %c0_37] : memref<9x4x8xf32, #tpu.memory_space<vmem>>, vector<1x4x8xf32>
    %27 = vector.shape_cast %26 : vector<1x4x8xf32> to vector<4x8xf32>
    %cst_38 = arith.constant dense<0.000000e+00> : vector<256x8xf32>
    %28 = tpu.matmul %25, %27, %cst_38 {dimension_numbers = #tpu.dot_dimension_numbers<[1], [0], [0], [1], [0, 0, 1, 1], [], []>} : vector<256x4xf32>, vector<4x8xf32>, vector<256x8xf32> -> vector<256x8xf32>
    %29 = arith.addf %23, %28 : vector<256x8xf32>
    %c0_39 = arith.constant 0 : index
    %c2 = arith.constant 2 : index
    %c0_40 = arith.constant 0 : index
    %30 = vector.load %arg8[%c0_39, %c2, %c0_40] : memref<18x18x4xf32, #tpu.memory_space<vmem>>, vector<16x16x4xf32>
    %31 = vector.shape_cast %30 : vector<16x16x4xf32> to vector<256x4xf32>
    %c2_41 = arith.constant 2 : index
    %c0_42 = arith.constant 0 : index
    %c0_43 = arith.constant 0 : index
    %32 = vector.load %arg4[%c2_41, %c0_42, %c0_43] : memref<9x4x8xf32, #tpu.memory_space<vmem>>, vector<1x4x8xf32>
    %33 = vector.shape_cast %32 : vector<1x4x8xf32> to vector<4x8xf32>
    %cst_44 = arith.constant dense<0.000000e+00> : vector<256x8xf32>
    %34 = tpu.matmul %31, %33, %cst_44 {dimension_numbers = #tpu.dot_dimension_numbers<[1], [0], [0], [1], [0, 0, 1, 1], [], []>} : vector<256x4xf32>, vector<4x8xf32>, vector<256x8xf32> -> vector<256x8xf32>
    %35 = arith.addf %29, %34 : vector<256x8xf32>
    %c1_45 = arith.constant 1 : index
    %c0_46 = arith.constant 0 : index
    %c0_47 = arith.constant 0 : index
    %36 = vector.load %arg8[%c1_45, %c0_46, %c0_47] : memref<18x18x4xf32, #tpu.memory_space<vmem>>, vector<16x16x4xf32>
    %37 = vector.shape_cast %36 : vector<16x16x4xf32> to vector<256x4xf32>
    %c3 = arith.constant 3 : index
    %c0_48 = arith.constant 0 : index
    %c0_49 = arith.constant 0 : index
    %38 = vector.load %arg4[%c3, %c0_48, %c0_49] : memref<9x4x8xf32, #tpu.memory_space<vmem>>, vector<1x4x8xf32>
    %39 = vector.shape_cast %38 : vector<1x4x8xf32> to vector<4x8xf32>
    %cst_50 = arith.constant dense<0.000000e+00> : vector<256x8xf32>
    %40 = tpu.matmul %37, %39, %cst_50 {dimension_numbers = #tpu.dot_dimension_numbers<[1], [0], [0], [1], [0, 0, 1, 1], [], []>} : vector<256x4xf32>, vector<4x8xf32>, vector<256x8xf32> -> vector<256x8xf32>
    %41 = arith.addf %35, %40 : vector<256x8xf32>
    %c1_51 = arith.constant 1 : index
    %c1_52 = arith.constant 1 : index
    %c0_53 = arith.constant 0 : index
    %42 = vector.load %arg8[%c1_51, %c1_52, %c0_53] : memref<18x18x4xf32, #tpu.memory_space<vmem>>, vector<16x16x4xf32>
    %43 = vector.shape_cast %42 : vector<16x16x4xf32> to vector<256x4xf32>
    %c4 = arith.constant 4 : index
    %c0_54 = arith.constant 0 : index
    %c0_55 = arith.constant 0 : index
    %44 = vector.load %arg4[%c4, %c0_54, %c0_55] : memref<9x4x8xf32, #tpu.memory_space<vmem>>, vector<1x4x8xf32>
    %45 = vector.shape_cast %44 : vector<1x4x8xf32> to vector<4x8xf32>
    %cst_56 = arith.constant dense<0.000000e+00> : vector<256x8xf32>
    %46 = tpu.matmul %43, %45, %cst_56 {dimension_numbers = #tpu.dot_dimension_numbers<[1], [0], [0], [1], [0, 0, 1, 1], [], []>} : vector<256x4xf32>, vector<4x8xf32>, vector<256x8xf32> -> vector<256x8xf32>
    %47 = arith.addf %41, %46 : vector<256x8xf32>
    %c1_57 = arith.constant 1 : index
    %c2_58 = arith.constant 2 : index
    %c0_59 = arith.constant 0 : index
    %48 = vector.load %arg8[%c1_57, %c2_58, %c0_59] : memref<18x18x4xf32, #tpu.memory_space<vmem>>, vector<16x16x4xf32>
    %49 = vector.shape_cast %48 : vector<16x16x4xf32> to vector<256x4xf32>
    %c5 = arith.constant 5 : index
    %c0_60 = arith.constant 0 : index
    %c0_61 = arith.constant 0 : index
    %50 = vector.load %arg4[%c5, %c0_60, %c0_61] : memref<9x4x8xf32, #tpu.memory_space<vmem>>, vector<1x4x8xf32>
    %51 = vector.shape_cast %50 : vector<1x4x8xf32> to vector<4x8xf32>
    %cst_62 = arith.constant dense<0.000000e+00> : vector<256x8xf32>
    %52 = tpu.matmul %49, %51, %cst_62 {dimension_numbers = #tpu.dot_dimension_numbers<[1], [0], [0], [1], [0, 0, 1, 1], [], []>} : vector<256x4xf32>, vector<4x8xf32>, vector<256x8xf32> -> vector<256x8xf32>
    %53 = arith.addf %47, %52 : vector<256x8xf32>
    %c2_63 = arith.constant 2 : index
    %c0_64 = arith.constant 0 : index
    %c0_65 = arith.constant 0 : index
    %54 = vector.load %arg8[%c2_63, %c0_64, %c0_65] : memref<18x18x4xf32, #tpu.memory_space<vmem>>, vector<16x16x4xf32>
    %55 = vector.shape_cast %54 : vector<16x16x4xf32> to vector<256x4xf32>
    %c6 = arith.constant 6 : index
    %c0_66 = arith.constant 0 : index
    %c0_67 = arith.constant 0 : index
    %56 = vector.load %arg4[%c6, %c0_66, %c0_67] : memref<9x4x8xf32, #tpu.memory_space<vmem>>, vector<1x4x8xf32>
    %57 = vector.shape_cast %56 : vector<1x4x8xf32> to vector<4x8xf32>
    %cst_68 = arith.constant dense<0.000000e+00> : vector<256x8xf32>
    %58 = tpu.matmul %55, %57, %cst_68 {dimension_numbers = #tpu.dot_dimension_numbers<[1], [0], [0], [1], [0, 0, 1, 1], [], []>} : vector<256x4xf32>, vector<4x8xf32>, vector<256x8xf32> -> vector<256x8xf32>
    %59 = arith.addf %53, %58 : vector<256x8xf32>
    %c2_69 = arith.constant 2 : index
    %c1_70 = arith.constant 1 : index
    %c0_71 = arith.constant 0 : index
    %60 = vector.load %arg8[%c2_69, %c1_70, %c0_71] : memref<18x18x4xf32, #tpu.memory_space<vmem>>, vector<16x16x4xf32>
    %61 = vector.shape_cast %60 : vector<16x16x4xf32> to vector<256x4xf32>
    %c7 = arith.constant 7 : index
    %c0_72 = arith.constant 0 : index
    %c0_73 = arith.constant 0 : index
    %62 = vector.load %arg4[%c7, %c0_72, %c0_73] : memref<9x4x8xf32, #tpu.memory_space<vmem>>, vector<1x4x8xf32>
    %63 = vector.shape_cast %62 : vector<1x4x8xf32> to vector<4x8xf32>
    %cst_74 = arith.constant dense<0.000000e+00> : vector<256x8xf32>
    %64 = tpu.matmul %61, %63, %cst_74 {dimension_numbers = #tpu.dot_dimension_numbers<[1], [0], [0], [1], [0, 0, 1, 1], [], []>} : vector<256x4xf32>, vector<4x8xf32>, vector<256x8xf32> -> vector<256x8xf32>
    %65 = arith.addf %59, %64 : vector<256x8xf32>
    %c2_75 = arith.constant 2 : index
    %c2_76 = arith.constant 2 : index
    %c0_77 = arith.constant 0 : index
    %66 = vector.load %arg8[%c2_75, %c2_76, %c0_77] : memref<18x18x4xf32, #tpu.memory_space<vmem>>, vector<16x16x4xf32>
    %67 = vector.shape_cast %66 : vector<16x16x4xf32> to vector<256x4xf32>
    %c8 = arith.constant 8 : index
    %c0_78 = arith.constant 0 : index
    %c0_79 = arith.constant 0 : index
    %68 = vector.load %arg4[%c8, %c0_78, %c0_79] : memref<9x4x8xf32, #tpu.memory_space<vmem>>, vector<1x4x8xf32>
    %69 = vector.shape_cast %68 : vector<1x4x8xf32> to vector<4x8xf32>
    %cst_80 = arith.constant dense<0.000000e+00> : vector<256x8xf32>
    %70 = tpu.matmul %67, %69, %cst_80 {dimension_numbers = #tpu.dot_dimension_numbers<[1], [0], [0], [1], [0, 0, 1, 1], [], []>} : vector<256x4xf32>, vector<4x8xf32>, vector<256x8xf32> -> vector<256x8xf32>
    %71 = arith.addf %65, %70 : vector<256x8xf32>
    %72 = vector.shape_cast %71 : vector<256x8xf32> to vector<16x16x8xf32>
    %c0_81 = arith.constant 0 : index
    %c0_82 = arith.constant 0 : index
    %c0_83 = arith.constant 0 : index
    %c0_84 = arith.constant 0 : index
    %73 = vector.load %arg6[%c0_81, %c0_82, %c0_83, %c0_84] : memref<1x16x16x8xf32, #tpu.memory_space<vmem>>, vector<1x16x16x8xf32>
    %74 = vector.shape_cast %73 : vector<1x16x16x8xf32> to vector<16x16x8xf32>
    %75 = vector.shape_cast %72 : vector<16x16x8xf32> to vector<1x16x16x8xf32>
    tpu.vector_store %arg6[%c0_81, %c0_82, %c0_83, %c0_84], %75 {strides = array<i32>} : memref<1x16x16x8xf32, #tpu.memory_space<vmem>>, vector<1x16x16x8xf32>,
    %c1_85 = arith.constant 1 : index
    %c1_86 = arith.constant 1 : index
    %c0_87 = arith.constant 0 : index
    %76 = vector.load %arg8[%c1_85, %c1_86, %c0_87] : memref<18x18x4xf32, #tpu.memory_space<vmem>>, vector<16x16x4xf32>
    %77 = vector.shape_cast %76 : vector<16x16x4xf32> to vector<256x4xf32>
    %c0_88 = arith.constant 0 : index
    %c0_89 = arith.constant 0 : index
    %c0_90 = arith.constant 0 : index
    %78 = vector.load %arg5[%c0_88, %c0_89, %c0_90] : memref<1x4x8xf32, #tpu.memory_space<vmem>>, vector<1x4x8xf32>
    %79 = vector.shape_cast %78 : vector<1x4x8xf32> to vector<4x8xf32>
    %cst_91 = arith.constant dense<0.000000e+00> : vector<256x8xf32>
    %80 = tpu.matmul %77, %79, %cst_91 {dimension_numbers = #tpu.dot_dimension_numbers<[1], [0], [0], [1], [0, 0, 1, 1], [], []>} : vector<256x4xf32>, vector<4x8xf32>, vector<256x8xf32> -> vector<256x8xf32>
    %81 = vector.shape_cast %80 : vector<256x8xf32> to vector<16x16x8xf32>
    %c0_92 = arith.constant 0 : index
    %c0_93 = arith.constant 0 : index
    %c0_94 = arith.constant 0 : index
    %c0_95 = arith.constant 0 : index
    %82 = vector.load %arg7[%c0_92, %c0_93, %c0_94, %c0_95] : memref<1x16x16x8xf32, #tpu.memory_space<vmem>>, vector<1x16x16x8xf32>
    %83 = vector.shape_cast %82 : vector<1x16x16x8xf32> to vector<16x16x8xf32>
    %84 = vector.shape_cast %81 : vector<16x16x8xf32> to vector<1x16x16x8xf32>
    tpu.vector_store %arg7[%c0_92, %c0_93, %c0_94, %c0_95], %84 {strides = array<i32>} : memref<1x16x16x8xf32, #tpu.memory_space<vmem>>, vector<1x16x16x8xf32>,
    return
  }
  func.func @transform_0(%arg0: i32) -> (i32, i32, i32, i32) {
    %c0_i32 = arith.constant 0 : i32
    %c0_i32_0 = arith.constant 0 : i32
    %c0_i32_1 = arith.constant 0 : i32
    %c0_i32_2 = arith.constant 0 : i32
    return %arg0, %c0_i32, %c0_i32_0, %c0_i32_1 : i32, i32, i32, i32
  }
  func.func @transform_1(%arg0: i32) -> (i32, i32, i32) {
    %c0_i32 = arith.constant 0 : i32
    %c0_i32_0 = arith.constant 0 : i32
    %c0_i32_1 = arith.constant 0 : i32
    %c0_i32_2 = arith.constant 0 : i32
    return %c0_i32, %c0_i32_0, %c0_i32_1 : i32, i32, i32
  }
  func.func @transform_2(%arg0: i32) -> (i32, i32, i32) {
    %c0_i32 = arith.constant 0 : i32
    %c0_i32_0 = arith.constant 0 : i32
    %c0_i32_1 = arith.constant 0 : i32
    %c0_i32_2 = arith.constant 0 : i32
    return %c0_i32, %c0_i32_0, %c0_i32_1 : i32, i32, i32
  }
  func.func @transform_3(%arg0: i32) -> (i32, i32, i32) {
    %c0_i32 = arith.constant 0 : i32
    %c0_i32_0 = arith.constant 0 : i32
    %c0_i32_1 = arith.constant 0 : i32
    %c0_i32_2 = arith.constant 0 : i32
    return %c0_i32, %c0_i32_0, %c0_i32_1 : i32, i32, i32
  }
  func.func @transform_4(%arg0: i32) -> (i32, i32, i32) {
    %c0_i32 = arith.constant 0 : i32
    %c0_i32_0 = arith.constant 0 : i32
    %c0_i32_1 = arith.constant 0 : i32
    %c0_i32_2 = arith.constant 0 : i32
    return %c0_i32, %c0_i32_0, %c0_i32_1 : i32, i32, i32
  }
  func.func @transform_5(%arg0: i32) -> (i32, i32, i32, i32) {
    %c0_i32 = arith.constant 0 : i32
    %c0_i32_0 = arith.constant 0 : i32
    %c0_i32_1 = arith.constant 0 : i32
    %c0_i32_2 = arith.constant 0 : i32
    return %arg0, %c0_i32, %c0_i32_0, %c0_i32_1 : i32, i32, i32, i32
  }
  func.func @transform_6(%arg0: i32) -> (i32, i32, i32, i32) {
    %c0_i32 = arith.constant 0 : i32
    %c0_i32_0 = arith.constant 0 : i32
    %c0_i32_1 = arith.constant 0 : i32
    %c0_i32_2 = arith.constant 0 : i32
    return %arg0, %c0_i32, %c0_i32_0, %c0_i32_1 : i32, i32, i32, i32
  }
}

</mosaic_0001>

<bundles_post_ra>
// kernel: tpu_custom_call.1
= control target key start
LH: loop header
LB: loop body
LE: loop exit
PB: predicated region body
PF: predicated region fallthrough
CT: control target
= control target key end

     0   :  { %12 = vsyncpa [#allocation4], 0  ;;  %s3311_s0 = inlined_call_operand.vmem [shape: f32[2,16,16,4], index: 0, kind: input, shape index: {}]   ;;  %s3312_s1 = inlined_call_operand.vmem [shape: f32[1,1,4], index: 1, kind: input, shape index: {}]   ;;  %s3313_s2 = inlined_call_operand.vmem [shape: f32[1,1,4], index: 2, kind: input, shape index: {}]   ;;  %s3314_s3 = inlined_call_operand.vmem [shape: f32[9,4,8], index: 3, kind: input, shape index: {}]   ;;  %s3315_s4 = inlined_call_operand.vmem [shape: f32[1,4,8], index: 4, kind: input, shape index: {}]   ;;  %s3316_s5 = inlined_call_operand.hbm [shape: f32[2,8,8,8], index: 5, kind: output, shape index: {0}]   ;;  %s3317_s6 = inlined_call_operand.hbm [shape: f32[2,8,8,8], index: 6, kind: output, shape index: {1}]  }
   0x1   :  { %14 = vsyncpa [#allocation4 + $0x1], 0 }
   0x2   :  { %15 = vsyncpa [#allocation6], 0 }
   0x3   :  { %17 = vsyncpa [#allocation6 + $0x1], 0  ;;  %s2815_s21 = smov 0   ;;  %s2817_s22 = smov 0  }
   0x4   :  { %s2819_s23 = smov 0   ;;  %s2821_s24 = smov 0  }
   0x5 LB: > { %s2836_s25 = sadd.s32 4294967295, %s2773_s24   ;;  %s2219_s26 = sadd.s32 4294967294, %s2773_s24   ;;  %s2773_s24 = sphi %s2821_s24, %s3323_s24   ;;  %s2769_s23 = sphi %s2819_s23, %s3322_s23   ;;  %s2765_s22 = sphi %s2817_s22, %s3321_s22   ;;  %s2761_s21 = sphi %s2815_s21, %s3320_s21  }
   0x6   : > { %s2840_s27 = sadd.s32 1, %s2773_s24   ;;  %s140_s28 = sadd.s32 1, %s2769_s23 }
   0x7   : > { %s137_s29 = ssub.s32 %s2773_s24, %s2840_s27  ;;  %p150_p0 = scmp.ne.s32.totalorder %s2769_s23, %s2765_s22 }
   0x8   : > { %p138_p1 = scmp.eq.s32.totalorder %s137_s29, 0  ;;  %p151_p2 = scmp.eq.s32.totalorder %s2836_s25, 1 }
   0x9   : > { %p156_p3 = scmp.ne.s32.totalorder %s2765_s22, %s2761_s21  ;;  %p157_p4 = scmp.eq.s32.totalorder %s2219_s26, 1 }
   0xa   : > { %s2851_s30 = scalar_select %p138_p1, %s2769_s23, %s140_s28  }
   0xb   : > { %p2853_p5 = por %p151_p2, %p150_p0  ;;  %p2857_p6 = por %p157_p4, %p156_p3 }
   0xc   : > { %p2222_p7 = scmp.ge.s32.totalorder %s2773_s24, 1  ;;  %p221_p8 = scmp.lt.s32.totalorder %s2773_s24, 3 }
   0xe   : > { %p222_p9 = pnand %p2222_p7, %p221_p8 }
   0xf   : > { %v2229_v0 = vld [vmem:[%s3314_s3 + $0x4] sm:$0xf] (!%p222_p9)  ;;  %vm540_vm0 = vcmask (!%p222_p9), 1043456   ;;  %v2268_v1 = vld [vmem:[%s3314_s3 + $0x10] sm:$0xf] (!%p222_p9)  ;;  %vm403_vm1 = vcmask (!%p222_p9), 31744  }
  0x10   : > { %225 = sbr.rel (%p222_p9) target bundleno = 377 (0x179), region = 40  ;;  %2428 = vmatprep.subr.msk.mxu1 (!%p222_p9), %vm540_vm0, %v2229_v0  ;;  %2484 = vmatprep.subr.msk.mxu0 (!%p222_p9), %vm540_vm0, %v2268_v1  ;;  %p256_p10 = scmp.lt.s32.totalorder (!%p222_p9), %s2836_s25, 1  ;;  %v2775_v2 = vmov (!%p222_p9), 0.0   ;;  %v2879_v3 = vld [vmem:[%s3314_s3 + $0x14] sm:$0xf] (!%p222_p9)  ;;  %vm412_vm2 = vcmask (!%p222_p9), 24576  }
  0x11   : > { %2429 = vmatpush3.msk.msra.mxu1 (!%p222_p9), %vm540_vm0, %v2229_v0  ;;  %404 = vst.msk [vmem:[#allocation2] sm:$0xff] (!%p222_p9), %vm403_vm1, %v2775_v2  ;;  %405 = vst.msk [vmem:[#allocation2 + $0x8] sm:$0xff] (!%p222_p9), %vm403_vm1, %v2775_v2  ;;  %2485 = vmatpush3.msk.msra.mxu0 (!%p222_p9), %vm540_vm0, %v2268_v1  ;;  %v2884_v4 = vld [vmem:[%s3314_s3] sm:$0xf] (!%p222_p9)  ;;  %vm406_vm3 = vcmask (!%p222_p9), 25600   ;;  %vm1886_vm4 = vcmask (!%p222_p9), 64512  }
  0x12   : > { %2498 = vmatprep.subr.msk.mxu0 (!%p222_p9), %vm540_vm0, %v2879_v3  ;;  %2442 = vmatprep.subr.msk.mxu1 (!%p222_p9), %vm540_vm0, %v2884_v4  ;;  %413 = vst.msk [vmem:[#allocation2] sm:$0x1] (!%p222_p9), %vm412_vm2, %v2775_v2  ;;  %414 = vst.msk [vmem:[#allocation2 + $0x18] sm:$0x1] (!%p222_p9), %vm412_vm2, %v2775_v2  ;;  %v2912_v5 = vld [vmem:[%s3312_s1] ss:$0 sm:$0xff] (!%p222_p9) }
  0x13   : > { %415 = vst.msk [vmem:[#allocation2 + $0x30] sm:$0x1] (!%p222_p9), %vm412_vm2, %v2775_v2  ;;  %416 = vst.msk [vmem:[#allocation2 + $0x48] sm:$0x1] (!%p222_p9), %vm412_vm2, %v2775_v2  ;;  %v2922_v6 = vld [vmem:[%s3313_s2] ss:$0 sm:$0xff] (!%p222_p9) }
  0x14   : > { %417 = vst.msk [vmem:[#allocation2 + $0x60] sm:$0x1] (!%p222_p9), %vm412_vm2, %v2775_v2  ;;  %418 = vst.msk [vmem:[#allocation2 + $0x78] sm:$0x1] (!%p222_p9), %vm412_vm2, %v2775_v2  ;;  %s2336_s12 = sshll.u32 (!%p222_p9), %s2836_s25, 10  ;;  %s2776_s20 = smov (!%p222_p9), [#allocation5]  }
  0x15   : > { %419 = vst.msk [vmem:[#allocation2 + $0x90] sm:$0x1] (!%p222_p9), %vm412_vm2, %v2775_v2  ;;  %420 = vst.msk [vmem:[#allocation2 + $0xa8] sm:$0x1] (!%p222_p9), %vm412_vm2, %v2775_v2  ;;  %s3211_s16 = scalar_lea.hbm (!%p222_p9), %s3317_s6, %s2336_s12  ;;  %s2683_s26 = sshll.u32 (!%p222_p9), %s2776_s20, 4  ;;  %s2684_s26 = int_to_ptr.vmem [resolvable:$false] %s2683_s26 }
  0x16   : > { %421 = vst.msk [vmem:[#allocation2 + $0xc0] sm:$0x1] (!%p222_p9), %vm412_vm2, %v2775_v2  ;;  %422 = vst.msk [vmem:[#allocation2 + $0xd8] sm:$0x1] (!%p222_p9), %vm412_vm2, %v2775_v2  ;;  %s2685_s28 = scalar_lea.vmem (!%p222_p9), %s2684_s26, 2048 }
  0x17   : > { %s257_s17 = scalar_select %p256_p10, %s2836_s25, 1  ;;  %423 = vst.msk [vmem:[#allocation2 + $0xf0] sm:$0x1] %vm412_vm2, %v2775_v2  ;;  %424 = vst.msk [vmem:[#allocation2 + $0x108] sm:$0x1] %vm412_vm2, %v2775_v2 }
  0x18   : > { %425 = vst.msk [vmem:[#allocation2 + $0x120] sm:$0x1] %vm412_vm2, %v2775_v2  ;;  %426 = vst.msk [vmem:[#allocation2 + $0x138] sm:$0x1] %vm412_vm2, %v2775_v2  ;;  %v499_v16 = vld [vmem:[#allocation2 + $0x1] ss:$2 sm:$0xff] }
  0x19   : > { %427 = vst.msk [vmem:[#allocation2 + $0x150] sm:$0x1] %vm412_vm2, %v2775_v2  ;;  %428 = vst.msk [vmem:[#allocation2 + $0x168] sm:$0x1] %vm412_vm2, %v2775_v2  ;;  %s2335_s18 = sshll.u32 %s257_s17, 8  ;;  %2430 = vmatprep.mubr.msk.f32.mxu1 %vm403_vm1, %v499_v16 }
  0x1a   : > { %429 = vst.msk [vmem:[#allocation2 + $0x180] sm:$0x1] %vm412_vm2, %v2775_v2  ;;  %s2917_s29 = scalar_lea.vmem %s3311_s0, %s2335_s18 }
  0x1b   : > { %407 = vst.msk [vmem:[#allocation2 + $0x10] sm:$0x3] %vm406_vm3, %v2775_v2  ;;  %v263_v7 = vld [vmem:[%s2917_s29 + $0x10] sm:$0xff]  ;;  %v264_v8 = vld [vmem:[%s2917_s29 + $0x18] sm:$0xff]  ;;  %v261_v9 = vld [vmem:[%s2917_s29] sm:$0xff] }
  0x1c   : > { %v302_v10 = vmul.f32 %v2912_v5, %v263_v7  ;;  %v303_v11 = vmul.f32 %v2912_v5, %v264_v8  ;;  %v262_v12 = vld [vmem:[%s2917_s29 + $0x8] sm:$0xff]  ;;  %v300_v13 = vmul.f32 %v2912_v5, %v261_v9  ;;  %v265_v14 = vld [vmem:[%s2917_s29 + $0x20] sm:$0xff]  ;;  %v267_v20 = vld [vmem:[%s2917_s29 + $0x30] sm:$0xff] }
  0x1d   : > { %v266_v15 = vld [vmem:[%s2917_s29 + $0x28] sm:$0xff]  ;;  %v301_v17 = vmul.f32 %v2912_v5, %v262_v12  ;;  %v304_v18 = vmul.f32 %v2912_v5, %v265_v14  ;;  %v268_v21 = vld [vmem:[%s2917_s29 + $0x38] sm:$0xff]  ;;  %v306_v25 = vmul.f32 %v2912_v5, %v267_v20  ;;  %v271_v30 = vld [vmem:[%s2917_s29 + $0x50] sm:$0xff] }
  0x1e   : > { %v305_v19 = vmul.f32 %v2912_v5, %v266_v15  ;;  %v341_v22 = vadd.f32 %v2922_v6, %v302_v10  ;;  %v342_v23 = vadd.f32 %v2922_v6, %v303_v11  ;;  %v339_v24 = vadd.f32 %v2922_v6, %v300_v13  ;;  %v272_v31 = vld [vmem:[%s2917_s29 + $0x58] sm:$0xff]  ;;  %v269_v32 = vld [vmem:[%s2917_s29 + $0x40] sm:$0xff]  ;;  %v270_v37 = vld [vmem:[%s2917_s29 + $0x48] sm:$0xff] }
  0x1f   : > { %v340_v26 = vadd.f32 %v2922_v6, %v301_v17  ;;  %v343_v27 = vadd.f32 %v2922_v6, %v304_v18  ;;  %v307_v29 = vmul.f32 %v2912_v5, %v268_v21  ;;  %v345_v36 = vadd.f32 %v2922_v6, %v306_v25  ;;  %v273_v38 = vld [vmem:[%s2917_s29 + $0x60] sm:$0xff]  ;;  %v274_v39 = vld [vmem:[%s2917_s29 + $0x68] sm:$0xff]  ;;  %v275_v44 = vld [vmem:[%s2917_s29 + $0x70] sm:$0xff] }
  0x20   : > { %v344_v28 = vadd.f32 %v2922_v6, %v305_v19  ;;  %v373_v33 = vmax.f32 %v341_v22, 0.0  ;;  %v374_v34 = vmax.f32 %v342_v23, 0.0  ;;  %v371_v35 = vmax.f32 %v339_v24, 0.0  ;;  %v276_v49 = vld [vmem:[%s2917_s29 + $0x78] sm:$0xff]  ;;  %v279_v62 = vld [vmem:[%s2917_s29 + $0x90] sm:$0xff]  ;;  %v277_v0 = vld [vmem:[%s2917_s29 + $0x80] sm:$0xff] }
  0x21   : > { %v372_v40 = vmax.f32 %v340_v26, 0.0  ;;  %v375_v41 = vmax.f32 %v343_v27, 0.0  ;;  %v346_v43 = vadd.f32 %v2922_v6, %v307_v29  ;;  %v377_v45 = vmax.f32 %v345_v36, 0.0  ;;  %v280_v63 = vld [vmem:[%s2917_s29 + $0x98] sm:$0xff]  ;;  %v278_v9 = vld [vmem:[%s2917_s29 + $0x88] sm:$0xff]  ;;  %v281_v10 = vld [vmem:[%s2917_s29 + $0xa0] sm:$0xff] }
  0x22   : > { %v376_v42 = vmax.f32 %v344_v28, 0.0  ;;  %452 = vst.msk [vmem:[#allocation2 + $0x31] sm:$0xff] %vm403_vm1, %v373_v33  ;;  %453 = vst.msk [vmem:[#allocation2 + $0x39] sm:$0xff] %vm403_vm1, %v374_v34  ;;  %v310_v46 = vmul.f32 %v2912_v5, %v271_v30  ;;  %v311_v47 = vmul.f32 %v2912_v5, %v272_v31  ;;  %v308_v48 = vmul.f32 %v2912_v5, %v269_v32  ;;  %v282_v11 = vld [vmem:[%s2917_s29 + $0xa8] sm:$0xff]  ;;  %v283_v16 = vld [vmem:[%s2917_s29 + $0xb0] sm:$0xff] }
  0x23   : > { %450 = vst.msk [vmem:[#allocation2 + $0x19] sm:$0xff] %vm403_vm1, %v371_v35  ;;  %451 = vst.msk [vmem:[#allocation2 + $0x21] sm:$0xff] %vm403_vm1, %v372_v40  ;;  %v378_v50 = vmax.f32 %v346_v43, 0.0  ;;  %v309_v51 = vmul.f32 %v2912_v5, %v270_v37  ;;  %v312_v52 = vmul.f32 %v2912_v5, %v273_v38  ;;  %v313_v53 = vmul.f32 %v2912_v5, %v274_v39  ;;  %v2997_v21 = vld [vmem:[%s3314_s3 + $0x8] sm:$0xf]  ;;  %v284_v27 = vld [vmem:[%s2917_s29 + $0xb8] sm:$0xff] }
  0x24   : > { %454 = vst.msk [vmem:[#allocation2 + $0x49] sm:$0xff] %vm403_vm1, %v375_v41  ;;  %455 = vst.msk [vmem:[#allocation2 + $0x51] sm:$0xff] %vm403_vm1, %v376_v42  ;;  %v349_v54 = vadd.f32 %v2922_v6, %v310_v46  ;;  %v350_v55 = vadd.f32 %v2922_v6, %v311_v47  ;;  %v347_v56 = vadd.f32 %v2922_v6, %v308_v48  ;;  %v287_v28 = vld [vmem:[%s2917_s29 + $0xd0] sm:$0xff]  ;;  %v3010_v29 = vld [vmem:[%s3314_s3 + $0x18] sm:$0xf] }
  0x25   : > { %456 = vst.msk [vmem:[#allocation2 + $0x61] sm:$0xff] %vm403_vm1, %v377_v45  ;;  %v314_v57 = vmul.f32 %v2912_v5, %v275_v44  ;;  %457 = vst.msk [vmem:[#allocation2 + $0x69] sm:$0xff] %vm403_vm1, %v378_v50  ;;  %v348_v58 = vadd.f32 %v2922_v6, %v309_v51  ;;  %v351_v59 = vadd.f32 %v2922_v6, %v312_v52  ;;  %v288_v36 = vld [vmem:[%s2917_s29 + $0xd8] sm:$0xff]  ;;  %v285_v40 = vld [vmem:[%s2917_s29 + $0xc0] sm:$0xff] }
  0x26   : > { %v352_v60 = vadd.f32 %v2922_v6, %v313_v53  ;;  %v315_v61 = vmul.f32 %v2912_v5, %v276_v49  ;;  %v381_v1 = vmax.f32 %v349_v54, 0.0  ;;  %v382_v2 = vmax.f32 %v350_v55, 0.0  ;;  %v286_v41 = vld [vmem:[%s2917_s29 + $0xc8] sm:$0xff]  ;;  %v289_v42 = vld [vmem:[%s2917_s29 + $0xe0] sm:$0xff]  ;;  %v291_v55 = vld [vmem:[%s2917_s29 + $0xf0] sm:$0xff] }
  0x27   : > { %v379_v7 = vmax.f32 %v347_v56, 0.0  ;;  %v353_v8 = vadd.f32 %v2922_v6, %v314_v57  ;;  %v380_v12 = vmax.f32 %v348_v58, 0.0  ;;  %v383_v13 = vmax.f32 %v351_v59, 0.0 }
  0x28   : > { %v384_v14 = vmax.f32 %v352_v60, 0.0  ;;  %v354_v15 = vadd.f32 %v2922_v6, %v315_v61  ;;  %460 = vst.msk [vmem:[#allocation2 + $0x91] sm:$0xff] %vm403_vm1, %v381_v1  ;;  %461 = vst.msk [vmem:[#allocation2 + $0x99] sm:$0xff] %vm403_vm1, %v382_v2  ;;  %v318_v18 = vmul.f32 %v2912_v5, %v279_v62  ;;  %v319_v19 = vmul.f32 %v2912_v5, %v280_v63  ;;  %v292_v61 = vld [vmem:[%s2917_s29 + $0xf8] sm:$0xff] }
  0x29   : > { %458 = vst.msk [vmem:[#allocation2 + $0x79] sm:$0xff] %vm403_vm1, %v379_v7  ;;  %v385_v17 = vmax.f32 %v353_v8, 0.0  ;;  %v316_v20 = vmul.f32 %v2912_v5, %v277_v0  ;;  %v501_v22 = vld [vmem:[#allocation2 + $0x31] ss:$2 sm:$0xff]  ;;  %459 = vst.msk [vmem:[#allocation2 + $0x81] sm:$0xff] %vm403_vm1, %v380_v12  ;;  %v317_v24 = vmul.f32 %v2912_v5, %v278_v9  ;;  %v320_v25 = vmul.f32 %v2912_v5, %v281_v10 }
  0x2a   : > { %462 = vst.msk [vmem:[#allocation2 + $0xa9] sm:$0xff] %vm403_vm1, %v383_v13  ;;  %463 = vst.msk [vmem:[#allocation2 + $0xb1] sm:$0xff] %vm403_vm1, %v384_v14  ;;  %v386_v23 = vmax.f32 %v354_v15, 0.0  ;;  %v321_v26 = vmul.f32 %v2912_v5, %v282_v11  ;;  %2431 = vmatmul.mubr.msk.f32.vlgmr.msra.gmra.mrb[0].mxu1 %vm403_vm1, %v501_v22  ;;  %v1097_v30 = vld [vmem:[#allocation2 + $0x19] ss:$2 sm:$0xff]  ;;  %v357_v32 = vadd.f32 %v2922_v6, %v318_v18 }
  0x2b   : > { %v1099_v31 = vld [vmem:[#allocation2 + $0x49] ss:$2 sm:$0xff]  ;;  %464 = vst.msk [vmem:[#allocation2 + $0xc1] sm:$0xff] %vm403_vm1, %v385_v17  ;;  %v358_v33 = vadd.f32 %v2922_v6, %v319_v19  ;;  %v355_v34 = vadd.f32 %v2922_v6, %v316_v20  ;;  %v322_v35 = vmul.f32 %v2912_v5, %v283_v16  ;;  %2486 = vmatprep.mubr.msk.f32.mxu0 %vm403_vm1, %v1097_v30 }
  0x2c   : > { %2443 = vmatpush3.msk.msra.mxu1 %vm540_vm0, %v2884_v4  ;;  %465 = vst.msk [vmem:[#allocation2 + $0xc9] sm:$0xff] %vm403_vm1, %v386_v23  ;;  %v356_v37 = vadd.f32 %v2922_v6, %v317_v24  ;;  %v359_v38 = vadd.f32 %v2922_v6, %v320_v25  ;;  %v360_v39 = vadd.f32 %v2922_v6, %v321_v26  ;;  %v503_v43 = vld [vmem:[#allocation2 + $0x61] ss:$2 sm:$0xff]  ;;  %v389_v44 = vmax.f32 %v357_v32, 0.0  ;;  %v1255_v32 = vld [vmem:[#allocation2 + $0x1a] ss:$2 sm:$0xff] }
  0x2d   : > { %2487 = vmatmul.mubr.msk.f32.vlgmr.msra.gmra.mrb[0].mxu0 %vm403_vm1, %v1099_v31  ;;  %v390_v45 = vmax.f32 %v358_v33, 0.0  ;;  %v387_v46 = vmax.f32 %v355_v34, 0.0  ;;  %v323_v47 = vmul.f32 %v2912_v5, %v284_v27  ;;  %v290_v4 = vld [vmem:[%s2917_s29 + $0xe8] sm:$0xff]  ;;  %2456 = vmatprep.subr.msk.mxu1 %vm540_vm0, %v2997_v21  ;;  %v361_v51 = vadd.f32 %v2922_v6, %v322_v35  ;;  %v484_v33 = vld [vmem:[#allocation2 + $0x30] ss:$2 sm:$0xff]  ;;  %s3175_s29 = sand.u32 1, %s2765_s22  }
  0x2e   : > { %2499 = vmatpush3.msk.msra.mxu0 %vm540_vm0, %v2879_v3  ;;  %2433 = vmatprep.mubr.msk.f32.mxu1 %vm403_vm1, %v503_v43  ;;  %v388_v48 = vmax.f32 %v356_v37, 0.0  ;;  %v391_v49 = vmax.f32 %v359_v38, 0.0  ;;  %v392_v50 = vmax.f32 %v360_v39, 0.0  ;;  %468 = vst.msk [vmem:[#allocation2 + $0xf1] sm:$0xff] %vm403_vm1, %v389_v44  ;;  %v326_v53 = vmul.f32 %v2912_v5, %v287_v28  ;;  %v486_v34 = vld [vmem:[#allocation2 + $0x60] ss:$2 sm:$0xff] }
  0x2f   : > { %469 = vst.msk [vmem:[#allocation2 + $0xf9] sm:$0xff] %vm403_vm1, %v390_v45  ;;  %466 = vst.msk [vmem:[#allocation2 + $0xd9] sm:$0xff] %vm403_vm1, %v387_v46  ;;  %v362_v52 = vadd.f32 %v2922_v6, %v323_v47  ;;  %v327_v3 = vmul.f32 %v2912_v5, %v288_v36  ;;  %v324_v54 = vmul.f32 %v2912_v5, %v285_v40  ;;  %2512 = vmatprep.subr.msk.mxu0 %vm540_vm0, %v3010_v29  ;;  %v505_v56 = vld [vmem:[#allocation2 + $0x91] ss:$2 sm:$0xff]  ;;  %v1257_v35 = vld [vmem:[#allocation2 + $0x4a] ss:$2 sm:$0xff] }
  0x30   : > { %467 = vst.msk [vmem:[#allocation2 + $0xe1] sm:$0xff] %vm403_vm1, %v388_v48  ;;  %470 = vst.msk [vmem:[#allocation2 + $0x109] sm:$0xff] %vm403_vm1, %v391_v49  ;;  %v393_v57 = vmax.f32 %v361_v51, 0.0  ;;  %v325_v58 = vmul.f32 %v2912_v5, %v286_v41  ;;  %v328_v59 = vmul.f32 %v2912_v5, %v289_v42  ;;  %v329_v60 = vmul.f32 %v2912_v5, %v290_v4  ;;  %v1101_v62 = vld [vmem:[#allocation2 + $0x79] ss:$2 sm:$0xff]  ;;  %s2223_s9 = sshll.u32 %s3175_s29, 6 }
  0x31   : > { %471 = vst.msk [vmem:[#allocation2 + $0x111] sm:$0xff] %vm403_vm1, %v392_v50  ;;  %2434 = vmatmul.mubr.msk.f32.gmra.mrb[2].mxu1 %vm403_vm1, %v505_v56  ;;  %v1103_v63 = vld [vmem:[#allocation2 + $0xa9] ss:$2 sm:$0xff]  ;;  %v394_v0 = vmax.f32 %v362_v52, 0.0  ;;  %v365_v1 = vadd.f32 %v2922_v6, %v326_v53  ;;  %v366_v2 = vadd.f32 %v2922_v6, %v327_v3  ;;  %v363_v7 = vadd.f32 %v2922_v6, %v324_v54  ;;  %v1259_v37 = vld [vmem:[#allocation2 + $0x7a] ss:$2 sm:$0xff] }
  0x32   : > { %2489 = vmatprep.mubr.msk.f32.mxu0 %vm403_vm1, %v1101_v62  ;;  %472 = vst.msk [vmem:[#allocation2 + $0x121] sm:$0xff] %vm403_vm1, %v393_v57  ;;  %v364_v8 = vadd.f32 %v2922_v6, %v325_v58  ;;  %v367_v9 = vadd.f32 %v2922_v6, %v328_v59  ;;  %v368_v10 = vadd.f32 %v2922_v6, %v329_v60  ;;  %v2258_v36 = vld [vmem:[%s3314_s3 + $0xc] sm:$0xf]  ;;  %v488_v38 = vld [vmem:[#allocation2 + $0x90] ss:$2 sm:$0xff]  ;;  %s3180_s10 = scalar_lea.vmem [#allocation5], %s2223_s9 }
  0x33   : > { %v330_v11 = vmul.f32 %v2912_v5, %v291_v55  ;;  %2490 = vmatmul.mubr.msk.f32.gmra.mrb[2].mxu0 %vm403_vm1, %v1103_v63  ;;  %v507_v12 = vld [vmem:[#allocation2 + $0xc1] ss:$2 sm:$0xff]  ;;  %473 = vst.msk [vmem:[#allocation2 + $0x129] sm:$0xff] %vm403_vm1, %v394_v0  ;;  %v397_v13 = vmax.f32 %v365_v1, 0.0  ;;  %v398_v14 = vmax.f32 %v366_v2, 0.0  ;;  %v395_v15 = vmax.f32 %v363_v7, 0.0 }
  0x34   : > { %v331_v16 = vmul.f32 %v2912_v5, %v292_v61  ;;  %2436 = vmatprep.mubr.msk.f32.mxu1 %vm403_vm1, %v507_v12  ;;  %v396_v17 = vmax.f32 %v364_v8, 0.0  ;;  %v399_v18 = vmax.f32 %v367_v9, 0.0  ;;  %v400_v19 = vmax.f32 %v368_v10, 0.0  ;;  %v2298_v39 = vld [vmem:[%s3314_s3 + $0x1c] sm:$0xf]  ;;  %s3186_s11 = scalar_lea.vmem [#allocation3], %s2223_s9 }
  0x35   : > { %v369_v20 = vadd.f32 %v2922_v6, %v330_v11  ;;  %476 = vst.msk [vmem:[#allocation2 + $0x151] sm:$0xff] %vm403_vm1, %v397_v13  ;;  %477 = vst.msk [vmem:[#allocation2 + $0x159] sm:$0xff] %vm403_vm1, %v398_v14  ;;  %v490_v40 = vld [vmem:[#allocation2 + $0xc0] ss:$2 sm:$0xff]  ;;  %v1413_v4 = vld [vmem:[#allocation2 + $0x30] ss:$2 sm:$0xff] }
  0x36   : > { %474 = vst.msk [vmem:[#allocation2 + $0x139] sm:$0xff] %vm403_vm1, %v395_v15  ;;  %v370_v22 = vadd.f32 %v2922_v6, %v331_v16  ;;  %v509_v23 = vld [vmem:[#allocation2 + $0xf1] ss:$2 sm:$0xff]  ;;  %475 = vst.msk [vmem:[#allocation2 + $0x141] sm:$0xff] %vm403_vm1, %v396_v17  ;;  %v482_v6 = vld [vmem:[#allocation2] ss:$2 sm:$0xff] }
  0x37   : > { %478 = vst.msk [vmem:[#allocation2 + $0x169] sm:$0xff] %vm403_vm1, %v399_v18  ;;  %479 = vst.msk [vmem:[#allocation2 + $0x171] sm:$0xff] %vm403_vm1, %v400_v19  ;;  %2437 = vmatmul.mubr.msk.f32.gmra.mrb[4].mxu1 %vm403_vm1, %v509_v23  ;;  %v1105_v5 = vld [vmem:[#allocation2 + $0xd9] ss:$2 sm:$0xff]  ;;  %v401_v25 = vmax.f32 %v369_v20, 0.0  ;;  %s2079_s13 = sshll.u32 %s3180_s10, 4  ;;  %s3213_s13 = int_to_ptr.vmem [resolvable:$true] %s2079_s13 }
  0x38   : > { %v1107_v24 = vld [vmem:[#allocation2 + $0x109] ss:$2 sm:$0xff]  ;;  %2492 = vmatprep.mubr.msk.f32.mxu0 %vm403_vm1, %v1105_v5  ;;  %v402_v26 = vmax.f32 %v370_v22, 0.0  ;;  %v1261_v41 = vld [vmem:[#allocation2 + $0xaa] ss:$2 sm:$0xff]  ;;  %s2063_s17 = sshll.u32 %s3186_s11, 4  ;;  %p2686_p0 = scmp.lt.s32.totalorder %s3213_s13, %s2684_s26  ;;  %s3261_s17 = int_to_ptr.vmem [resolvable:$true] %s2063_s17 }
  0x39   : > { %2493 = vmatmul.mubr.msk.f32.gmra.mrb[4].mxu0 %vm403_vm1, %v1107_v24  ;;  %480 = vst.msk [vmem:[#allocation2 + $0x181] sm:$0xff] %vm403_vm1, %v401_v25  ;;  %v1263_v42 = vld [vmem:[#allocation2 + $0xda] ss:$2 sm:$0xff]  ;;  %v1265_v44 = vld [vmem:[#allocation2 + $0x10a] ss:$2 sm:$0xff]  ;;  %s2050_s18 = scalar_lea.sflag [#allocation6], %s3175_s29 }
  0x3a   : > { %v511_v27 = vld [vmem:[#allocation2 + $0x121] ss:$2 sm:$0xff]  ;;  %481 = vst.msk [vmem:[#allocation2 + $0x189] sm:$0xff] %vm403_vm1, %v402_v26  ;;  %v494_v43 = vld [vmem:[#allocation2 + $0x120] ss:$2 sm:$0xff]  ;;  %s2679_s19 = scalar_lea.vmem %s3213_s13, 1024 }
  0x3b   : > { %2439 = vmatprep.mubr.msk.f32.mxu1 %vm403_vm1, %v511_v27  ;;  %v782_v46 = vld [vmem:[#allocation2 + $0x2] ss:$2 sm:$0xff]  ;;  %v784_v48 = vld [vmem:[#allocation2 + $0x32] ss:$2 sm:$0xff]  ;;  %v1571_v0 = vld [vmem:[#allocation2 + $0x31] ss:$2 sm:$0xff]  ;;  %p2680_p11 = scmp.ne.s32.totalorder %s3213_s13, %s2679_s19  ;;  %p2687_p1 = scmp.lt.s32.totalorder %s2685_s28, %s2679_s19 }
  0x3c   : > { %v513_v28 = vld [vmem:[#allocation2 + $0x151] ss:$2 sm:$0xff]  ;;  %v496_v45 = vld [vmem:[#allocation2 + $0x150] ss:$2 sm:$0xff]  ;;  %v1415_v50 = vld [vmem:[#allocation2 + $0x60] ss:$2 sm:$0xff] }
  0x3d   : > { %2440 = vmatmul.mubr.msk.f32.gmra.mrb[6].mxu1 %vm403_vm1, %v513_v28  ;;  %v1109_v30 = vld [vmem:[#allocation2 + $0x139] ss:$2 sm:$0xff]  ;;  %v786_v49 = vld [vmem:[#allocation2 + $0x62] ss:$2 sm:$0xff]  ;;  %v788_v53 = vld [vmem:[#allocation2 + $0x92] ss:$2 sm:$0xff]  ;;  %p2681_p12 = pnand %p2680_p11, %p2853_p5  ;;  %p2688_p2 = por %p2687_p1, %p2686_p0 }
  0x3e   : > { %v1111_v31 = vld [vmem:[#allocation2 + $0x169] ss:$2 sm:$0xff]  ;;  %2495 = vmatprep.mubr.msk.f32.mxu0 %vm403_vm1, %v1109_v30  ;;  %2444 = vmatprep.mubr.msk.f32.mxu1 %vm403_vm1, %v482_v6  ;;  %v1269_v47 = vld [vmem:[#allocation2 + $0x16a] ss:$2 sm:$0xff]  ;;  %v1903_v51 = vld [vmem:[%s3315_s4] sm:$0xf] }
  0x3f   : > { %2496 = vmatmul.mubr.msk.f32.gmra.mrb[6].mxu0 %vm403_vm1, %v1111_v31  ;;  %v1417_v52 = vld [vmem:[#allocation2 + $0x90] ss:$2 sm:$0xff]  ;;  %v2308_v3 = vld [vmem:[%s3314_s3 + $0x20] sm:$0xf]  ;;  %v1575_v8 = vld [vmem:[#allocation2 + $0x91] ss:$2 sm:$0xff]  ;;  %p2682_p13 = pneg %p2681_p12 }
  0x40   : > { %2500 = vmatprep.mubr.msk.f32.mxu0 %vm403_vm1, %v1255_v32  ;;  %v790_v54 = vld [vmem:[#allocation2 + $0xc2] ss:$2 sm:$0xff]  ;;  %v792_v57 = vld [vmem:[#allocation2 + $0xf2] ss:$2 sm:$0xff]  ;;  %v1573_v7 = vld [vmem:[#allocation2 + $0x61] ss:$2 sm:$0xff] }
  0x41   : > { %2445 = vmatmul.mubr.msk.f32.vlgmr.msra.gmra.mrb[0].mxu1 %vm403_vm1, %v484_v33  ;;  %v1419_v55 = vld [vmem:[#allocation2 + $0xc0] ss:$2 sm:$0xff]  ;;  %v1421_v56 = vld [vmem:[#allocation2 + $0xf0] ss:$2 sm:$0xff]  ;;  %v1577_v11 = vld [vmem:[#allocation2 + $0xc1] ss:$2 sm:$0xff]  ;;  %p2689_p3 = pnand %p2688_p2, %p2682_p13 }
  0x42   : > { %2447 = vmatprep.mubr.msk.f32.mxu1 %vm403_vm1, %v486_v34  ;;  %2457 = vmatpush3.msk.msra.mxu1 %vm540_vm0, %v2997_v21  ;;  %v492_v21 = vld [vmem:[#allocation2 + $0xf0] ss:$2 sm:$0xff]  ;;  %v1423_v59 = vld [vmem:[#allocation2 + $0x120] ss:$2 sm:$0xff]  ;;  %v1579_v12 = vld [vmem:[#allocation2 + $0xf1] ss:$2 sm:$0xff] }
  0x43   : > { %2501 = vmatmul.mubr.msk.f32.vlgmr.msra.gmra.mrb[0].mxu0 %vm403_vm1, %v1257_v35  ;;  %2470 = vmatprep.subr.msk.mxu1 %vm540_vm0, %v2258_v36  ;;  %v794_v58 = vld [vmem:[#allocation2 + $0x122] ss:$2 sm:$0xff]  ;;  %v796_v61 = vld [vmem:[#allocation2 + $0x152] ss:$2 sm:$0xff]  ;;  %v1581_v15 = vld [vmem:[#allocation2 + $0x121] ss:$2 sm:$0xff] }
  0x44   : > { %2513 = vmatpush3.msk.msra.mxu0 %vm540_vm0, %v3010_v29  ;;  %2503 = vmatprep.mubr.msk.f32.mxu0 %vm403_vm1, %v1259_v37  ;;  %v1267_v29 = vld [vmem:[#allocation2 + $0x13a] ss:$2 sm:$0xff]  ;;  %v1583_v16 = vld [vmem:[#allocation2 + $0x151] ss:$2 sm:$0xff]  ;;  %v1585_v19 = vld [vmem:[#allocation2 + $0x181] ss:$2 sm:$0xff] }
  0x45   : > { %2448 = vmatmul.mubr.msk.f32.gmra.mrb[2].mxu1 %vm403_vm1, %v488_v38  ;;  %2526 = vmatprep.subr.msk.mxu0 %vm540_vm0, %v2298_v39  ;;  %v1425_v60 = vld [vmem:[#allocation2 + $0x150] ss:$2 sm:$0xff]  ;;  %v1427_v63 = vld [vmem:[#allocation2 + $0x180] ss:$2 sm:$0xff]  ;;  %v1895_v18 = vld [vmem:[#allocation2 + $0x19] ss:$2 sm:$0xff] }
  0x46   : > { %2450 = vmatprep.mubr.msk.f32.mxu1 %vm403_vm1, %v490_v40  ;;  %v939_v62 = vld [vmem:[#allocation2 + $0x18] ss:$2 sm:$0xff]  ;;  %v941_v1 = vld [vmem:[#allocation2 + $0x48] ss:$2 sm:$0xff]  ;;  %v1896_v22 = vld [vmem:[#allocation2 + $0x49] ss:$2 sm:$0xff] }
  0x47   : > { %2504 = vmatmul.mubr.msk.f32.gmra.mrb[2].mxu0 %vm403_vm1, %v1261_v41  ;;  %v943_v2 = vld [vmem:[#allocation2 + $0x78] ss:$2 sm:$0xff]  ;;  %v945_v9 = vld [vmem:[#allocation2 + $0xa8] ss:$2 sm:$0xff]  ;;  %v1897_v23 = vld [vmem:[#allocation2 + $0x79] ss:$2 sm:$0xff] }
  0x48   : > { %2506 = vmatprep.mubr.msk.f32.mxu0 %vm403_vm1, %v1263_v42  ;;  %v947_v10 = vld [vmem:[#allocation2 + $0xd8] ss:$2 sm:$0xff]  ;;  %v949_v13 = vld [vmem:[#allocation2 + $0x108] ss:$2 sm:$0xff]  ;;  %v1898_v25 = vld [vmem:[#allocation2 + $0xa9] ss:$2 sm:$0xff] }
  0x49   : > { %2451 = vmatmul.mubr.msk.f32.gmra.mrb[4].mxu1 %vm403_vm1, %v492_v21  ;;  %v951_v14 = vld [vmem:[#allocation2 + $0x138] ss:$2 sm:$0xff]  ;;  %v953_v17 = vld [vmem:[#allocation2 + $0x168] ss:$2 sm:$0xff]  ;;  %v1899_v26 = vld [vmem:[#allocation2 + $0xd9] ss:$2 sm:$0xff] }
  0x4a   : > { %2453 = vmatprep.mubr.msk.f32.mxu1 %vm403_vm1, %v494_v43  ;;  %v1729_v20 = vld [vmem:[#allocation2 + $0x32] ss:$2 sm:$0xff]  ;;  %v1731_v5 = vld [vmem:[#allocation2 + $0x62] ss:$2 sm:$0xff]  ;;  %v1900_v28 = vld [vmem:[#allocation2 + $0x109] ss:$2 sm:$0xff] }
  0x4b   : > { %2507 = vmatmul.mubr.msk.f32.gmra.mrb[4].mxu0 %vm403_vm1, %v1265_v44  ;;  %v1733_v24 = vld [vmem:[#allocation2 + $0x92] ss:$2 sm:$0xff]  ;;  %v1735_v27 = vld [vmem:[#allocation2 + $0xc2] ss:$2 sm:$0xff]  ;;  %v1901_v30 = vld [vmem:[#allocation2 + $0x139] ss:$2 sm:$0xff] }
  0x4c   : > { %2509 = vmatprep.mubr.msk.f32.mxu0 %vm403_vm1, %v1267_v29  ;;  %v1737_v6 = vld [vmem:[#allocation2 + $0xf2] ss:$2 sm:$0xff]  ;;  %v1739_v31 = vld [vmem:[#allocation2 + $0x122] ss:$2 sm:$0xff]  ;;  %v1902_v33 = vld [vmem:[#allocation2 + $0x169] ss:$2 sm:$0xff] }
  0x4d   : > { %2454 = vmatmul.mubr.msk.f32.gmra.mrb[6].mxu1 %vm403_vm1, %v496_v45  ;;  %v1741_v32 = vld [vmem:[#allocation2 + $0x152] ss:$2 sm:$0xff]  ;;  %v1743_v34 = vld [vmem:[#allocation2 + $0x182] ss:$2 sm:$0xff] }
  0x4e   : > { %2458 = vmatprep.mubr.msk.f32.mxu1 %vm403_vm1, %v782_v46 }
  0x4f   : > { %2510 = vmatmul.mubr.msk.f32.gmra.mrb[6].mxu0 %vm403_vm1, %v1269_v47 }
  0x50   : > { %2514 = vmatprep.mubr.msk.f32.mxu0 %vm403_vm1, %v1413_v4 }
  0x51   : > { %2459 = vmatmul.mubr.msk.f32.vlgmr.msra.gmra.mrb[0].mxu1 %vm403_vm1, %v784_v48 }
  0x52   : > { %2461 = vmatprep.mubr.msk.f32.mxu1 %vm403_vm1, %v786_v49  ;;  %2471 = vmatpush3.msk.msra.mxu1 %vm540_vm0, %v2258_v36 }
  0x53   : > { %2515 = vmatmul.mubr.msk.f32.vlgmr.msra.gmra.mrb[0].mxu0 %vm403_vm1, %v1415_v50  ;;  %2554 = vmatprep.subr.msk.mxu1 %vm540_vm0, %v1903_v51 }
  0x54   : > { %2527 = vmatpush3.msk.msra.mxu0 %vm540_vm0, %v2298_v39  ;;  %2517 = vmatprep.mubr.msk.f32.mxu0 %vm403_vm1, %v1417_v52 }
  0x55   : > { %2462 = vmatmul.mubr.msk.f32.gmra.mrb[2].mxu1 %vm403_vm1, %v788_v53  ;;  %2540 = vmatprep.subr.msk.mxu0 %vm540_vm0, %v2308_v3 }
  0x56   : > { %2464 = vmatprep.mubr.msk.f32.mxu1 %vm403_vm1, %v790_v54 }
  0x57   : > { %2518 = vmatmul.mubr.msk.f32.gmra.mrb[2].mxu0 %vm403_vm1, %v1419_v55 }
  0x58   : > { %2520 = vmatprep.mubr.msk.f32.mxu0 %vm403_vm1, %v1421_v56 }
  0x59   : > { %2465 = vmatmul.mubr.msk.f32.gmra.mrb[4].mxu1 %vm403_vm1, %v792_v57 }
  0x5a   : > { %2467 = vmatprep.mubr.msk.f32.mxu1 %vm403_vm1, %v794_v58 }
  0x5b   : > { %2521 = vmatmul.mubr.msk.f32.gmra.mrb[4].mxu0 %vm403_vm1, %v1423_v59 }
  0x5c   : > { %2523 = vmatprep.mubr.msk.f32.mxu0 %vm403_vm1, %v1425_v60 }
  0x5d   : > { %2468 = vmatmul.mubr.msk.f32.gmra.mrb[6].mxu1 %vm403_vm1, %v796_v61 }
  0x5e   : > { %2472 = vmatprep.mubr.msk.f32.mxu1 %vm403_vm1, %v939_v62 }
  0x5f   : > { %2524 = vmatmul.mubr.msk.f32.gmra.mrb[6].mxu0 %vm403_vm1, %v1427_v63 }
  0x60   : > { %2528 = vmatprep.mubr.msk.f32.mxu0 %vm403_vm1, %v1571_v0 }
  0x61   : > { %2473 = vmatmul.mubr.msk.f32.vlgmr.msra.gmra.mrb[0].mxu1 %vm403_vm1, %v941_v1 }
  0x62   : > { %2475 = vmatprep.mubr.msk.f32.mxu1 %vm403_vm1, %v943_v2  ;;  %2555 = vmatpush3.msk.msra.mxu1 %vm540_vm0, %v1903_v51 }
  0x63   : > { %2529 = vmatmul.mubr.msk.f32.vlgmr.msra.gmra.mrb[0].mxu0 %vm403_vm1, %v1573_v7 }
  0x64   : > { %2541 = vmatpush3.msk.msra.mxu0 %vm540_vm0, %v2308_v3  ;;  %2531 = vmatprep.mubr.msk.f32.mxu0 %vm403_vm1, %v1575_v8 }
  0x65   : > { %2476 = vmatmul.mubr.msk.f32.gmra.mrb[2].mxu1 %vm403_vm1, %v945_v9 }
  0x66   : > { %2478 = vmatprep.mubr.msk.f32.mxu1 %vm403_vm1, %v947_v10 }
  0x67   : > { %2532 = vmatmul.mubr.msk.f32.gmra.mrb[2].mxu0 %vm403_vm1, %v1577_v11 }
  0x68   : > { %2534 = vmatprep.mubr.msk.f32.mxu0 %vm403_vm1, %v1579_v12 }
  0x69   : > { %2479 = vmatmul.mubr.msk.f32.gmra.mrb[4].mxu1 %vm403_vm1, %v949_v13 }
  0x6a   : > { %2481 = vmatprep.mubr.msk.f32.mxu1 %vm403_vm1, %v951_v14 }
  0x6b   : > { %2535 = vmatmul.mubr.msk.f32.gmra.mrb[4].mxu0 %vm403_vm1, %v1581_v15 }
  0x6c   : > { %2537 = vmatprep.mubr.msk.f32.mxu0 %vm403_vm1, %v1583_v16 }
  0x6d   : > { %2482 = vmatmul.mubr.msk.f32.gmra.mrb[6].mxu1 %vm403_vm1, %v953_v17 }
  0x6e   : > { %2556 = vmatprep.mubr.msk.f32.mxu1 %vm403_vm1, %v1895_v18 }
  0x6f   : > { %2538 = vmatmul.mubr.msk.f32.gmra.mrb[6].mxu0 %vm403_vm1, %v1585_v19 }
  0x70   : > { %2542 = vmatprep.mubr.msk.f32.mxu0 %vm403_vm1, %v1729_v20 }
  0x71   : > { %2557 = vmatmul.mubr.msk.f32.vlgmr.msra.gmra.mrb[8].mxu1 %vm403_vm1, %v1896_v22 }
  0x72   : > { %2559 = vmatprep.mubr.msk.f32.mxu1 %vm403_vm1, %v1897_v23 }
  0x73   : > { %2543 = vmatmul.mubr.msk.f32.vlgmr.msra.gmra.mrb[0].mxu0 %vm403_vm1, %v1731_v5 }
  0x74   : > { %2545 = vmatprep.mubr.msk.f32.mxu0 %vm403_vm1, %v1733_v24 }
  0x75   : > { %2560 = vmatmul.mubr.msk.f32.gmra.mrb[10].mxu1 %vm403_vm1, %v1898_v25 }
  0x76   : > { %2562 = vmatprep.mubr.msk.f32.mxu1 %vm403_vm1, %v1899_v26 }
  0x77   : > { %2546 = vmatmul.mubr.msk.f32.gmra.mrb[2].mxu0 %vm403_vm1, %v1735_v27 }
  0x78   : > { %2548 = vmatprep.mubr.msk.f32.mxu0 %vm403_vm1, %v1737_v6 }
  0x79   : > { %2563 = vmatmul.mubr.msk.f32.gmra.mrb[12].mxu1 %vm403_vm1, %v1900_v28 }
  0x7a   : > { %2565 = vmatprep.mubr.msk.f32.mxu1 %vm403_vm1, %v1901_v30 }
  0x7b   : > { %2549 = vmatmul.mubr.msk.f32.gmra.mrb[4].mxu0 %vm403_vm1, %v1739_v31 }
  0x7c   : > { %2551 = vmatprep.mubr.msk.f32.mxu0 %vm403_vm1, %v1741_v32 }
  0x7d   : > { %2566 = vmatmul.mubr.msk.f32.gmra.mrb[14].mxu1 %vm403_vm1, %v1902_v33 }
  0x7f   : > { %2552 = vmatmul.mubr.msk.f32.gmra.mrb[6].mxu0 %vm403_vm1, %v1743_v34 }
 0x134   : > { %v2474_v35 = vpop.f32.mrb[0].mxu1 }
 0x135   : > { %v1049_v36 = vpop.f32.mrb[1].mxu1 }
 0x138   : > { %v2477_v37 = vpop.f32.mrb[2].mxu1 }
 0x139   : > { %v1059_v38 = vpop.f32.mrb[3].mxu1 }
 0x13c   : > { %v2480_v39 = vpop.f32.mrb[4].mxu1 }
 0x13d   : > { %v1069_v40 = vpop.f32.mrb[5].mxu1 }
 0x140   : > { %v2483_v41 = vpop.f32.mrb[6].mxu1 }
 0x141   : > { %v3178_v42 = vpop.f32.mrb[7].mxu1 }
 0x144   : > { %v2558_v21 = vpop.f32.mrb[8].mxu1 }
 0x145   : > { %2037 = vst.msk [vmem:[%s3180_s10 + $0x8] sm:$0xff] %vm1886_vm4, %v2558_v21  ;;  %v1997_v43 = vpop.f32.mrb[9].mxu1 }
 0x146   : > { %v2544_v44 = vpop.f32.mrb[0].mxu0  ;;  %2036 = vst.msk [vmem:[%s3180_s10] sm:$0xff] %vm1886_vm4, %v1997_v43 }
 0x147   : > { %v2568_v29 = vadd.f32 %v2544_v44, %v2474_v35  ;;  %v1839_v45 = vpop.f32.mrb[1].mxu0 }
 0x148   : > { %v2569_v46 = vadd.f32 %v1839_v45, %v1049_v36  ;;  %v2561_v47 = vpop.f32.mrb[10].mxu1 }
 0x149   : > { %1888 = vst.msk [vmem:[%s3186_s11 + $0x8] sm:$0xff] %vm1886_vm4, %v2568_v29  ;;  %2039 = vst.msk [vmem:[%s3180_s10 + $0x18] sm:$0xff] %vm1886_vm4, %v2561_v47  ;;  %v2007_v4 = vpop.f32.mrb[11].mxu1 }
 0x14a   : > { %1887 = vst.msk [vmem:[%s3186_s11] sm:$0xff] %vm1886_vm4, %v2569_v46  ;;  %v2547_v48 = vpop.f32.mrb[2].mxu0  ;;  %2038 = vst.msk [vmem:[%s3180_s10 + $0x10] sm:$0xff] %vm1886_vm4, %v2007_v4 }
 0x14b   : > { %v2570_v49 = vadd.f32 %v2547_v48, %v2477_v37  ;;  %v1849_v50 = vpop.f32.mrb[3].mxu0 }
 0x14c   : > { %v2571_v51 = vadd.f32 %v1849_v50, %v1059_v38  ;;  %v2564_v52 = vpop.f32.mrb[12].mxu1 }
 0x14d   : > { %1890 = vst.msk [vmem:[%s3186_s11 + $0x18] sm:$0xff] %vm1886_vm4, %v2570_v49  ;;  %2041 = vst.msk [vmem:[%s3180_s10 + $0x28] sm:$0xff] %vm1886_vm4, %v2564_v52  ;;  %v2017_v53 = vpop.f32.mrb[13].mxu1 }
 0x14e   : > { %1889 = vst.msk [vmem:[%s3186_s11 + $0x10] sm:$0xff] %vm1886_vm4, %v2571_v51  ;;  %v2550_v3 = vpop.f32.mrb[4].mxu0  ;;  %2040 = vst.msk [vmem:[%s3180_s10 + $0x20] sm:$0xff] %vm1886_vm4, %v2017_v53 }
 0x14f   : > { %v2572_v54 = vadd.f32 %v2550_v3, %v2480_v39  ;;  %v1859_v55 = vpop.f32.mrb[5].mxu0 }
 0x150   : > { %v2573_v56 = vadd.f32 %v1859_v55, %v1069_v40  ;;  %v2567_v57 = vpop.f32.mrb[14].mxu1 }
 0x151   : > { %1892 = vst.msk [vmem:[%s3186_s11 + $0x28] sm:$0xff] %vm1886_vm4, %v2572_v54  ;;  %2043 = vst.msk [vmem:[%s3180_s10 + $0x38] sm:$0xff] %vm1886_vm4, %v2567_v57  ;;  %v2027_v58 = vpop.f32.mrb[15].mxu1 }
 0x152   : > { %1891 = vst.msk [vmem:[%s3186_s11 + $0x20] sm:$0xff] %vm1886_vm4, %v2573_v56  ;;  %v2553_v59 = vpop.f32.mrb[6].mxu0  ;;  %2042 = vst.msk [vmem:[%s3180_s10 + $0x30] sm:$0xff] %vm1886_vm4, %v2027_v58 }
 0x153   : > { %v2574_v60 = vadd.f32 %v2553_v59, %v2483_v41  ;;  %v1869_v61 = vpop.f32.mrb[7].mxu0 }
 0x154   : > { %2692 = shalt.err (!%p2689_p3)
}
 0x155   : > { %s2693_s9 = scalar_lea.hbm %s3211_s16, 1024  ;;  %s2697_s15 = scalar_lea.hbm %s3317_s6, 2048 }
 0x156   : > { %p2694_p4 = scmp.ne.s32.totalorder %s3211_s16, %s2693_s9  ;;  %p2698_p9 = scmp.lt.u32.totalorder %s3211_s16, %s3317_s6 }
 0x157   : > { %p2699_p10 = scmp.lt.u32.totalorder %s2697_s15, %s2693_s9  ;;  %p2701_p12 = scmp.lt.u32.totalorder %s2693_s9, %s3211_s16 }
 0x158   : > { %p2695_p7 = pnand %p2694_p4, %p2853_p5 }
 0x159   : > { %p2700_p11 = por %p2699_p10, %p2698_p9 }
 0x15a   : > { %p2696_p8 = pneg %p2695_p7 }
 0x15b   : > { %p2702_p13 = por %p2701_p12, %p2700_p11 }
 0x15d   : > { %p2703_p0 = pnand %p2702_p13, %p2696_p8 }
 0x15f   : > { %2706 = shalt.err (!%p2703_p0)
}
 0x160   : > { %s2777_s19 = smov 128   ;;  %s2778_s28 = smov 8   ;;  %v2575_v62 = vadd.f32 %v1869_v61, %v3178_v42  ;;  %1894 = vst.msk [vmem:[%s3186_s11 + $0x38] sm:$0xff] %vm1886_vm4, %v2574_v60 }
 0x161   : > { %2633 = dma.vmem_to_hbm [thread:$0]  (%p2853_p5), %s3213_s13, 1024, %s3211_s16, %s2050_s18, %s2777_s19, %s2777_s19, %s2778_s28  }
 0x162   : > { %s3257_s14 = scalar_lea.hbm %s3316_s5, %s2336_s12  ;;  %1893 = vst.msk [vmem:[%s3186_s11 + $0x30] sm:$0xff] %vm1886_vm4, %v2575_v62  ;;  %s2045_s15 = scalar_lea.sflag [#allocation4], %s3175_s29 }
 0x163   : > { %s2707_s13 = scalar_lea.vmem %s3261_s17, 1024  ;;  %s2779_s25 = smov [#allocation3]  }
 0x164   : > { %p2708_p1 = scmp.ne.s32.totalorder %s3261_s17, %s2707_s13  ;;  %s2711_s16 = sshll.u32 %s2779_s25, 4  ;;  %s2712_s16 = int_to_ptr.vmem [resolvable:$false] %s2711_s16 }
 0x165   : > { %s2713_s12 = scalar_lea.vmem %s2712_s16, 2048  ;;  %p2714_p4 = scmp.lt.s32.totalorder %s3261_s17, %s2712_s16 }
 0x166   : > { %p2709_p2 = pnand %p2708_p1, %p2853_p5  ;;  %p2715_p7 = scmp.lt.s32.totalorder %s2713_s12, %s2707_s13 }
 0x168   : > { %p2710_p3 = pneg %p2709_p2  ;;  %p2716_p8 = por %p2715_p7, %p2714_p4 }
 0x16a   : > { %p2717_p9 = pnand %p2716_p8, %p2710_p3 }
 0x16c   : > { %2720 = shalt.err (!%p2717_p9)
}
 0x16d   : > { %s2721_s11 = scalar_lea.hbm %s3257_s14, 1024  ;;  %s2725_s26 = scalar_lea.hbm %s3316_s5, 2048 }
 0x16e   : > { %p2722_p10 = scmp.ne.s32.totalorder %s3257_s14, %s2721_s11  ;;  %p2726_p13 = scmp.lt.u32.totalorder %s3257_s14, %s3316_s5 }
 0x16f   : > { %p2727_p0 = scmp.lt.u32.totalorder %s2725_s26, %s2721_s11  ;;  %p2729_p2 = scmp.lt.u32.totalorder %s2721_s11, %s3257_s14 }
 0x170   : > { %p2723_p11 = pnand %p2722_p10, %p2853_p5 }
 0x171   : > { %p2728_p1 = por %p2727_p0, %p2726_p13 }
 0x172   : > { %p2724_p12 = pneg %p2723_p11 }
 0x173   : > { %p2730_p3 = por %p2729_p2, %p2728_p1 }
 0x175   : > { %p2731_p4 = pnand %p2730_p3, %p2724_p12 }
 0x177   : > { %2734 = shalt.err (!%p2731_p4)
}
 0x178   : > { %2632 = dma.vmem_to_hbm [thread:$0]  (%p2853_p5), %s3261_s17, 1024, %s3257_s14, %s2045_s15, %s2777_s19, %s2777_s19, %s2778_s28  }
 0x179 PF: > { %p2643_p7 = scmp.ge.s32.totalorder %s2773_s24, 2  ;;  %s2094_s13 = sand.u32 1, %s2761_s21  }
 0x17a   : > { %s2095_s25 = scalar_lea.sflag [#allocation4], %s2094_s13 }
 0x17b   : > { %p2637_p8 = pnand %p2643_p7, %p2857_p6 }
 0x17d   : > { %2752 = dma.done.wait (!%p2637_p8), %s2095_s25, 1024  }
 0x17e   : > { %2754 = vsyncadd (!%p2637_p8), %s2095_s25, 4294966272  ;;  %s2104_s7 = scalar_lea.sflag [#allocation6], %s2094_s13 }
 0x17f   : > { %2756 = dma.done.wait (!%p2637_p8), %s2104_s7, 1024  }
 0x180   : > { %2758 = vsyncadd (!%p2637_p8), %s2104_s7, 4294966272  ;;  %p20_p5 = scmp.ge.s32.totalorder %s2840_s27, 4   ;;  %s3320_s21 = smov %s2765_s22 }
 0x181   : > { %s3321_s22 = smov %s2769_s23  ;;  %s3322_s23 = smov %s2851_s30 }
 0x182   : > { %s3323_s24 = smov %s2840_s27  ;;  %22 = sbr.rel (!%p20_p5) target bundleno = 5 (0x5), region = 172 }
 0x189   :  { %2109 = vsyncpa [#allocation4], 1 }
 0x18a   :  { %2111 = vsyncpa [#allocation4 + $0x1], 1 }
 0x18b   :  { %2112 = vsyncpa [#allocation6], 1 }
 0x18c   :  { %2114 = vsyncpa [#allocation6 + $0x1], 1 }

// kernel: tpu_custom_call.1
= control target key start
LH: loop header
LB: loop body
LE: loop exit
PB: predicated region body
PF: predicated region fallthrough
CT: control target
= control target key end

     0   :  { %s5938_s21 = smov 0   ;;  %s7215_s0 = inlined_call_operand.vmem [shape: f32[2,16,16,4], index: 0, kind: input, shape index: {}]   ;;  %s7216_s1 = inlined_call_operand.vmem [shape: f32[1,1,4], index: 1, kind: input, shape index: {}]   ;;  %s7217_s2 = inlined_call_operand.vmem [shape: f32[1,1,4], index: 2, kind: input, shape index: {}]   ;;  %s7218_s3 = inlined_call_operand.vmem [shape: f32[9,4,8], index: 3, kind: input, shape index: {}]   ;;  %s7219_s4 = inlined_call_operand.vmem [shape: f32[1,4,8], index: 4, kind: input, shape index: {}]   ;;  %s7220_s5 = inlined_call_operand.vmem [shape: f32[2,16,16,8], index: 5, kind: output, shape index: {0}]   ;;  %s7221_s6 = inlined_call_operand.vmem [shape: f32[2,16,16,8], index: 6, kind: output, shape index: {1}]  }
   0x1 LB: > { %s4443_s22 = sadd.s32 4294967295, %s5900_s21   ;;  %p4447_p0 = scmp.ge.s32.totalorder %s5900_s21, 1  ;;  %s5900_s21 = sphi %s5938_s21, %s17_s21  }
   0x2   : > { %p215_p1 = scmp.lt.s32.totalorder %s5900_s21, 3 }
   0x4   : > { %p216_p2 = pnand %p4447_p0, %p215_p1 }
   0x6   : > { %219 = sbr.rel (%p216_p2) target bundleno = 576 (0x240), region = 40 }
   0xd   : > { %v4456_v0 = vld [vmem:[%s7218_s3 + $0x4] sm:$0xf]  ;;  %vm649_vm0 = vcmask 1043456   ;;  %vm407_vm1 = vcmask 31744   ;;  %vm410_vm2 = vcmask 25600   ;;  %v5902_v1 = vmov 0.0  }
   0xe   : > { %5129 = vmatprep.subr.msk.mxu1 %vm649_vm0, %v4456_v0  ;;  %408 = vst.msk [vmem:[#allocation2] sm:$0xff] %vm407_vm1, %v5902_v1  ;;  %409 = vst.msk [vmem:[#allocation2 + $0x8] sm:$0xff] %vm407_vm1, %v5902_v1  ;;  %vm416_vm3 = vcmask 24576   ;;  %v4591_v2 = vld [vmem:[%s7218_s3 + $0x10] sm:$0xf]  ;;  %p5959_p3 = scmp.lt.s32.totalorder %s4443_s22, 1 }
   0xf   : > { %413 = vst.msk [vmem:[#allocation2 + $0x198] sm:$0xff] %vm407_vm1, %v5902_v1  ;;  %414 = vst.msk [vmem:[#allocation2 + $0x1a0] sm:$0xff] %vm407_vm1, %v5902_v1  ;;  %5130 = vmatpush3.msk.msra.mxu1 %vm649_vm0, %v4456_v0  ;;  %5329 = vmatprep.subr.msk.mxu0 %vm649_vm0, %v4591_v2  ;;  %v6004_v3 = vld [vmem:[%s7218_s3 + $0x14] sm:$0xf]  ;;  %v518_v4 = vld [vmem:[%s7218_s3] sm:$0xf] }
  0x10   : > { %411 = vst.msk [vmem:[#allocation2 + $0x10] sm:$0x3] %vm410_vm2, %v5902_v1  ;;  %415 = vst.msk [vmem:[#allocation2 + $0x1a8] sm:$0x3] %vm410_vm2, %v5902_v1  ;;  %5330 = vmatpush3.msk.msra.mxu0 %vm649_vm0, %v4591_v2  ;;  %s7316_s22 = smov (!%p5959_p3, %s4443_s22), 1  ;;  %5179 = vmatprep.subr.msk.mxu1 %vm649_vm0, %v518_v4  ;;  %vm3933_vm4 = vcmask 64512  }
  0x11   : > { %435 = vst.msk [vmem:[#allocation2 + $0x11] sm:$0x1] %vm416_vm3, %v5902_v1  ;;  %417 = vst.msk [vmem:[#allocation2] sm:$0x1] %vm416_vm3, %v5902_v1  ;;  %5379 = vmatprep.subr.msk.mxu0 %vm649_vm0, %v6004_v3  ;;  %s6017_s8 = sshll.u32 %s7316_s22, 8 }
  0x12   : > { %418 = vst.msk [vmem:[#allocation2 + $0x18] sm:$0x1] %vm416_vm3, %v5902_v1  ;;  %419 = vst.msk [vmem:[#allocation2 + $0x30] sm:$0x1] %vm416_vm3, %v5902_v1  ;;  %v6022_v5 = vld [vmem:[%s7216_s1] ss:$0 sm:$0xff]  ;;  %s6028_s13 = scalar_lea.vmem %s7215_s0, %s6017_s8  ;;  %s7050_s7 = scalar_lea.vmem %s7221_s6, %s6017_s8 }
  0x13   : > { %420 = vst.msk [vmem:[#allocation2 + $0x48] sm:$0x1] %vm416_vm3, %v5902_v1  ;;  %421 = vst.msk [vmem:[#allocation2 + $0x60] sm:$0x1] %vm416_vm3, %v5902_v1  ;;  %v6033_v6 = vld [vmem:[%s7217_s2] ss:$0 sm:$0xff]  ;;  %s7060_s11 = scalar_lea.vmem %s7220_s5, %s6017_s8 }
  0x14   : > { %422 = vst.msk [vmem:[#allocation2 + $0x78] sm:$0x1] %vm416_vm3, %v5902_v1  ;;  %423 = vst.msk [vmem:[#allocation2 + $0x90] sm:$0x1] %vm416_vm3, %v5902_v1  ;;  %v265_v7 = vld [vmem:[%s6028_s13] sm:$0xff]  ;;  %v266_v8 = vld [vmem:[%s6028_s13 + $0x8] sm:$0xff] }
  0x15   : > { %424 = vst.msk [vmem:[#allocation2 + $0xa8] sm:$0x1] %vm416_vm3, %v5902_v1  ;;  %425 = vst.msk [vmem:[#allocation2 + $0xc0] sm:$0x1] %vm416_vm3, %v5902_v1  ;;  %v267_v9 = vld [vmem:[%s6028_s13 + $0x10] sm:$0xff]  ;;  %v519_v11 = vld [vmem:[#allocation2 + $0x1] sm:$0xff]  ;;  %v304_v13 = vmul.f32 %v6022_v5, %v265_v7  ;;  %v305_v14 = vmul.f32 %v6022_v5, %v266_v8 }
  0x16   : > { %426 = vst.msk [vmem:[#allocation2 + $0xd8] sm:$0x1] %vm416_vm3, %v5902_v1  ;;  %427 = vst.msk [vmem:[#allocation2 + $0xf0] sm:$0x1] %vm416_vm3, %v5902_v1  ;;  %v6041_v10 = vld [vmem:[%s7218_s3 + $0x8] sm:$0xf]  ;;  %v306_v15 = vmul.f32 %v6022_v5, %v267_v9  ;;  %5131 = vmatprep.mubr.msk.f32.mxu1 %vm407_vm1, %v519_v11 }
  0x17   : > { %428 = vst.msk [vmem:[#allocation2 + $0x108] sm:$0x1] %vm416_vm3, %v5902_v1  ;;  %429 = vst.msk [vmem:[#allocation2 + $0x120] sm:$0x1] %vm416_vm3, %v5902_v1  ;;  %v520_v12 = vld [vmem:[#allocation2 + $0x9] sm:$0xff]  ;;  %v268_v16 = vld [vmem:[%s6028_s13 + $0x18] sm:$0xff]  ;;  %v343_v21 = vadd.f32 %v6033_v6, %v304_v13  ;;  %v344_v22 = vadd.f32 %v6033_v6, %v305_v14 }
  0x18   : > { %430 = vst.msk [vmem:[#allocation2 + $0x138] sm:$0x1] %vm416_vm3, %v5902_v1  ;;  %431 = vst.msk [vmem:[#allocation2 + $0x150] sm:$0x1] %vm416_vm3, %v5902_v1  ;;  %v307_v17 = vmul.f32 %v6022_v5, %v268_v16  ;;  %v269_v18 = vld [vmem:[%s6028_s13 + $0x20] sm:$0xff]  ;;  %v270_v19 = vld [vmem:[%s6028_s13 + $0x28] sm:$0xff]  ;;  %5132 = vmatmul.mubr.msk.f32.vlgmr.msra.gmra.mrb[0].mxu1 %vm407_vm1, %v520_v12  ;;  %v345_v23 = vadd.f32 %v6033_v6, %v306_v15 }
  0x19   : > { %432 = vst.msk [vmem:[#allocation2 + $0x168] sm:$0x1] %vm416_vm3, %v5902_v1  ;;  %433 = vst.msk [vmem:[#allocation2 + $0x180] sm:$0x1] %vm416_vm3, %v5902_v1  ;;  %v271_v20 = vld [vmem:[%s6028_s13 + $0x30] sm:$0xff]  ;;  %v308_v24 = vmul.f32 %v6022_v5, %v269_v18  ;;  %v272_v25 = vld [vmem:[%s6028_s13 + $0x38] sm:$0xff]  ;;  %5180 = vmatpush3.msk.msra.mxu1 %vm649_vm0, %v518_v4  ;;  %v309_v27 = vmul.f32 %v6022_v5, %v270_v19 }
  0x1a   : > { %434 = vst.msk [vmem:[#allocation2 + $0x198] sm:$0x1] %vm416_vm3, %v5902_v1  ;;  %436 = vst.msk [vmem:[#allocation2 + $0x29] sm:$0x1] %vm416_vm3, %v5902_v1  ;;  %v346_v26 = vadd.f32 %v6033_v6, %v307_v17  ;;  %v310_v28 = vmul.f32 %v6022_v5, %v271_v20  ;;  %v311_v29 = vmul.f32 %v6022_v5, %v272_v25  ;;  %v273_v30 = vld [vmem:[%s6028_s13 + $0x40] sm:$0xff]  ;;  %v274_v31 = vld [vmem:[%s6028_s13 + $0x48] sm:$0xff]  ;;  %5229 = vmatprep.subr.msk.mxu1 %vm649_vm0, %v6041_v10 }
  0x1b   : > { %437 = vst.msk [vmem:[#allocation2 + $0x41] sm:$0x1] %vm416_vm3, %v5902_v1  ;;  %438 = vst.msk [vmem:[#allocation2 + $0x59] sm:$0x1] %vm416_vm3, %v5902_v1  ;;  %v275_v32 = vld [vmem:[%s6028_s13 + $0x50] sm:$0xff]  ;;  %v375_v33 = vmax.f32 %v343_v21, 0.0  ;;  %v347_v36 = vadd.f32 %v6033_v6, %v308_v24  ;;  %v348_v39 = vadd.f32 %v6033_v6, %v309_v27  ;;  %v312_v44 = vmul.f32 %v6022_v5, %v273_v30 }
  0x1c   : > { %439 = vst.msk [vmem:[#allocation2 + $0x71] sm:$0x1] %vm416_vm3, %v5902_v1  ;;  %440 = vst.msk [vmem:[#allocation2 + $0x89] sm:$0x1] %vm416_vm3, %v5902_v1  ;;  %v376_v34 = vmax.f32 %v344_v22, 0.0  ;;  %v377_v35 = vmax.f32 %v345_v23, 0.0  ;;  %v349_v40 = vadd.f32 %v6033_v6, %v310_v28  ;;  %v350_v41 = vadd.f32 %v6033_v6, %v311_v29 }
  0x1d   : > { %441 = vst.msk [vmem:[#allocation2 + $0xa1] sm:$0x1] %vm416_vm3, %v5902_v1  ;;  %442 = vst.msk [vmem:[#allocation2 + $0xb9] sm:$0x1] %vm416_vm3, %v5902_v1  ;;  %v276_v37 = vld [vmem:[%s6028_s13 + $0x58] sm:$0xff]  ;;  %v378_v38 = vmax.f32 %v346_v26, 0.0  ;;  %v313_v45 = vmul.f32 %v6022_v5, %v274_v31  ;;  %v314_v46 = vmul.f32 %v6022_v5, %v275_v32  ;;  %v351_v54 = vadd.f32 %v6033_v6, %v312_v44 }
  0x1e   : > { %443 = vst.msk [vmem:[#allocation2 + $0xd1] sm:$0x1] %vm416_vm3, %v5902_v1  ;;  %444 = vst.msk [vmem:[#allocation2 + $0xe9] sm:$0x1] %vm416_vm3, %v5902_v1  ;;  %v277_v42 = vld [vmem:[%s6028_s13 + $0x60] sm:$0xff]  ;;  %v379_v43 = vmax.f32 %v347_v36, 0.0  ;;  %v315_v53 = vmul.f32 %v6022_v5, %v276_v37 }
  0x1f   : > { %445 = vst.msk [vmem:[#allocation2 + $0x101] sm:$0x1] %vm416_vm3, %v5902_v1  ;;  %446 = vst.msk [vmem:[#allocation2 + $0x119] sm:$0x1] %vm416_vm3, %v5902_v1  ;;  %v278_v47 = vld [vmem:[%s6028_s13 + $0x68] sm:$0xff]  ;;  %v279_v48 = vld [vmem:[%s6028_s13 + $0x70] sm:$0xff]  ;;  %v352_v55 = vadd.f32 %v6033_v6, %v313_v45  ;;  %v353_v56 = vadd.f32 %v6033_v6, %v314_v46  ;;  %v316_v57 = vmul.f32 %v6022_v5, %v277_v42 }
  0x20   : > { %447 = vst.msk [vmem:[#allocation2 + $0x131] sm:$0x1] %vm416_vm3, %v5902_v1  ;;  %448 = vst.msk [vmem:[#allocation2 + $0x149] sm:$0x1] %vm416_vm3, %v5902_v1  ;;  %v280_v49 = vld [vmem:[%s6028_s13 + $0x78] sm:$0xff]  ;;  %v380_v50 = vmax.f32 %v348_v39, 0.0  ;;  %v354_v58 = vadd.f32 %v6033_v6, %v315_v53  ;;  %v317_v59 = vmul.f32 %v6022_v5, %v278_v47  ;;  %v318_v60 = vmul.f32 %v6022_v5, %v279_v48 }
  0x21   : > { %449 = vst.msk [vmem:[#allocation2 + $0x161] sm:$0x1] %vm416_vm3, %v5902_v1  ;;  %450 = vst.msk [vmem:[#allocation2 + $0x179] sm:$0x1] %vm416_vm3, %v5902_v1  ;;  %v381_v51 = vmax.f32 %v349_v40, 0.0  ;;  %v382_v52 = vmax.f32 %v350_v41, 0.0  ;;  %v319_v61 = vmul.f32 %v6022_v5, %v280_v49  ;;  %v355_v7 = vadd.f32 %v6033_v6, %v316_v57 }
  0x22   : > { %451 = vst.msk [vmem:[#allocation2 + $0x191] sm:$0x1] %vm416_vm3, %v5902_v1  ;;  %452 = vst.msk [vmem:[#allocation2 + $0x1a9] sm:$0x1] %vm416_vm3, %v5902_v1  ;;  %v281_v62 = vld [vmem:[%s6028_s13 + $0x80] sm:$0xff]  ;;  %v282_v63 = vld [vmem:[%s6028_s13 + $0x88] sm:$0xff]  ;;  %v356_v11 = vadd.f32 %v6033_v6, %v317_v59  ;;  %v357_v12 = vadd.f32 %v6033_v6, %v318_v60 }
  0x23   : > { %454 = vst.msk [vmem:[#allocation2 + $0x19] sm:$0xff] %vm407_vm1, %v375_v33  ;;  %455 = vst.msk [vmem:[#allocation2 + $0x21] sm:$0xff] %vm407_vm1, %v376_v34  ;;  %v283_v0 = vld [vmem:[%s6028_s13 + $0x90] sm:$0xff]  ;;  %v383_v1 = vmax.f32 %v351_v54, 0.0  ;;  %v384_v2 = vmax.f32 %v352_v55, 0.0  ;;  %v385_v4 = vmax.f32 %v353_v56, 0.0  ;;  %v358_v13 = vadd.f32 %v6033_v6, %v319_v61 }
  0x24   : > { %456 = vst.msk [vmem:[#allocation2 + $0x31] sm:$0xff] %vm407_vm1, %v377_v35  ;;  %457 = vst.msk [vmem:[#allocation2 + $0x39] sm:$0xff] %vm407_vm1, %v378_v38  ;;  %v284_v8 = vld [vmem:[%s6028_s13 + $0x98] sm:$0xff]  ;;  %v386_v9 = vmax.f32 %v354_v58, 0.0  ;;  %v387_v14 = vmax.f32 %v355_v7, 0.0  ;;  %v320_v15 = vmul.f32 %v6022_v5, %v281_v62  ;;  %v321_v16 = vmul.f32 %v6022_v5, %v282_v63  ;;  %v285_v18 = vld [vmem:[%s6028_s13 + $0xa0] sm:$0xff] }
  0x25   : > { %458 = vst.msk [vmem:[#allocation2 + $0x49] sm:$0xff] %vm407_vm1, %v379_v43  ;;  %459 = vst.msk [vmem:[#allocation2 + $0x51] sm:$0xff] %vm407_vm1, %v380_v50  ;;  %v322_v17 = vmul.f32 %v6022_v5, %v283_v0  ;;  %v286_v19 = vld [vmem:[%s6028_s13 + $0xa8] sm:$0xff]  ;;  %v287_v20 = vld [vmem:[%s6028_s13 + $0xb0] sm:$0xff]  ;;  %v388_v24 = vmax.f32 %v356_v11, 0.0  ;;  %v389_v25 = vmax.f32 %v357_v12, 0.0  ;;  %v323_v27 = vmul.f32 %v6022_v5, %v284_v8 }
  0x26   : > { %460 = vst.msk [vmem:[#allocation2 + $0x61] sm:$0xff] %vm407_vm1, %v381_v51  ;;  %461 = vst.msk [vmem:[#allocation2 + $0x69] sm:$0xff] %vm407_vm1, %v382_v52  ;;  %v390_v26 = vmax.f32 %v358_v13, 0.0  ;;  %v359_v28 = vadd.f32 %v6033_v6, %v320_v15  ;;  %v360_v29 = vadd.f32 %v6033_v6, %v321_v16  ;;  %v288_v31 = vld [vmem:[%s6028_s13 + $0xb8] sm:$0xff]  ;;  %v324_v34 = vmul.f32 %v6022_v5, %v285_v18  ;;  %v289_v36 = vld [vmem:[%s6028_s13 + $0xc0] sm:$0xff] }
  0x27   : > { %462 = vst.msk [vmem:[#allocation2 + $0x79] sm:$0xff] %vm407_vm1, %v383_v1  ;;  %463 = vst.msk [vmem:[#allocation2 + $0x81] sm:$0xff] %vm407_vm1, %v384_v2  ;;  %v361_v30 = vadd.f32 %v6033_v6, %v322_v17  ;;  %v6126_v32 = vld [vmem:[%s7218_s3 + $0x18] sm:$0xf]  ;;  %v362_v33 = vadd.f32 %v6033_v6, %v323_v27  ;;  %v325_v35 = vmul.f32 %v6022_v5, %v286_v19  ;;  %v290_v37 = vld [vmem:[%s6028_s13 + $0xc8] sm:$0xff] }
  0x28   : > { %464 = vst.msk [vmem:[#allocation2 + $0x91] sm:$0xff] %vm407_vm1, %v385_v4  ;;  %465 = vst.msk [vmem:[#allocation2 + $0x99] sm:$0xff] %vm407_vm1, %v386_v9  ;;  %v291_v38 = vld [vmem:[%s6028_s13 + $0xd0] sm:$0xff]  ;;  %v391_v40 = vmax.f32 %v359_v28, 0.0  ;;  %v392_v41 = vmax.f32 %v360_v29, 0.0  ;;  %v326_v43 = vmul.f32 %v6022_v5, %v287_v20  ;;  %v292_v44 = vld [vmem:[%s6028_s13 + $0xd8] sm:$0xff]  ;;  %v363_v47 = vadd.f32 %v6033_v6, %v324_v34 }
  0x29   : > { %466 = vst.msk [vmem:[#allocation2 + $0xa9] sm:$0xff] %vm407_vm1, %v387_v14  ;;  %467 = vst.msk [vmem:[#allocation2 + $0xb1] sm:$0xff] %vm407_vm1, %v388_v24  ;;  %v393_v42 = vmax.f32 %v361_v30, 0.0  ;;  %v394_v46 = vmax.f32 %v362_v33, 0.0  ;;  %v364_v48 = vadd.f32 %v6033_v6, %v325_v35  ;;  %v328_v50 = vmul.f32 %v6022_v5, %v289_v36  ;;  %v293_v53 = vld [vmem:[%s6028_s13 + $0xe0] sm:$0xff]  ;;  %v294_v54 = vld [vmem:[%s6028_s13 + $0xe8] sm:$0xff] }
  0x2a   : > { %v521_v21 = vld [vmem:[#allocation2 + $0x19] sm:$0xff]  ;;  %v522_v22 = vld [vmem:[#allocation2 + $0x21] sm:$0xff]  ;;  %468 = vst.msk [vmem:[#allocation2 + $0xc1] sm:$0xff] %vm407_vm1, %v389_v25  ;;  %469 = vst.msk [vmem:[#allocation2 + $0xc9] sm:$0xff] %vm407_vm1, %v390_v26  ;;  %v365_v49 = vadd.f32 %v6033_v6, %v326_v43  ;;  %v329_v51 = vmul.f32 %v6022_v5, %v290_v37  ;;  %v330_v52 = vmul.f32 %v6022_v5, %v291_v38  ;;  %v395_v55 = vmax.f32 %v363_v47, 0.0 }
  0x2b   : > { %v523_v23 = vld [vmem:[#allocation2 + $0x31] sm:$0xff]  ;;  %5134 = vmatprep.mubr.msk.f32.mxu1 %vm407_vm1, %v521_v21  ;;  %5331 = vmatprep.mubr.msk.f32.mxu0 %vm407_vm1, %v521_v21  ;;  %v524_v39 = vld [vmem:[#allocation2 + $0x39] sm:$0xff]  ;;  %470 = vst.msk [vmem:[#allocation2 + $0xd9] sm:$0xff] %vm407_vm1, %v391_v40  ;;  %471 = vst.msk [vmem:[#allocation2 + $0xe1] sm:$0xff] %vm407_vm1, %v392_v41  ;;  %v396_v56 = vmax.f32 %v364_v48, 0.0  ;;  %v331_v58 = vmul.f32 %v6022_v5, %v292_v44  ;;  %v367_v62 = vadd.f32 %v6033_v6, %v328_v50 }
  0x2c   : > { %5135 = vmatmul.mubr.msk.f32.gmra.mrb[2].mxu1 %vm407_vm1, %v522_v22  ;;  %5332 = vmatmul.mubr.msk.f32.vlgmr.msra.gmra.mrb[0].mxu0 %vm407_vm1, %v522_v22  ;;  %v525_v45 = vld [vmem:[#allocation2 + $0x49] sm:$0xff]  ;;  %472 = vst.msk [vmem:[#allocation2 + $0xf1] sm:$0xff] %vm407_vm1, %v393_v42  ;;  %473 = vst.msk [vmem:[#allocation2 + $0xf9] sm:$0xff] %vm407_vm1, %v394_v46  ;;  %v526_v60 = vld [vmem:[#allocation2 + $0x51] sm:$0xff]  ;;  %v397_v61 = vmax.f32 %v365_v49, 0.0  ;;  %v368_v63 = vadd.f32 %v6033_v6, %v329_v51  ;;  %v369_v0 = vadd.f32 %v6033_v6, %v330_v52 }
  0x2d   : > { %5380 = vmatpush3.msk.msra.mxu0 %vm649_vm0, %v6004_v3  ;;  %5137 = vmatprep.mubr.msk.f32.mxu1 %vm407_vm1, %v523_v23  ;;  %v327_v3 = vmul.f32 %v6022_v5, %v288_v31  ;;  %v295_v59 = vld [vmem:[%s6028_s13 + $0xf0] sm:$0xff]  ;;  %v296_v1 = vld [vmem:[%s6028_s13 + $0xf8] sm:$0xff]  ;;  %v527_v2 = vld [vmem:[#allocation2 + $0x61] sm:$0xff]  ;;  %474 = vst.msk [vmem:[#allocation2 + $0x109] sm:$0xff] %vm407_vm1, %v395_v55  ;;  %v370_v7 = vadd.f32 %v6033_v6, %v331_v58  ;;  %v399_v11 = vmax.f32 %v367_v62, 0.0 }
  0x2e   : > { %5334 = vmatprep.mubr.msk.f32.mxu0 %vm407_vm1, %v523_v23  ;;  %5429 = vmatprep.subr.msk.mxu0 %vm649_vm0, %v6126_v32  ;;  %475 = vst.msk [vmem:[#allocation2 + $0x111] sm:$0xff] %vm407_vm1, %v396_v56  ;;  %v332_v8 = vmul.f32 %v6022_v5, %v293_v53  ;;  %v333_v9 = vmul.f32 %v6022_v5, %v294_v54  ;;  %476 = vst.msk [vmem:[#allocation2 + $0x121] sm:$0xff] %vm407_vm1, %v397_v61  ;;  %v400_v12 = vmax.f32 %v368_v63, 0.0  ;;  %v528_v19 = vld [vmem:[#allocation2 + $0x69] sm:$0xff]  ;;  %v6190_v21 = vld [vmem:[#allocation2 + $0x79] sm:$0xff] }
  0x2f   : > { %v366_v57 = vadd.f32 %v6033_v6, %v327_v3  ;;  %v401_v13 = vmax.f32 %v369_v0, 0.0  ;;  %v334_v14 = vmul.f32 %v6022_v5, %v295_v59  ;;  %v402_v15 = vmax.f32 %v370_v7, 0.0  ;;  %478 = vst.msk [vmem:[#allocation2 + $0x139] sm:$0xff] %vm407_vm1, %v399_v11  ;;  %7254 = vst [vmem:[#allocation3_spill] sm:$0xff] %v6190_v21  ;;  %v6202_v26 = vld [vmem:[#allocation2 + $0x81] sm:$0xff]  ;;  %v6216_v27 = vld [vmem:[#allocation2 + $0x99] sm:$0xff] }
  0x30   : > { %5138 = vmatmul.mubr.msk.f32.gmra.mrb[4].mxu1 %vm407_vm1, %v524_v39  ;;  %5335 = vmatmul.mubr.msk.f32.gmra.mrb[2].mxu0 %vm407_vm1, %v524_v39  ;;  %v371_v16 = vadd.f32 %v6033_v6, %v332_v8  ;;  %v372_v17 = vadd.f32 %v6033_v6, %v333_v9  ;;  %v335_v18 = vmul.f32 %v6022_v5, %v296_v1  ;;  %v6218_v28 = vld [vmem:[#allocation2 + $0xa9] sm:$0xff]  ;;  %v6228_v29 = vld [vmem:[#allocation2 + $0xb1] sm:$0xff]  ;;  %v486_v47 = vld [vmem:[#allocation2] sm:$0xff] }
  0x31   : > { %5140 = vmatprep.mubr.msk.f32.mxu1 %vm407_vm1, %v525_v45  ;;  %5337 = vmatprep.mubr.msk.f32.mxu0 %vm407_vm1, %v525_v45  ;;  %v398_v4 = vmax.f32 %v366_v57, 0.0  ;;  %479 = vst.msk [vmem:[#allocation2 + $0x141] sm:$0xff] %vm407_vm1, %v400_v12  ;;  %480 = vst.msk [vmem:[#allocation2 + $0x151] sm:$0xff] %vm407_vm1, %v401_v13  ;;  %v373_v20 = vadd.f32 %v6033_v6, %v334_v14  ;;  %v6230_v30 = vld [vmem:[#allocation2 + $0xc1] sm:$0xff]  ;;  %v6240_v31 = vld [vmem:[#allocation2 + $0xc9] sm:$0xff] }
  0x32   : > { %481 = vst.msk [vmem:[#allocation2 + $0x159] sm:$0xff] %vm407_vm1, %v402_v15  ;;  %v403_v22 = vmax.f32 %v371_v16, 0.0  ;;  %v404_v23 = vmax.f32 %v372_v17, 0.0  ;;  %v374_v5 = vadd.f32 %v6033_v6, %v335_v18  ;;  %7255 = vst [vmem:[#allocation4_spill] sm:$0xff] %v6202_v26  ;;  %v6205_v6 = vld [vmem:[#allocation2 + $0x91] sm:$0xff]  ;;  %v6242_v33 = vld [vmem:[#allocation2 + $0xd9] sm:$0xff] }
  0x33   : > { %477 = vst.msk [vmem:[#allocation2 + $0x129] sm:$0xff] %vm407_vm1, %v398_v4  ;;  %v405_v24 = vmax.f32 %v373_v20, 0.0  ;;  %7256 = vst [vmem:[#allocation5_spill] sm:$0xff] %v6205_v6  ;;  %v6252_v34 = vld [vmem:[#allocation2 + $0xe1] sm:$0xff]  ;;  %v6254_v35 = vld [vmem:[#allocation2 + $0xf1] sm:$0xff] }
  0x34   : > { %5141 = vmatmul.mubr.msk.f32.gmra.mrb[6].mxu1 %vm407_vm1, %v526_v60  ;;  %5338 = vmatmul.mubr.msk.f32.gmra.mrb[4].mxu0 %vm407_vm1, %v526_v60  ;;  %482 = vst.msk [vmem:[#allocation2 + $0x169] sm:$0xff] %vm407_vm1, %v403_v22  ;;  %483 = vst.msk [vmem:[#allocation2 + $0x171] sm:$0xff] %vm407_vm1, %v404_v23  ;;  %v406_v25 = vmax.f32 %v374_v5, 0.0  ;;  %v6264_v36 = vld [vmem:[#allocation2 + $0xf9] sm:$0xff]  ;;  %v6266_v37 = vld [vmem:[#allocation2 + $0x109] sm:$0xff] }
  0x35   : > { %5143 = vmatprep.mubr.msk.f32.mxu1 %vm407_vm1, %v527_v2  ;;  %5340 = vmatprep.mubr.msk.f32.mxu0 %vm407_vm1, %v527_v2  ;;  %484 = vst.msk [vmem:[#allocation2 + $0x181] sm:$0xff] %vm407_vm1, %v405_v24  ;;  %7257 = vst [vmem:[#allocation6_spill] sm:$0xff] %v6216_v27  ;;  %v6276_v38 = vld [vmem:[#allocation2 + $0x111] sm:$0xff]  ;;  %v6278_v39 = vld [vmem:[#allocation2 + $0x121] sm:$0xff] }
  0x36   : > { %485 = vst.msk [vmem:[#allocation2 + $0x189] sm:$0xff] %vm407_vm1, %v406_v25  ;;  %7258 = vst [vmem:[#allocation7_spill] sm:$0xff] %v6218_v28  ;;  %v6290_v41 = vld [vmem:[#allocation2 + $0x139] sm:$0xff]  ;;  %v487_v3 = vld [vmem:[#allocation2 + $0x8] sm:$0xff] }
  0x37   : > { %7259 = vst [vmem:[#allocation8_spill] sm:$0xff] %v6228_v29  ;;  %7260 = vst [vmem:[#allocation9_spill] sm:$0xff] %v6230_v30  ;;  %v6337_v50 = vld [vmem:[#allocation2 + $0x18] sm:$0xff]  ;;  %v6347_v52 = vld [vmem:[%s7218_s3 + $0xc] sm:$0xf] }
  0x38   : > { %5144 = vmatmul.mubr.msk.f32.gmra.mrb[8].mxu1 %vm407_vm1, %v528_v19  ;;  %5341 = vmatmul.mubr.msk.f32.gmra.mrb[6].mxu0 %vm407_vm1, %v528_v19  ;;  %7261 = vst [vmem:[#allocation10_spill] sm:$0xff] %v6240_v31  ;;  %7262 = vst [vmem:[#allocation11_spill] sm:$0xff] %v6242_v33  ;;  %v6300_v42 = vld [vmem:[#allocation2 + $0x141] sm:$0xff]  ;;  %v6302_v43 = vld [vmem:[#allocation2 + $0x151] sm:$0xff] }
  0x39   : > { %5146 = vmatprep.mubr.msk.f32.mxu1 %vm407_vm1, %v6190_v21  ;;  %5343 = vmatprep.mubr.msk.f32.mxu0 %vm407_vm1, %v6190_v21  ;;  %7263 = vst [vmem:[#allocation12_spill] sm:$0xff] %v6252_v34  ;;  %7264 = vst [vmem:[#allocation13_spill] sm:$0xff] %v6254_v35  ;;  %v6312_v44 = vld [vmem:[#allocation2 + $0x159] sm:$0xff]  ;;  %v6355_v54 = vld [vmem:[#allocation2 + $0x22] sm:$0xff] }
  0x3a   : > { %7265 = vst [vmem:[#allocation14_spill] sm:$0xff] %v6264_v36  ;;  %7266 = vst [vmem:[#allocation15_spill] sm:$0xff] %v6266_v37  ;;  %v6288_v40 = vld [vmem:[#allocation2 + $0x129] sm:$0xff]  ;;  %v6339_v51 = vld [vmem:[#allocation2 + $0x1a] sm:$0xff] }
  0x3b   : > { %7267 = vst [vmem:[#allocation16_spill] sm:$0xff] %v6276_v38  ;;  %7268 = vst [vmem:[#allocation17_spill] sm:$0xff] %v6278_v39  ;;  %v6314_v45 = vld [vmem:[#allocation2 + $0x169] sm:$0xff]  ;;  %v6324_v46 = vld [vmem:[#allocation2 + $0x171] sm:$0xff] }
  0x3c   : > { %5147 = vmatmul.mubr.msk.f32.gmra.mrb[10].mxu1 %vm407_vm1, %v6202_v26  ;;  %5344 = vmatmul.mubr.msk.f32.gmra.mrb[8].mxu0 %vm407_vm1, %v6202_v26  ;;  %7269 = vst [vmem:[#allocation18_spill] sm:$0xff] %v6288_v40  ;;  %7270 = vst [vmem:[#allocation19_spill] sm:$0xff] %v6290_v41  ;;  %v6326_v48 = vld [vmem:[#allocation2 + $0x181] sm:$0xff]  ;;  %v6359_v55 = vld [vmem:[#allocation2 + $0x30] sm:$0xff] }
  0x3d   : > { %5149 = vmatprep.mubr.msk.f32.mxu1 %vm407_vm1, %v6205_v6  ;;  %5346 = vmatprep.mubr.msk.f32.mxu0 %vm407_vm1, %v6205_v6  ;;  %7271 = vst [vmem:[#allocation20_spill] sm:$0xff] %v6300_v42  ;;  %7272 = vst [vmem:[#allocation21_spill] sm:$0xff] %v6302_v43  ;;  %v6335_v49 = vld [vmem:[#allocation2 + $0x189] sm:$0xff]  ;;  %v6353_v53 = vld [vmem:[#allocation2 + $0x20] sm:$0xff] }
  0x3e   : > { %7273 = vst [vmem:[#allocation22_spill] sm:$0xff] %v6312_v44  ;;  %7274 = vst [vmem:[#allocation23_spill] sm:$0xff] %v6314_v45  ;;  %v6361_v56 = vld [vmem:[#allocation2 + $0x32] sm:$0xff]  ;;  %v6366_v57 = vld [vmem:[%s7218_s3 + $0x1c] sm:$0xf] }
  0x3f   : > { %7275 = vst [vmem:[#allocation24_spill] sm:$0xff] %v6324_v46  ;;  %7276 = vst [vmem:[#allocation25_spill] sm:$0xff] %v6326_v48  ;;  %v6380_v58 = vld [vmem:[#allocation2 + $0x3a] sm:$0xff]  ;;  %v6384_v59 = vld [vmem:[#allocation2 + $0x48] sm:$0xff] }
  0x40   : > { %5150 = vmatmul.mubr.msk.f32.gmra.mrb[12].mxu1 %vm407_vm1, %v6216_v27  ;;  %5347 = vmatmul.mubr.msk.f32.gmra.mrb[10].mxu0 %vm407_vm1, %v6216_v27  ;;  %7277 = vst [vmem:[#allocation26_spill] sm:$0xff] %v6335_v49  ;;  %7278 = vst [vmem:[#allocation27_spill] sm:$0xff] %v6337_v50  ;;  %v6386_v60 = vld [vmem:[#allocation2 + $0x4a] sm:$0xff]  ;;  %v6400_v61 = vld [vmem:[#allocation2 + $0x52] sm:$0xff] }
  0x41   : > { %5152 = vmatprep.mubr.msk.f32.mxu1 %vm407_vm1, %v6218_v28  ;;  %5349 = vmatprep.mubr.msk.f32.mxu0 %vm407_vm1, %v6218_v28  ;;  %7279 = vst [vmem:[#allocation28_spill] sm:$0xff] %v6353_v53  ;;  %v6402_v62 = vld [vmem:[#allocation2 + $0x60] sm:$0xff]  ;;  %v6414_v0 = vld [vmem:[#allocation2 + $0x68] sm:$0xff]  ;;  %v6418_v2 = vld [vmem:[#allocation2 + $0x78] sm:$0xff] }
  0x42   : > { %v6404_v63 = vld [vmem:[#allocation2 + $0x62] sm:$0xff]  ;;  %v6416_v1 = vld [vmem:[#allocation2 + $0x6a] sm:$0xff]  ;;  %v6420_v4 = vld [vmem:[#allocation2 + $0x7a] sm:$0xff] }
  0x43   : > { %v6430_v7 = vld [vmem:[#allocation2 + $0x80] sm:$0xff]  ;;  %v6434_v9 = vld [vmem:[#allocation2 + $0x90] sm:$0xff]  ;;  %v6446_v12 = vld [vmem:[#allocation2 + $0x98] sm:$0xff] }
  0x44   : > { %5153 = vmatmul.mubr.msk.f32.gmra.mrb[14].mxu1 %vm407_vm1, %v6228_v29  ;;  %5350 = vmatmul.mubr.msk.f32.gmra.mrb[12].mxu0 %vm407_vm1, %v6228_v29  ;;  %v6432_v8 = vld [vmem:[#allocation2 + $0x82] sm:$0xff]  ;;  %v6436_v11 = vld [vmem:[#allocation2 + $0x92] sm:$0xff]  ;;  %v6448_v13 = vld [vmem:[#allocation2 + $0x9a] sm:$0xff] }
  0x45   : > { %5155 = vmatprep.mubr.msk.f32.mxu1 %vm407_vm1, %v6230_v30  ;;  %5352 = vmatprep.mubr.msk.f32.mxu0 %vm407_vm1, %v6230_v30  ;;  %v6450_v14 = vld [vmem:[#allocation2 + $0xa8] sm:$0xff]  ;;  %v6462_v16 = vld [vmem:[#allocation2 + $0xb0] sm:$0xff]  ;;  %v6466_v18 = vld [vmem:[#allocation2 + $0xc0] sm:$0xff] }
  0x46   : > { %v6452_v15 = vld [vmem:[#allocation2 + $0xaa] sm:$0xff]  ;;  %v6464_v17 = vld [vmem:[#allocation2 + $0xb2] sm:$0xff]  ;;  %v6468_v19 = vld [vmem:[#allocation2 + $0xc2] sm:$0xff] }
  0x47   : > { %v6478_v20 = vld [vmem:[#allocation2 + $0xc8] sm:$0xff]  ;;  %v6482_v23 = vld [vmem:[#allocation2 + $0xd8] sm:$0xff]  ;;  %v6494_v24 = vld [vmem:[#allocation2 + $0xe0] sm:$0xff] }
  0x48   : > { %5156 = vmatmul.mubr.msk.f32.gmra.mrb[16].mxu1 %vm407_vm1, %v6240_v31  ;;  %5353 = vmatmul.mubr.msk.f32.gmra.mrb[14].mxu0 %vm407_vm1, %v6240_v31  ;;  %v6480_v22 = vld [vmem:[#allocation2 + $0xca] sm:$0xff]  ;;  %v6484_v5 = vld [vmem:[#allocation2 + $0xda] sm:$0xff]  ;;  %v6496_v25 = vld [vmem:[#allocation2 + $0xe2] sm:$0xff] }
  0x49   : > { %5158 = vmatprep.mubr.msk.f32.mxu1 %vm407_vm1, %v6242_v33  ;;  %5355 = vmatprep.mubr.msk.f32.mxu0 %vm407_vm1, %v6242_v33  ;;  %v6564_v33 = vld [vmem:[#allocation2 + $0x152] sm:$0xff]  ;;  %v6576_v30 = vld [vmem:[#allocation2 + $0x15a] sm:$0xff]  ;;  %v6578_v29 = vld [vmem:[#allocation2 + $0x168] sm:$0xff] }
  0x4a   : > { %v6574_v31 = vld [vmem:[#allocation2 + $0x158] sm:$0xff]  ;;  %v6580_v28 = vld [vmem:[#allocation2 + $0x16a] sm:$0xff]  ;;  %v1202_v26 = vld [vmem:[#allocation2 + $0x2] sm:$0xff] }
  0x4b   : > { %7280 = vst [vmem:[#allocation29_spill] sm:$0xff] %v6580_v28  ;;  %v6590_v27 = vld [vmem:[#allocation2 + $0x170] sm:$0xff]  ;;  %v6594_v21 = vld [vmem:[#allocation2 + $0x182] sm:$0xff] }
  0x4c   : > { %5159 = vmatmul.mubr.msk.f32.gmra.mrb[18].mxu1 %vm407_vm1, %v6252_v34  ;;  %5356 = vmatmul.mubr.msk.f32.gmra.mrb[16].mxu0 %vm407_vm1, %v6252_v34  ;;  %v6562_v34 = vld [vmem:[#allocation2 + $0x150] sm:$0xff]  ;;  %7282 = vst [vmem:[#allocation31_spill] sm:$0xff] %v6594_v21 }
  0x4d   : > { %5161 = vmatprep.mubr.msk.f32.mxu1 %vm407_vm1, %v6254_v35  ;;  %5358 = vmatprep.mubr.msk.f32.mxu0 %vm407_vm1, %v6254_v35  ;;  %v6560_v35 = vld [vmem:[#allocation2 + $0x142] sm:$0xff]  ;;  %v6592_v6 = vld [vmem:[#allocation2 + $0x172] sm:$0xff] }
  0x4e   : > { %7281 = vst [vmem:[#allocation30_spill] sm:$0xff] %v6592_v6 }
  0x50   : > { %5162 = vmatmul.mubr.msk.f32.gmra.mrb[20].mxu1 %vm407_vm1, %v6264_v36  ;;  %5359 = vmatmul.mubr.msk.f32.gmra.mrb[18].mxu0 %vm407_vm1, %v6264_v36  ;;  %v6558_v36 = vld [vmem:[#allocation2 + $0x140] sm:$0xff] }
  0x51   : > { %5164 = vmatprep.mubr.msk.f32.mxu1 %vm407_vm1, %v6266_v37  ;;  %5361 = vmatprep.mubr.msk.f32.mxu0 %vm407_vm1, %v6266_v37  ;;  %v6548_v37 = vld [vmem:[#allocation2 + $0x13a] sm:$0xff] }
  0x54   : > { %5165 = vmatmul.mubr.msk.f32.gmra.mrb[22].mxu1 %vm407_vm1, %v6276_v38  ;;  %5362 = vmatmul.mubr.msk.f32.gmra.mrb[20].mxu0 %vm407_vm1, %v6276_v38  ;;  %v6546_v38 = vld [vmem:[#allocation2 + $0x138] sm:$0xff] }
  0x55   : > { %5167 = vmatprep.mubr.msk.f32.mxu1 %vm407_vm1, %v6278_v39  ;;  %5364 = vmatprep.mubr.msk.f32.mxu0 %vm407_vm1, %v6278_v39  ;;  %v6544_v39 = vld [vmem:[#allocation2 + $0x12a] sm:$0xff] }
  0x58   : > { %5168 = vmatmul.mubr.msk.f32.gmra.mrb[24].mxu1 %vm407_vm1, %v6288_v40  ;;  %5365 = vmatmul.mubr.msk.f32.gmra.mrb[22].mxu0 %vm407_vm1, %v6288_v40  ;;  %v6542_v40 = vld [vmem:[#allocation2 + $0x128] sm:$0xff] }
  0x59   : > { %5170 = vmatprep.mubr.msk.f32.mxu1 %vm407_vm1, %v6290_v41  ;;  %5367 = vmatprep.mubr.msk.f32.mxu0 %vm407_vm1, %v6290_v41  ;;  %v6532_v41 = vld [vmem:[#allocation2 + $0x122] sm:$0xff] }
  0x5c   : > { %5171 = vmatmul.mubr.msk.f32.gmra.mrb[26].mxu1 %vm407_vm1, %v6300_v42  ;;  %5368 = vmatmul.mubr.msk.f32.gmra.mrb[24].mxu0 %vm407_vm1, %v6300_v42  ;;  %v6530_v42 = vld [vmem:[#allocation2 + $0x120] sm:$0xff] }
  0x5d   : > { %5173 = vmatprep.mubr.msk.f32.mxu1 %vm407_vm1, %v6302_v43  ;;  %5370 = vmatprep.mubr.msk.f32.mxu0 %vm407_vm1, %v6302_v43  ;;  %v6528_v43 = vld [vmem:[#allocation2 + $0x112] sm:$0xff] }
  0x60   : > { %5174 = vmatmul.mubr.msk.f32.gmra.mrb[28].mxu1 %vm407_vm1, %v6312_v44  ;;  %5371 = vmatmul.mubr.msk.f32.gmra.mrb[26].mxu0 %vm407_vm1, %v6312_v44  ;;  %v6526_v44 = vld [vmem:[#allocation2 + $0x110] sm:$0xff] }
  0x61   : > { %5176 = vmatprep.mubr.msk.f32.mxu1 %vm407_vm1, %v6314_v45  ;;  %5373 = vmatprep.mubr.msk.f32.mxu0 %vm407_vm1, %v6314_v45  ;;  %v6516_v45 = vld [vmem:[#allocation2 + $0x10a] sm:$0xff] }
  0x64   : > { %5177 = vmatmul.mubr.msk.f32.gmra.mrb[30].mxu1 %vm407_vm1, %v6324_v46  ;;  %5374 = vmatmul.mubr.msk.f32.gmra.mrb[28].mxu0 %vm407_vm1, %v6324_v46  ;;  %v6514_v46 = vld [vmem:[#allocation2 + $0x108] sm:$0xff] }
  0x65   : > { %5181 = vmatprep.mubr.msk.f32.mxu1 %vm407_vm1, %v486_v47  ;;  %5376 = vmatprep.mubr.msk.f32.mxu0 %vm407_vm1, %v6326_v48  ;;  %v6498_v47 = vld [vmem:[#allocation2 + $0xf0] sm:$0xff]  ;;  %v6512_v48 = vld [vmem:[#allocation2 + $0xfa] sm:$0xff] }
  0x68   : > { %5182 = vmatmul.mubr.msk.f32.vlgmr.msra.gmra.mrb[0].mxu1 %vm407_vm1, %v487_v3  ;;  %5377 = vmatmul.mubr.msk.f32.gmra.mrb[30].mxu0 %vm407_vm1, %v6335_v49  ;;  %v6500_v3 = vld [vmem:[#allocation2 + $0xf2] sm:$0xff] }
  0x69   : > { %5184 = vmatprep.mubr.msk.f32.mxu1 %vm407_vm1, %v6337_v50  ;;  %5381 = vmatprep.mubr.msk.f32.mxu0 %vm407_vm1, %v6339_v51  ;;  %v6510_v49 = vld [vmem:[#allocation2 + $0xf8] sm:$0xff]  ;;  %v6603_v50 = vld [vmem:[#allocation2 + $0x18a] sm:$0xff] }
  0x6a   : > { %5230 = vmatpush3.msk.msra.mxu1 %vm649_vm0, %v6041_v10  ;;  %v6378_v10 = vld [vmem:[#allocation2 + $0x38] sm:$0xff]  ;;  %7283 = vst [vmem:[#allocation32_spill] sm:$0xff] %v6603_v50 }
  0x6b   : > { %5279 = vmatprep.subr.msk.mxu1 %vm649_vm0, %v6347_v52 }
  0x6c   : > { %5185 = vmatmul.mubr.msk.f32.gmra.mrb[2].mxu1 %vm407_vm1, %v6353_v53  ;;  %5382 = vmatmul.mubr.msk.f32.vlgmr.msra.gmra.mrb[0].mxu0 %vm407_vm1, %v6355_v54  ;;  %v1203_v53 = vld [vmem:[#allocation2 + $0xa] sm:$0xff] }
  0x6d   : > { %5430 = vmatpush3.msk.msra.mxu0 %vm649_vm0, %v6126_v32  ;;  %5187 = vmatprep.mubr.msk.f32.mxu1 %vm407_vm1, %v6359_v55  ;;  %v6398_v32 = vld [vmem:[#allocation2 + $0x50] sm:$0xff] }
  0x6e   : > { %5384 = vmatprep.mubr.msk.f32.mxu0 %vm407_vm1, %v6361_v56  ;;  %5479 = vmatprep.subr.msk.mxu0 %vm649_vm0, %v6366_v57 }
  0x70   : > { %5188 = vmatmul.mubr.msk.f32.gmra.mrb[4].mxu1 %vm407_vm1, %v6378_v10  ;;  %5385 = vmatmul.mubr.msk.f32.gmra.mrb[2].mxu0 %vm407_vm1, %v6380_v58 }
  0x71   : > { %5190 = vmatprep.mubr.msk.f32.mxu1 %vm407_vm1, %v6384_v59  ;;  %5387 = vmatprep.mubr.msk.f32.mxu0 %vm407_vm1, %v6386_v60 }
  0x74   : > { %5191 = vmatmul.mubr.msk.f32.gmra.mrb[6].mxu1 %vm407_vm1, %v6398_v32  ;;  %5388 = vmatmul.mubr.msk.f32.gmra.mrb[4].mxu0 %vm407_vm1, %v6400_v61 }
  0x75   : > { %5193 = vmatprep.mubr.msk.f32.mxu1 %vm407_vm1, %v6402_v62  ;;  %5390 = vmatprep.mubr.msk.f32.mxu0 %vm407_vm1, %v6404_v63 }
  0x78   : > { %5194 = vmatmul.mubr.msk.f32.gmra.mrb[8].mxu1 %vm407_vm1, %v6414_v0  ;;  %5391 = vmatmul.mubr.msk.f32.gmra.mrb[6].mxu0 %vm407_vm1, %v6416_v1 }
  0x79   : > { %5196 = vmatprep.mubr.msk.f32.mxu1 %vm407_vm1, %v6418_v2  ;;  %5393 = vmatprep.mubr.msk.f32.mxu0 %vm407_vm1, %v6420_v4 }
  0x7c   : > { %5197 = vmatmul.mubr.msk.f32.gmra.mrb[10].mxu1 %vm407_vm1, %v6430_v7  ;;  %5394 = vmatmul.mubr.msk.f32.gmra.mrb[8].mxu0 %vm407_vm1, %v6432_v8 }
  0x7d   : > { %5199 = vmatprep.mubr.msk.f32.mxu1 %vm407_vm1, %v6434_v9  ;;  %5396 = vmatprep.mubr.msk.f32.mxu0 %vm407_vm1, %v6436_v11 }
  0x80   : > { %5200 = vmatmul.mubr.msk.f32.gmra.mrb[12].mxu1 %vm407_vm1, %v6446_v12  ;;  %5397 = vmatmul.mubr.msk.f32.gmra.mrb[10].mxu0 %vm407_vm1, %v6448_v13 }
  0x81   : > { %5202 = vmatprep.mubr.msk.f32.mxu1 %vm407_vm1, %v6450_v14  ;;  %5399 = vmatprep.mubr.msk.f32.mxu0 %vm407_vm1, %v6452_v15 }
  0x84   : > { %5203 = vmatmul.mubr.msk.f32.gmra.mrb[14].mxu1 %vm407_vm1, %v6462_v16  ;;  %5400 = vmatmul.mubr.msk.f32.gmra.mrb[12].mxu0 %vm407_vm1, %v6464_v17 }
  0x85   : > { %5205 = vmatprep.mubr.msk.f32.mxu1 %vm407_vm1, %v6466_v18  ;;  %5402 = vmatprep.mubr.msk.f32.mxu0 %vm407_vm1, %v6468_v19 }
  0x88   : > { %5206 = vmatmul.mubr.msk.f32.gmra.mrb[16].mxu1 %vm407_vm1, %v6478_v20  ;;  %5403 = vmatmul.mubr.msk.f32.gmra.mrb[14].mxu0 %vm407_vm1, %v6480_v22 }
  0x89   : > { %5208 = vmatprep.mubr.msk.f32.mxu1 %vm407_vm1, %v6482_v23  ;;  %5405 = vmatprep.mubr.msk.f32.mxu0 %vm407_vm1, %v6484_v5 }
  0x8c   : > { %5209 = vmatmul.mubr.msk.f32.gmra.mrb[18].mxu1 %vm407_vm1, %v6494_v24  ;;  %5406 = vmatmul.mubr.msk.f32.gmra.mrb[16].mxu0 %vm407_vm1, %v6496_v25 }
  0x8d   : > { %5211 = vmatprep.mubr.msk.f32.mxu1 %vm407_vm1, %v6498_v47  ;;  %5408 = vmatprep.mubr.msk.f32.mxu0 %vm407_vm1, %v6500_v3 }
  0x90   : > { %5212 = vmatmul.mubr.msk.f32.gmra.mrb[20].mxu1 %vm407_vm1, %v6510_v49  ;;  %5409 = vmatmul.mubr.msk.f32.gmra.mrb[18].mxu0 %vm407_vm1, %v6512_v48 }
  0x91   : > { %5214 = vmatprep.mubr.msk.f32.mxu1 %vm407_vm1, %v6514_v46  ;;  %5411 = vmatprep.mubr.msk.f32.mxu0 %vm407_vm1, %v6516_v45 }
  0x94   : > { %5215 = vmatmul.mubr.msk.f32.gmra.mrb[22].mxu1 %vm407_vm1, %v6526_v44  ;;  %5412 = vmatmul.mubr.msk.f32.gmra.mrb[20].mxu0 %vm407_vm1, %v6528_v43 }
  0x95   : > { %5217 = vmatprep.mubr.msk.f32.mxu1 %vm407_vm1, %v6530_v42  ;;  %5414 = vmatprep.mubr.msk.f32.mxu0 %vm407_vm1, %v6532_v41 }
  0x98   : > { %5218 = vmatmul.mubr.msk.f32.gmra.mrb[24].mxu1 %vm407_vm1, %v6542_v40  ;;  %5415 = vmatmul.mubr.msk.f32.gmra.mrb[22].mxu0 %vm407_vm1, %v6544_v39 }
  0x99   : > { %5220 = vmatprep.mubr.msk.f32.mxu1 %vm407_vm1, %v6546_v38  ;;  %5417 = vmatprep.mubr.msk.f32.mxu0 %vm407_vm1, %v6548_v37 }
  0x9c   : > { %5221 = vmatmul.mubr.msk.f32.gmra.mrb[26].mxu1 %vm407_vm1, %v6558_v36  ;;  %5418 = vmatmul.mubr.msk.f32.gmra.mrb[24].mxu0 %vm407_vm1, %v6560_v35 }
  0x9d   : > { %5223 = vmatprep.mubr.msk.f32.mxu1 %vm407_vm1, %v6562_v34  ;;  %5420 = vmatprep.mubr.msk.f32.mxu0 %vm407_vm1, %v6564_v33 }
  0xa0   : > { %5224 = vmatmul.mubr.msk.f32.gmra.mrb[28].mxu1 %vm407_vm1, %v6574_v31  ;;  %5421 = vmatmul.mubr.msk.f32.gmra.mrb[26].mxu0 %vm407_vm1, %v6576_v30 }
  0xa1   : > { %5226 = vmatprep.mubr.msk.f32.mxu1 %vm407_vm1, %v6578_v29  ;;  %5423 = vmatprep.mubr.msk.f32.mxu0 %vm407_vm1, %v6580_v28  ;;  %v6611_v28 = vld [vmem:[%s7219_s4] sm:$0xf] }
  0xa4   : > { %5227 = vmatmul.mubr.msk.f32.gmra.mrb[30].mxu1 %vm407_vm1, %v6590_v27  ;;  %5424 = vmatmul.mubr.msk.f32.gmra.mrb[28].mxu0 %vm407_vm1, %v6592_v6 }
  0xa5   : > { %5231 = vmatprep.mubr.msk.f32.mxu1 %vm407_vm1, %v1202_v26  ;;  %5426 = vmatprep.mubr.msk.f32.mxu0 %vm407_vm1, %v6594_v21  ;;  %v6622_v26 = vld [vmem:[%s7218_s3 + $0x20] sm:$0xf]  ;;  %v6753_v21 = vld [vmem:[#allocation2 + $0x31] sm:$0xff] }
  0xa8   : > { %5232 = vmatmul.mubr.msk.f32.vlgmr.msra.gmra.mrb[0].mxu1 %vm407_vm1, %v1203_v53  ;;  %5427 = vmatmul.mubr.msk.f32.gmra.mrb[30].mxu0 %vm407_vm1, %v6603_v50  ;;  %v6744_v53 = vld [vmem:[#allocation2 + $0x188] sm:$0xff]  ;;  %v2794_v50 = vld [vmem:[#allocation2 + $0x1a0] sm:$0xff] }
  0xa9   : > { %5234 = vmatprep.mubr.msk.f32.mxu1 %vm407_vm1, %v6339_v51  ;;  %5431 = vmatprep.mubr.msk.f32.mxu0 %vm407_vm1, %v6359_v55  ;;  %v6734_v51 = vld [vmem:[#allocation2 + $0x180] sm:$0xff] }
  0xaa   : > { %5280 = vmatpush3.msk.msra.mxu1 %vm649_vm0, %v6347_v52  ;;  %v7284_v52 = vld [vmem:[#allocation29_spill] sm:$0xff] }
  0xab   : > { %5579 = vmatprep.subr.msk.mxu1 %vm649_vm0, %v6611_v28 }
  0xac   : > { %5235 = vmatmul.mubr.msk.f32.gmra.mrb[2].mxu1 %vm407_vm1, %v6355_v54  ;;  %5432 = vmatmul.mubr.msk.f32.vlgmr.msra.gmra.mrb[0].mxu0 %vm407_vm1, %v6378_v10  ;;  %v2793_v54 = vld [vmem:[#allocation2 + $0x198] sm:$0xff] }
  0xad   : > { %5480 = vmatpush3.msk.msra.mxu0 %vm649_vm0, %v6366_v57  ;;  %5237 = vmatprep.mubr.msk.f32.mxu1 %vm407_vm1, %v6361_v56  ;;  %v7285_v57 = vld [vmem:[#allocation27_spill] sm:$0xff] }
  0xae   : > { %5434 = vmatprep.mubr.msk.f32.mxu0 %vm407_vm1, %v6384_v59  ;;  %5529 = vmatprep.subr.msk.mxu0 %vm649_vm0, %v6622_v26 }
  0xb0   : > { %5238 = vmatmul.mubr.msk.f32.gmra.mrb[4].mxu1 %vm407_vm1, %v6380_v58  ;;  %5435 = vmatmul.mubr.msk.f32.gmra.mrb[2].mxu0 %vm407_vm1, %v6398_v32 }
  0xb1   : > { %5240 = vmatprep.mubr.msk.f32.mxu1 %vm407_vm1, %v6386_v60  ;;  %5437 = vmatprep.mubr.msk.f32.mxu0 %vm407_vm1, %v6402_v62 }
  0xb4   : > { %5241 = vmatmul.mubr.msk.f32.gmra.mrb[6].mxu1 %vm407_vm1, %v6400_v61  ;;  %5438 = vmatmul.mubr.msk.f32.gmra.mrb[4].mxu0 %vm407_vm1, %v6414_v0 }
  0xb5   : > { %5243 = vmatprep.mubr.msk.f32.mxu1 %vm407_vm1, %v6404_v63  ;;  %5440 = vmatprep.mubr.msk.f32.mxu0 %vm407_vm1, %v6418_v2 }
  0xb8   : > { %5244 = vmatmul.mubr.msk.f32.gmra.mrb[8].mxu1 %vm407_vm1, %v6416_v1  ;;  %5441 = vmatmul.mubr.msk.f32.gmra.mrb[6].mxu0 %vm407_vm1, %v6430_v7 }
  0xb9   : > { %5246 = vmatprep.mubr.msk.f32.mxu1 %vm407_vm1, %v6420_v4  ;;  %5443 = vmatprep.mubr.msk.f32.mxu0 %vm407_vm1, %v6434_v9 }
  0xbc   : > { %5247 = vmatmul.mubr.msk.f32.gmra.mrb[10].mxu1 %vm407_vm1, %v6432_v8  ;;  %5444 = vmatmul.mubr.msk.f32.gmra.mrb[8].mxu0 %vm407_vm1, %v6446_v12 }
  0xbd   : > { %5249 = vmatprep.mubr.msk.f32.mxu1 %vm407_vm1, %v6436_v11  ;;  %5446 = vmatprep.mubr.msk.f32.mxu0 %vm407_vm1, %v6450_v14 }
  0xc0   : > { %5250 = vmatmul.mubr.msk.f32.gmra.mrb[12].mxu1 %vm407_vm1, %v6448_v13  ;;  %5447 = vmatmul.mubr.msk.f32.gmra.mrb[10].mxu0 %vm407_vm1, %v6462_v16 }
  0xc1   : > { %5252 = vmatprep.mubr.msk.f32.mxu1 %vm407_vm1, %v6452_v15  ;;  %5449 = vmatprep.mubr.msk.f32.mxu0 %vm407_vm1, %v6466_v18 }
  0xc4   : > { %5253 = vmatmul.mubr.msk.f32.gmra.mrb[14].mxu1 %vm407_vm1, %v6464_v17  ;;  %5450 = vmatmul.mubr.msk.f32.gmra.mrb[12].mxu0 %vm407_vm1, %v6478_v20 }
  0xc5   : > { %5255 = vmatprep.mubr.msk.f32.mxu1 %vm407_vm1, %v6468_v19  ;;  %5452 = vmatprep.mubr.msk.f32.mxu0 %vm407_vm1, %v6482_v23 }
  0xc8   : > { %5256 = vmatmul.mubr.msk.f32.gmra.mrb[16].mxu1 %vm407_vm1, %v6480_v22  ;;  %5453 = vmatmul.mubr.msk.f32.gmra.mrb[14].mxu0 %vm407_vm1, %v6494_v24 }
  0xc9   : > { %5258 = vmatprep.mubr.msk.f32.mxu1 %vm407_vm1, %v6484_v5  ;;  %5455 = vmatprep.mubr.msk.f32.mxu0 %vm407_vm1, %v6498_v47 }
  0xcc   : > { %5259 = vmatmul.mubr.msk.f32.gmra.mrb[18].mxu1 %vm407_vm1, %v6496_v25  ;;  %5456 = vmatmul.mubr.msk.f32.gmra.mrb[16].mxu0 %vm407_vm1, %v6510_v49 }
  0xcd   : > { %5261 = vmatprep.mubr.msk.f32.mxu1 %vm407_vm1, %v6500_v3  ;;  %5458 = vmatprep.mubr.msk.f32.mxu0 %vm407_vm1, %v6514_v46 }
  0xd0   : > { %5262 = vmatmul.mubr.msk.f32.gmra.mrb[20].mxu1 %vm407_vm1, %v6512_v48  ;;  %5459 = vmatmul.mubr.msk.f32.gmra.mrb[18].mxu0 %vm407_vm1, %v6526_v44 }
  0xd1   : > { %5264 = vmatprep.mubr.msk.f32.mxu1 %vm407_vm1, %v6516_v45  ;;  %5461 = vmatprep.mubr.msk.f32.mxu0 %vm407_vm1, %v6530_v42 }
  0xd4   : > { %5265 = vmatmul.mubr.msk.f32.gmra.mrb[22].mxu1 %vm407_vm1, %v6528_v43  ;;  %5462 = vmatmul.mubr.msk.f32.gmra.mrb[20].mxu0 %vm407_vm1, %v6542_v40 }
  0xd5   : > { %5267 = vmatprep.mubr.msk.f32.mxu1 %vm407_vm1, %v6532_v41  ;;  %5464 = vmatprep.mubr.msk.f32.mxu0 %vm407_vm1, %v6546_v38 }
  0xd8   : > { %5268 = vmatmul.mubr.msk.f32.gmra.mrb[24].mxu1 %vm407_vm1, %v6544_v39  ;;  %5465 = vmatmul.mubr.msk.f32.gmra.mrb[22].mxu0 %vm407_vm1, %v6558_v36 }
  0xd9   : > { %5270 = vmatprep.mubr.msk.f32.mxu1 %vm407_vm1, %v6548_v37  ;;  %5467 = vmatprep.mubr.msk.f32.mxu0 %vm407_vm1, %v6562_v34 }
  0xdc   : > { %5271 = vmatmul.mubr.msk.f32.gmra.mrb[26].mxu1 %vm407_vm1, %v6560_v35  ;;  %5468 = vmatmul.mubr.msk.f32.gmra.mrb[24].mxu0 %vm407_vm1, %v6574_v31 }
  0xdd   : > { %5273 = vmatprep.mubr.msk.f32.mxu1 %vm407_vm1, %v6564_v33  ;;  %5470 = vmatprep.mubr.msk.f32.mxu0 %vm407_vm1, %v6578_v29 }
  0xe0   : > { %5274 = vmatmul.mubr.msk.f32.gmra.mrb[28].mxu1 %vm407_vm1, %v6576_v30  ;;  %5471 = vmatmul.mubr.msk.f32.gmra.mrb[26].mxu0 %vm407_vm1, %v6590_v27 }
  0xe1   : > { %5276 = vmatprep.mubr.msk.f32.mxu1 %vm407_vm1, %v7284_v52  ;;  %5473 = vmatprep.mubr.msk.f32.mxu0 %vm407_vm1, %v6734_v51  ;;  %v7286_v52 = vld [vmem:[#allocation28_spill] sm:$0xff] }
  0xe4   : > { %5277 = vmatmul.mubr.msk.f32.gmra.mrb[30].mxu1 %vm407_vm1, %v6592_v6  ;;  %5474 = vmatmul.mubr.msk.f32.gmra.mrb[28].mxu0 %vm407_vm1, %v6744_v53  ;;  %v6762_v6 = vld [vmem:[#allocation2 + $0x39] sm:$0xff] }
  0xe5   : > { %5281 = vmatprep.mubr.msk.f32.mxu1 %vm407_vm1, %v7285_v57  ;;  %5476 = vmatprep.mubr.msk.f32.mxu0 %vm407_vm1, %v2793_v54  ;;  %v6766_v54 = vld [vmem:[#allocation2 + $0x49] sm:$0xff] }
  0xe8   : > { %5282 = vmatmul.mubr.msk.f32.vlgmr.msra.gmra.mrb[0].mxu1 %vm407_vm1, %v7286_v52  ;;  %5477 = vmatmul.mubr.msk.f32.gmra.mrb[30].mxu0 %vm407_vm1, %v2794_v50  ;;  %v6776_v50 = vld [vmem:[#allocation2 + $0x51] sm:$0xff]  ;;  %v3574_v52 = vld [vmem:[#allocation2 + $0x1a2] sm:$0xff] }
  0xe9   : > { %5284 = vmatprep.mubr.msk.f32.mxu1 %vm407_vm1, %v6359_v55  ;;  %5481 = vmatprep.mubr.msk.f32.mxu0 %vm407_vm1, %v6753_v21  ;;  %v6790_v55 = vld [vmem:[#allocation2 + $0x69] sm:$0xff] }
  0xea   : > { %5580 = vmatpush3.msk.msra.mxu1 %vm649_vm0, %v6611_v28  ;;  %v6780_v28 = vld [vmem:[#allocation2 + $0x61] sm:$0xff] }
  0xec   : > { %5285 = vmatmul.mubr.msk.f32.gmra.mrb[2].mxu1 %vm407_vm1, %v6378_v10  ;;  %5482 = vmatmul.mubr.msk.f32.vlgmr.msra.gmra.mrb[0].mxu0 %vm407_vm1, %v6762_v6  ;;  %v7287_v10 = vld [vmem:[#allocation3_spill] sm:$0xff] }
  0xed   : > { %5530 = vmatpush3.msk.msra.mxu0 %vm649_vm0, %v6622_v26  ;;  %5287 = vmatprep.mubr.msk.f32.mxu1 %vm407_vm1, %v6384_v59  ;;  %v7288_v59 = vld [vmem:[#allocation4_spill] sm:$0xff]  ;;  %v3967_v26 = vld [vmem:[#allocation2 + $0x21] sm:$0xff] }
  0xee   : > { %5484 = vmatprep.mubr.msk.f32.mxu0 %vm407_vm1, %v6766_v54 }
  0xf0   : > { %5288 = vmatmul.mubr.msk.f32.gmra.mrb[4].mxu1 %vm407_vm1, %v6398_v32  ;;  %5485 = vmatmul.mubr.msk.f32.gmra.mrb[2].mxu0 %vm407_vm1, %v6776_v50  ;;  %v7289_v32 = vld [vmem:[#allocation5_spill] sm:$0xff] }
  0xf1   : > { %5290 = vmatprep.mubr.msk.f32.mxu1 %vm407_vm1, %v6402_v62  ;;  %5487 = vmatprep.mubr.msk.f32.mxu0 %vm407_vm1, %v6780_v28  ;;  %v7290_v62 = vld [vmem:[#allocation6_spill] sm:$0xff] }
  0xf4   : > { %5291 = vmatmul.mubr.msk.f32.gmra.mrb[6].mxu1 %vm407_vm1, %v6414_v0  ;;  %5488 = vmatmul.mubr.msk.f32.gmra.mrb[4].mxu0 %vm407_vm1, %v6790_v55  ;;  %v7291_v0 = vld [vmem:[#allocation7_spill] sm:$0xff] }
  0xf5   : > { %5293 = vmatprep.mubr.msk.f32.mxu1 %vm407_vm1, %v6418_v2  ;;  %5490 = vmatprep.mubr.msk.f32.mxu0 %vm407_vm1, %v7287_v10  ;;  %v7292_v2 = vld [vmem:[#allocation8_spill] sm:$0xff] }
  0xf8   : > { %5294 = vmatmul.mubr.msk.f32.gmra.mrb[8].mxu1 %vm407_vm1, %v6430_v7  ;;  %5491 = vmatmul.mubr.msk.f32.gmra.mrb[6].mxu0 %vm407_vm1, %v7288_v59  ;;  %v7293_v7 = vld [vmem:[#allocation9_spill] sm:$0xff] }
  0xf9   : > { %5296 = vmatprep.mubr.msk.f32.mxu1 %vm407_vm1, %v6434_v9  ;;  %5493 = vmatprep.mubr.msk.f32.mxu0 %vm407_vm1, %v7289_v32  ;;  %v7294_v9 = vld [vmem:[#allocation10_spill] sm:$0xff] }
  0xfc   : > { %5297 = vmatmul.mubr.msk.f32.gmra.mrb[10].mxu1 %vm407_vm1, %v6446_v12  ;;  %5494 = vmatmul.mubr.msk.f32.gmra.mrb[8].mxu0 %vm407_vm1, %v7290_v62  ;;  %v7295_v12 = vld [vmem:[#allocation11_spill] sm:$0xff] }
  0xfd   : > { %5299 = vmatprep.mubr.msk.f32.mxu1 %vm407_vm1, %v6450_v14  ;;  %5496 = vmatprep.mubr.msk.f32.mxu0 %vm407_vm1, %v7291_v0  ;;  %v7296_v14 = vld [vmem:[#allocation12_spill] sm:$0xff] }
 0x100   : > { %5300 = vmatmul.mubr.msk.f32.gmra.mrb[12].mxu1 %vm407_vm1, %v6462_v16  ;;  %5497 = vmatmul.mubr.msk.f32.gmra.mrb[10].mxu0 %vm407_vm1, %v7292_v2  ;;  %v7297_v16 = vld [vmem:[#allocation13_spill] sm:$0xff] }
 0x101   : > { %5302 = vmatprep.mubr.msk.f32.mxu1 %vm407_vm1, %v6466_v18  ;;  %5499 = vmatprep.mubr.msk.f32.mxu0 %vm407_vm1, %v7293_v7  ;;  %v7298_v18 = vld [vmem:[#allocation14_spill] sm:$0xff] }
 0x104   : > { %5303 = vmatmul.mubr.msk.f32.gmra.mrb[14].mxu1 %vm407_vm1, %v6478_v20  ;;  %5500 = vmatmul.mubr.msk.f32.gmra.mrb[12].mxu0 %vm407_vm1, %v7294_v9  ;;  %v7299_v20 = vld [vmem:[#allocation15_spill] sm:$0xff] }
 0x105   : > { %5305 = vmatprep.mubr.msk.f32.mxu1 %vm407_vm1, %v6482_v23  ;;  %5502 = vmatprep.mubr.msk.f32.mxu0 %vm407_vm1, %v7295_v12  ;;  %v7300_v23 = vld [vmem:[#allocation16_spill] sm:$0xff] }
 0x108   : > { %5306 = vmatmul.mubr.msk.f32.gmra.mrb[16].mxu1 %vm407_vm1, %v6494_v24  ;;  %5503 = vmatmul.mubr.msk.f32.gmra.mrb[14].mxu0 %vm407_vm1, %v7296_v14  ;;  %v7301_v24 = vld [vmem:[#allocation17_spill] sm:$0xff] }
 0x109   : > { %5308 = vmatprep.mubr.msk.f32.mxu1 %vm407_vm1, %v6498_v47  ;;  %5505 = vmatprep.mubr.msk.f32.mxu0 %vm407_vm1, %v7297_v16  ;;  %v3966_v47 = vld [vmem:[#allocation2 + $0x19] sm:$0xff] }
 0x10c   : > { %5309 = vmatmul.mubr.msk.f32.gmra.mrb[18].mxu1 %vm407_vm1, %v6510_v49  ;;  %5506 = vmatmul.mubr.msk.f32.gmra.mrb[16].mxu0 %vm407_vm1, %v7298_v18  ;;  %v7302_v49 = vld [vmem:[#allocation18_spill] sm:$0xff] }
 0x10d   : > { %5311 = vmatprep.mubr.msk.f32.mxu1 %vm407_vm1, %v6514_v46  ;;  %5508 = vmatprep.mubr.msk.f32.mxu0 %vm407_vm1, %v7299_v20  ;;  %v7303_v46 = vld [vmem:[#allocation19_spill] sm:$0xff] }
 0x110   : > { %5312 = vmatmul.mubr.msk.f32.gmra.mrb[20].mxu1 %vm407_vm1, %v6526_v44  ;;  %5509 = vmatmul.mubr.msk.f32.gmra.mrb[18].mxu0 %vm407_vm1, %v7300_v23  ;;  %v7304_v44 = vld [vmem:[#allocation20_spill] sm:$0xff] }
 0x111   : > { %5314 = vmatprep.mubr.msk.f32.mxu1 %vm407_vm1, %v6530_v42  ;;  %5511 = vmatprep.mubr.msk.f32.mxu0 %vm407_vm1, %v7301_v24  ;;  %v7305_v42 = vld [vmem:[#allocation21_spill] sm:$0xff] }
 0x114   : > { %5315 = vmatmul.mubr.msk.f32.gmra.mrb[22].mxu1 %vm407_vm1, %v6542_v40  ;;  %5512 = vmatmul.mubr.msk.f32.gmra.mrb[20].mxu0 %vm407_vm1, %v7302_v49  ;;  %v7306_v40 = vld [vmem:[#allocation22_spill] sm:$0xff] }
 0x115   : > { %5317 = vmatprep.mubr.msk.f32.mxu1 %vm407_vm1, %v6546_v38  ;;  %5514 = vmatprep.mubr.msk.f32.mxu0 %vm407_vm1, %v7303_v46  ;;  %v7307_v38 = vld [vmem:[#allocation23_spill] sm:$0xff] }
 0x118   : > { %5318 = vmatmul.mubr.msk.f32.gmra.mrb[24].mxu1 %vm407_vm1, %v6558_v36  ;;  %5515 = vmatmul.mubr.msk.f32.gmra.mrb[22].mxu0 %vm407_vm1, %v7304_v44  ;;  %v7308_v36 = vld [vmem:[#allocation24_spill] sm:$0xff] }
 0x119   : > { %5320 = vmatprep.mubr.msk.f32.mxu1 %vm407_vm1, %v6562_v34  ;;  %5517 = vmatprep.mubr.msk.f32.mxu0 %vm407_vm1, %v7305_v42  ;;  %v7309_v34 = vld [vmem:[#allocation25_spill] sm:$0xff] }
 0x11c   : > { %5321 = vmatmul.mubr.msk.f32.gmra.mrb[26].mxu1 %vm407_vm1, %v6574_v31  ;;  %5518 = vmatmul.mubr.msk.f32.gmra.mrb[24].mxu0 %vm407_vm1, %v7306_v40  ;;  %v3183_v31 = vld [vmem:[#allocation2 + $0x199] sm:$0xff] }
 0x11d   : > { %5323 = vmatprep.mubr.msk.f32.mxu1 %vm407_vm1, %v6578_v29  ;;  %5520 = vmatprep.mubr.msk.f32.mxu0 %vm407_vm1, %v7307_v38  ;;  %v7310_v29 = vld [vmem:[#allocation26_spill] sm:$0xff] }
 0x120   : > { %5324 = vmatmul.mubr.msk.f32.gmra.mrb[28].mxu1 %vm407_vm1, %v6590_v27  ;;  %5521 = vmatmul.mubr.msk.f32.gmra.mrb[26].mxu0 %vm407_vm1, %v7308_v36  ;;  %v3184_v27 = vld [vmem:[#allocation2 + $0x1a1] sm:$0xff] }
 0x121   : > { %5326 = vmatprep.mubr.msk.f32.mxu1 %vm407_vm1, %v6734_v51  ;;  %5523 = vmatprep.mubr.msk.f32.mxu0 %vm407_vm1, %v7309_v34  ;;  %v7314_v51 = vld [vmem:[#allocation32_spill] sm:$0xff] }
 0x124   : > { %5327 = vmatmul.mubr.msk.f32.gmra.mrb[30].mxu1 %vm407_vm1, %v6744_v53  ;;  %5524 = vmatmul.mubr.msk.f32.gmra.mrb[28].mxu0 %vm407_vm1, %v7310_v29 }
 0x125   : > { %5526 = vmatprep.mubr.msk.f32.mxu0 %vm407_vm1, %v3183_v31  ;;  %5581 = vmatprep.mubr.msk.f32.mxu1 %vm407_vm1, %v3966_v47 }
 0x128   : > { %5527 = vmatmul.mubr.msk.f32.gmra.mrb[30].mxu0 %vm407_vm1, %v3184_v27  ;;  %5582 = vmatmul.mubr.msk.f32.vlgmr.msra.gmra.mrb[32].mxu1 %vm407_vm1, %v3967_v26 }
 0x129   : > { %5531 = vmatprep.mubr.msk.f32.mxu0 %vm407_vm1, %v6361_v56  ;;  %5584 = vmatprep.mubr.msk.f32.mxu1 %vm407_vm1, %v6753_v21  ;;  %v3974_v21 = vld [vmem:[#allocation2 + $0x79] sm:$0xff]  ;;  %v3976_v56 = vld [vmem:[#allocation2 + $0x91] sm:$0xff] }
 0x12c   : > { %5532 = vmatmul.mubr.msk.f32.vlgmr.msra.gmra.mrb[0].mxu0 %vm407_vm1, %v6380_v58  ;;  %5585 = vmatmul.mubr.msk.f32.gmra.mrb[34].mxu1 %vm407_vm1, %v6762_v6  ;;  %v3975_v6 = vld [vmem:[#allocation2 + $0x81] sm:$0xff]  ;;  %v3977_v58 = vld [vmem:[#allocation2 + $0x99] sm:$0xff] }
 0x12d   : > { %5534 = vmatprep.mubr.msk.f32.mxu0 %vm407_vm1, %v6386_v60  ;;  %5587 = vmatprep.mubr.msk.f32.mxu1 %vm407_vm1, %v6766_v54  ;;  %v3978_v60 = vld [vmem:[#allocation2 + $0xa9] sm:$0xff] }
 0x130   : > { %5535 = vmatmul.mubr.msk.f32.gmra.mrb[2].mxu0 %vm407_vm1, %v6400_v61  ;;  %5588 = vmatmul.mubr.msk.f32.gmra.mrb[36].mxu1 %vm407_vm1, %v6776_v50  ;;  %v3979_v61 = vld [vmem:[#allocation2 + $0xb1] sm:$0xff] }
 0x131   : > { %5537 = vmatprep.mubr.msk.f32.mxu0 %vm407_vm1, %v6404_v63  ;;  %5590 = vmatprep.mubr.msk.f32.mxu1 %vm407_vm1, %v6780_v28  ;;  %v3980_v63 = vld [vmem:[#allocation2 + $0xc1] sm:$0xff] }
 0x134   : > { %5538 = vmatmul.mubr.msk.f32.gmra.mrb[4].mxu0 %vm407_vm1, %v6416_v1  ;;  %5591 = vmatmul.mubr.msk.f32.gmra.mrb[38].mxu1 %vm407_vm1, %v6790_v55  ;;  %v3981_v1 = vld [vmem:[#allocation2 + $0xc9] sm:$0xff] }
 0x135   : > { %5540 = vmatprep.mubr.msk.f32.mxu0 %vm407_vm1, %v6420_v4  ;;  %5593 = vmatprep.mubr.msk.f32.mxu1 %vm407_vm1, %v3974_v21  ;;  %v3982_v4 = vld [vmem:[#allocation2 + $0xd9] sm:$0xff] }
 0x138   : > { %5541 = vmatmul.mubr.msk.f32.gmra.mrb[6].mxu0 %vm407_vm1, %v6432_v8  ;;  %5594 = vmatmul.mubr.msk.f32.gmra.mrb[40].mxu1 %vm407_vm1, %v3975_v6  ;;  %v3983_v8 = vld [vmem:[#allocation2 + $0xe1] sm:$0xff] }
 0x139   : > { %5543 = vmatprep.mubr.msk.f32.mxu0 %vm407_vm1, %v6436_v11  ;;  %5596 = vmatprep.mubr.msk.f32.mxu1 %vm407_vm1, %v3976_v56  ;;  %v3984_v11 = vld [vmem:[#allocation2 + $0xf1] sm:$0xff] }
 0x13c   : > { %5544 = vmatmul.mubr.msk.f32.gmra.mrb[8].mxu0 %vm407_vm1, %v6448_v13  ;;  %5597 = vmatmul.mubr.msk.f32.gmra.mrb[42].mxu1 %vm407_vm1, %v3977_v58  ;;  %v3985_v13 = vld [vmem:[#allocation2 + $0xf9] sm:$0xff] }
 0x13d   : > { %5546 = vmatprep.mubr.msk.f32.mxu0 %vm407_vm1, %v6452_v15  ;;  %5599 = vmatprep.mubr.msk.f32.mxu1 %vm407_vm1, %v3978_v60  ;;  %v3986_v15 = vld [vmem:[#allocation2 + $0x109] sm:$0xff] }
 0x140   : > { %5547 = vmatmul.mubr.msk.f32.gmra.mrb[10].mxu0 %vm407_vm1, %v6464_v17  ;;  %5600 = vmatmul.mubr.msk.f32.gmra.mrb[44].mxu1 %vm407_vm1, %v3979_v61  ;;  %v3987_v17 = vld [vmem:[#allocation2 + $0x111] sm:$0xff] }
 0x141   : > { %5549 = vmatprep.mubr.msk.f32.mxu0 %vm407_vm1, %v6468_v19  ;;  %5602 = vmatprep.mubr.msk.f32.mxu1 %vm407_vm1, %v3980_v63  ;;  %v3988_v19 = vld [vmem:[#allocation2 + $0x121] sm:$0xff] }
 0x144   : > { %5550 = vmatmul.mubr.msk.f32.gmra.mrb[12].mxu0 %vm407_vm1, %v6480_v22  ;;  %5603 = vmatmul.mubr.msk.f32.gmra.mrb[46].mxu1 %vm407_vm1, %v3981_v1  ;;  %v3990_v22 = vld [vmem:[#allocation2 + $0x139] sm:$0xff] }
 0x145   : > { %5552 = vmatprep.mubr.msk.f32.mxu0 %vm407_vm1, %v6484_v5  ;;  %5605 = vmatprep.mubr.msk.f32.mxu1 %vm407_vm1, %v3982_v4  ;;  %v3996_v5 = vld [vmem:[#allocation2 + $0x181] sm:$0xff] }
 0x148   : > { %5553 = vmatmul.mubr.msk.f32.gmra.mrb[14].mxu0 %vm407_vm1, %v6496_v25  ;;  %5606 = vmatmul.mubr.msk.f32.gmra.mrb[48].mxu1 %vm407_vm1, %v3983_v8  ;;  %v7312_v25 = vld [vmem:[#allocation30_spill] sm:$0xff] }
 0x149   : > { %5555 = vmatprep.mubr.msk.f32.mxu0 %vm407_vm1, %v6500_v3  ;;  %5608 = vmatprep.mubr.msk.f32.mxu1 %vm407_vm1, %v3984_v11  ;;  %v3573_v3 = vld [vmem:[#allocation2 + $0x19a] sm:$0xff] }
 0x14c   : > { %5556 = vmatmul.mubr.msk.f32.gmra.mrb[16].mxu0 %vm407_vm1, %v6512_v48  ;;  %5609 = vmatmul.mubr.msk.f32.gmra.mrb[50].mxu1 %vm407_vm1, %v3985_v13  ;;  %v3989_v48 = vld [vmem:[#allocation2 + $0x129] sm:$0xff] }
 0x14d   : > { %5558 = vmatprep.mubr.msk.f32.mxu0 %vm407_vm1, %v6516_v45  ;;  %5611 = vmatprep.mubr.msk.f32.mxu1 %vm407_vm1, %v3986_v15  ;;  %v3992_v45 = vld [vmem:[#allocation2 + $0x151] sm:$0xff] }
 0x150   : > { %5559 = vmatmul.mubr.msk.f32.gmra.mrb[18].mxu0 %vm407_vm1, %v6528_v43  ;;  %5612 = vmatmul.mubr.msk.f32.gmra.mrb[52].mxu1 %vm407_vm1, %v3987_v17  ;;  %v3991_v43 = vld [vmem:[#allocation2 + $0x141] sm:$0xff] }
 0x151   : > { %5561 = vmatprep.mubr.msk.f32.mxu0 %vm407_vm1, %v6532_v41  ;;  %5614 = vmatprep.mubr.msk.f32.mxu1 %vm407_vm1, %v3988_v19  ;;  %v3994_v41 = vld [vmem:[#allocation2 + $0x169] sm:$0xff] }
 0x154   : > { %5562 = vmatmul.mubr.msk.f32.gmra.mrb[20].mxu0 %vm407_vm1, %v6544_v39  ;;  %5615 = vmatmul.mubr.msk.f32.gmra.mrb[54].mxu1 %vm407_vm1, %v3989_v48  ;;  %v3993_v39 = vld [vmem:[#allocation2 + $0x159] sm:$0xff] }
 0x155   : > { %5564 = vmatprep.mubr.msk.f32.mxu0 %vm407_vm1, %v6548_v37  ;;  %5617 = vmatprep.mubr.msk.f32.mxu1 %vm407_vm1, %v3990_v22  ;;  %v7311_v37 = vld [vmem:[#allocation29_spill] sm:$0xff] }
 0x158   : > { %5565 = vmatmul.mubr.msk.f32.gmra.mrb[22].mxu0 %vm407_vm1, %v6560_v35  ;;  %5618 = vmatmul.mubr.msk.f32.gmra.mrb[56].mxu1 %vm407_vm1, %v3991_v43  ;;  %v3995_v35 = vld [vmem:[#allocation2 + $0x171] sm:$0xff] }
 0x159   : > { %5567 = vmatprep.mubr.msk.f32.mxu0 %vm407_vm1, %v6564_v33  ;;  %5620 = vmatprep.mubr.msk.f32.mxu1 %vm407_vm1, %v3992_v45  ;;  %v7313_v33 = vld [vmem:[#allocation31_spill] sm:$0xff] }
 0x15c   : > { %5568 = vmatmul.mubr.msk.f32.gmra.mrb[24].mxu0 %vm407_vm1, %v6576_v30  ;;  %5621 = vmatmul.mubr.msk.f32.gmra.mrb[58].mxu1 %vm407_vm1, %v3993_v39  ;;  %v3997_v30 = vld [vmem:[#allocation2 + $0x189] sm:$0xff] }
 0x15d   : > { %5570 = vmatprep.mubr.msk.f32.mxu0 %vm407_vm1, %v7311_v37  ;;  %5623 = vmatprep.mubr.msk.f32.mxu1 %vm407_vm1, %v3994_v41 }
 0x160   : > { %5571 = vmatmul.mubr.msk.f32.gmra.mrb[26].mxu0 %vm407_vm1, %v7312_v25  ;;  %5624 = vmatmul.mubr.msk.f32.gmra.mrb[60].mxu1 %vm407_vm1, %v3995_v35 }
 0x161   : > { %5573 = vmatprep.mubr.msk.f32.mxu0 %vm407_vm1, %v7313_v33  ;;  %5626 = vmatprep.mubr.msk.f32.mxu1 %vm407_vm1, %v3996_v5 }
 0x164   : > { %5574 = vmatmul.mubr.msk.f32.gmra.mrb[28].mxu0 %vm407_vm1, %v7314_v51  ;;  %5627 = vmatmul.mubr.msk.f32.gmra.mrb[62].mxu1 %vm407_vm1, %v3997_v30 }
 0x165   : > { %5576 = vmatprep.mubr.msk.f32.mxu0 %vm407_vm1, %v3573_v3 }
 0x168   : > { %5577 = vmatmul.mubr.msk.f32.gmra.mrb[30].mxu0 %vm407_vm1, %v3574_v52 }
 0x1bb   : > { %v5283_v53 = vpop.f32.mrb[0].mxu1 }
 0x1bc   : > { %v1791_v57 = vpop.f32.mrb[1].mxu1 }
 0x1bf   : > { %v5286_v54 = vpop.f32.mrb[2].mxu1 }
 0x1c0   : > { %v1801_v50 = vpop.f32.mrb[3].mxu1 }
 0x1c3   : > { %v5289_v28 = vpop.f32.mrb[4].mxu1 }
 0x1c4   : > { %v1811_v55 = vpop.f32.mrb[5].mxu1 }
 0x1c7   : > { %v6994_v10 = vpop.f32.mrb[6].mxu1 }
 0x1c8   : > { %v6996_v59 = vpop.f32.mrb[7].mxu1 }
 0x1cb   : > { %v6998_v32 = vpop.f32.mrb[8].mxu1 }
 0x1cc   : > { %v7000_v62 = vpop.f32.mrb[9].mxu1 }
 0x1cf   : > { %v7002_v0 = vpop.f32.mrb[10].mxu1 }
 0x1d0   : > { %v7004_v2 = vpop.f32.mrb[11].mxu1 }
 0x1d3   : > { %v7006_v7 = vpop.f32.mrb[12].mxu1 }
 0x1d4   : > { %v7008_v9 = vpop.f32.mrb[13].mxu1 }
 0x1d7   : > { %v7010_v12 = vpop.f32.mrb[14].mxu1 }
 0x1d8   : > { %v7012_v14 = vpop.f32.mrb[15].mxu1 }
 0x1db   : > { %v7014_v16 = vpop.f32.mrb[16].mxu1 }
 0x1dc   : > { %v7016_v18 = vpop.f32.mrb[17].mxu1 }
 0x1df   : > { %v7018_v20 = vpop.f32.mrb[18].mxu1 }
 0x1e0   : > { %v7020_v23 = vpop.f32.mrb[19].mxu1 }
 0x1e3   : > { %v7022_v24 = vpop.f32.mrb[20].mxu1 }
 0x1e4   : > { %v7024_v49 = vpop.f32.mrb[21].mxu1 }
 0x1e7   : > { %v7026_v46 = vpop.f32.mrb[22].mxu1 }
 0x1e8   : > { %v7028_v44 = vpop.f32.mrb[23].mxu1 }
 0x1eb   : > { %v7030_v42 = vpop.f32.mrb[24].mxu1 }
 0x1ec   : > { %v7032_v40 = vpop.f32.mrb[25].mxu1 }
 0x1ef   : > { %v7034_v38 = vpop.f32.mrb[26].mxu1 }
 0x1f0   : > { %v7036_v36 = vpop.f32.mrb[27].mxu1 }
 0x1f3   : > { %v7038_v34 = vpop.f32.mrb[28].mxu1 }
 0x1f4   : > { %v7040_v31 = vpop.f32.mrb[29].mxu1 }
 0x1f7   : > { %v7042_v47 = vpop.f32.mrb[30].mxu1 }
 0x1f8   : > { %v7044_v29 = vpop.f32.mrb[31].mxu1 }
 0x1fb   : > { %v5583_v27 = vpop.f32.mrb[32].mxu1 }
 0x1fc   : > { %4324 = vst.msk [vmem:[%s7050_s7 + $0x8] sm:$0xff] %vm3933_vm4, %v5583_v27  ;;  %v4164_v26 = vpop.f32.mrb[33].mxu1 }
 0x1fd   : > { %4323 = vst.msk [vmem:[%s7050_s7] sm:$0xff] %vm3933_vm4, %v4164_v26 }
 0x1ff   : > { %v5533_v21 = vpop.f32.mrb[0].mxu0  ;;  %v5586_v6 = vpop.f32.mrb[34].mxu1 }
 0x200   : > { %v5629_v56 = vadd.f32 %v5533_v21, %v5283_v53  ;;  %v3742_v58 = vpop.f32.mrb[1].mxu0  ;;  %4326 = vst.msk [vmem:[%s7050_s7 + $0x18] sm:$0xff] %vm3933_vm4, %v5586_v6  ;;  %v4174_v60 = vpop.f32.mrb[35].mxu1 }
 0x201   : > { %v5630_v61 = vadd.f32 %v3742_v58, %v1791_v57  ;;  %4325 = vst.msk [vmem:[%s7050_s7 + $0x10] sm:$0xff] %vm3933_vm4, %v4174_v60 }
 0x202   : > { %3935 = vst.msk [vmem:[%s7060_s11 + $0x8] sm:$0xff] %vm3933_vm4, %v5629_v56 }
 0x203   : > { %3934 = vst.msk [vmem:[%s7060_s11] sm:$0xff] %vm3933_vm4, %v5630_v61  ;;  %v5536_v63 = vpop.f32.mrb[2].mxu0  ;;  %v5589_v1 = vpop.f32.mrb[36].mxu1 }
 0x204   : > { %v5631_v4 = vadd.f32 %v5536_v63, %v5286_v54  ;;  %v3752_v8 = vpop.f32.mrb[3].mxu0  ;;  %4328 = vst.msk [vmem:[%s7050_s7 + $0x28] sm:$0xff] %vm3933_vm4, %v5589_v1  ;;  %v4184_v11 = vpop.f32.mrb[37].mxu1 }
 0x205   : > { %v5632_v13 = vadd.f32 %v3752_v8, %v1801_v50  ;;  %4327 = vst.msk [vmem:[%s7050_s7 + $0x20] sm:$0xff] %vm3933_vm4, %v4184_v11 }
 0x206   : > { %3937 = vst.msk [vmem:[%s7060_s11 + $0x18] sm:$0xff] %vm3933_vm4, %v5631_v4 }
 0x207   : > { %3936 = vst.msk [vmem:[%s7060_s11 + $0x10] sm:$0xff] %vm3933_vm4, %v5632_v13  ;;  %v5539_v15 = vpop.f32.mrb[4].mxu0  ;;  %v5592_v17 = vpop.f32.mrb[38].mxu1 }
 0x208   : > { %v5633_v19 = vadd.f32 %v5539_v15, %v5289_v28  ;;  %v3762_v48 = vpop.f32.mrb[5].mxu0  ;;  %4330 = vst.msk [vmem:[%s7050_s7 + $0x38] sm:$0xff] %vm3933_vm4, %v5592_v17  ;;  %v4194_v22 = vpop.f32.mrb[39].mxu1 }
 0x209   : > { %v5634_v43 = vadd.f32 %v3762_v48, %v1811_v55  ;;  %4329 = vst.msk [vmem:[%s7050_s7 + $0x30] sm:$0xff] %vm3933_vm4, %v4194_v22 }
 0x20a   : > { %3939 = vst.msk [vmem:[%s7060_s11 + $0x28] sm:$0xff] %vm3933_vm4, %v5633_v19 }
 0x20b   : > { %3938 = vst.msk [vmem:[%s7060_s11 + $0x20] sm:$0xff] %vm3933_vm4, %v5634_v43  ;;  %v5542_v45 = vpop.f32.mrb[6].mxu0  ;;  %v5595_v39 = vpop.f32.mrb[40].mxu1 }
 0x20c   : > { %v5635_v41 = vadd.f32 %v5542_v45, %v6994_v10  ;;  %v3772_v37 = vpop.f32.mrb[7].mxu0  ;;  %4332 = vst.msk [vmem:[%s7050_s7 + $0x48] sm:$0xff] %vm3933_vm4, %v5595_v39  ;;  %v4204_v35 = vpop.f32.mrb[41].mxu1 }
 0x20d   : > { %v5636_v5 = vadd.f32 %v3772_v37, %v6996_v59  ;;  %4331 = vst.msk [vmem:[%s7050_s7 + $0x40] sm:$0xff] %vm3933_vm4, %v4204_v35 }
 0x20e   : > { %3941 = vst.msk [vmem:[%s7060_s11 + $0x38] sm:$0xff] %vm3933_vm4, %v5635_v41 }
 0x20f   : > { %3940 = vst.msk [vmem:[%s7060_s11 + $0x30] sm:$0xff] %vm3933_vm4, %v5636_v5  ;;  %v5545_v25 = vpop.f32.mrb[8].mxu0  ;;  %v5598_v33 = vpop.f32.mrb[42].mxu1 }
 0x210   : > { %v5637_v30 = vadd.f32 %v5545_v25, %v6998_v32  ;;  %v3782_v3 = vpop.f32.mrb[9].mxu0  ;;  %4334 = vst.msk [vmem:[%s7050_s7 + $0x58] sm:$0xff] %vm3933_vm4, %v5598_v33  ;;  %v4214_v51 = vpop.f32.mrb[43].mxu1 }
 0x211   : > { %v5638_v52 = vadd.f32 %v3782_v3, %v7000_v62  ;;  %4333 = vst.msk [vmem:[%s7050_s7 + $0x50] sm:$0xff] %vm3933_vm4, %v4214_v51 }
 0x212   : > { %3943 = vst.msk [vmem:[%s7060_s11 + $0x48] sm:$0xff] %vm3933_vm4, %v5637_v30 }
 0x213   : > { %3942 = vst.msk [vmem:[%s7060_s11 + $0x40] sm:$0xff] %vm3933_vm4, %v5638_v52  ;;  %v5548_v53 = vpop.f32.mrb[10].mxu0  ;;  %v5601_v57 = vpop.f32.mrb[44].mxu1 }
 0x214   : > { %v5639_v54 = vadd.f32 %v5548_v53, %v7002_v0  ;;  %v3792_v50 = vpop.f32.mrb[11].mxu0  ;;  %4336 = vst.msk [vmem:[%s7050_s7 + $0x68] sm:$0xff] %vm3933_vm4, %v5601_v57  ;;  %v4224_v28 = vpop.f32.mrb[45].mxu1 }
 0x215   : > { %v5640_v55 = vadd.f32 %v3792_v50, %v7004_v2  ;;  %4335 = vst.msk [vmem:[%s7050_s7 + $0x60] sm:$0xff] %vm3933_vm4, %v4224_v28 }
 0x216   : > { %3945 = vst.msk [vmem:[%s7060_s11 + $0x58] sm:$0xff] %vm3933_vm4, %v5639_v54 }
 0x217   : > { %3944 = vst.msk [vmem:[%s7060_s11 + $0x50] sm:$0xff] %vm3933_vm4, %v5640_v55  ;;  %v5551_v10 = vpop.f32.mrb[12].mxu0  ;;  %v5604_v59 = vpop.f32.mrb[46].mxu1 }
 0x218   : > { %v5641_v32 = vadd.f32 %v5551_v10, %v7006_v7  ;;  %v3802_v62 = vpop.f32.mrb[13].mxu0  ;;  %4338 = vst.msk [vmem:[%s7050_s7 + $0x78] sm:$0xff] %vm3933_vm4, %v5604_v59  ;;  %v4234_v0 = vpop.f32.mrb[47].mxu1 }
 0x219   : > { %v5642_v2 = vadd.f32 %v3802_v62, %v7008_v9  ;;  %4337 = vst.msk [vmem:[%s7050_s7 + $0x70] sm:$0xff] %vm3933_vm4, %v4234_v0 }
 0x21a   : > { %3947 = vst.msk [vmem:[%s7060_s11 + $0x68] sm:$0xff] %vm3933_vm4, %v5641_v32 }
 0x21b   : > { %3946 = vst.msk [vmem:[%s7060_s11 + $0x60] sm:$0xff] %vm3933_vm4, %v5642_v2  ;;  %v5554_v27 = vpop.f32.mrb[14].mxu0  ;;  %v5607_v26 = vpop.f32.mrb[48].mxu1 }
 0x21c   : > { %v5643_v7 = vadd.f32 %v5554_v27, %v7010_v12  ;;  %v3812_v21 = vpop.f32.mrb[15].mxu0  ;;  %4340 = vst.msk [vmem:[%s7050_s7 + $0x88] sm:$0xff] %vm3933_vm4, %v5607_v26  ;;  %v4244_v6 = vpop.f32.mrb[49].mxu1 }
 0x21d   : > { %v5644_v9 = vadd.f32 %v3812_v21, %v7012_v14  ;;  %4339 = vst.msk [vmem:[%s7050_s7 + $0x80] sm:$0xff] %vm3933_vm4, %v4244_v6 }
 0x21e   : > { %3949 = vst.msk [vmem:[%s7060_s11 + $0x78] sm:$0xff] %vm3933_vm4, %v5643_v7 }
 0x21f   : > { %3948 = vst.msk [vmem:[%s7060_s11 + $0x70] sm:$0xff] %vm3933_vm4, %v5644_v9  ;;  %v5557_v56 = vpop.f32.mrb[16].mxu0  ;;  %v5610_v58 = vpop.f32.mrb[50].mxu1 }
 0x220   : > { %v5645_v12 = vadd.f32 %v5557_v56, %v7014_v16  ;;  %v3822_v60 = vpop.f32.mrb[17].mxu0  ;;  %4342 = vst.msk [vmem:[%s7050_s7 + $0x98] sm:$0xff] %vm3933_vm4, %v5610_v58  ;;  %v4254_v61 = vpop.f32.mrb[51].mxu1 }
 0x221   : > { %v5646_v14 = vadd.f32 %v3822_v60, %v7016_v18  ;;  %4341 = vst.msk [vmem:[%s7050_s7 + $0x90] sm:$0xff] %vm3933_vm4, %v4254_v61 }
 0x222   : > { %3951 = vst.msk [vmem:[%s7060_s11 + $0x88] sm:$0xff] %vm3933_vm4, %v5645_v12 }
 0x223   : > { %3950 = vst.msk [vmem:[%s7060_s11 + $0x80] sm:$0xff] %vm3933_vm4, %v5646_v14  ;;  %v5560_v63 = vpop.f32.mrb[18].mxu0  ;;  %v5613_v1 = vpop.f32.mrb[52].mxu1 }
 0x224   : > { %v5647_v16 = vadd.f32 %v5560_v63, %v7018_v20  ;;  %v3832_v4 = vpop.f32.mrb[19].mxu0  ;;  %4344 = vst.msk [vmem:[%s7050_s7 + $0xa8] sm:$0xff] %vm3933_vm4, %v5613_v1  ;;  %v4264_v8 = vpop.f32.mrb[53].mxu1 }
 0x225   : > { %v5648_v18 = vadd.f32 %v3832_v4, %v7020_v23  ;;  %4343 = vst.msk [vmem:[%s7050_s7 + $0xa0] sm:$0xff] %vm3933_vm4, %v4264_v8 }
 0x226   : > { %3953 = vst.msk [vmem:[%s7060_s11 + $0x98] sm:$0xff] %vm3933_vm4, %v5647_v16 }
 0x227   : > { %3952 = vst.msk [vmem:[%s7060_s11 + $0x90] sm:$0xff] %vm3933_vm4, %v5648_v18  ;;  %v5563_v11 = vpop.f32.mrb[20].mxu0  ;;  %v5616_v13 = vpop.f32.mrb[54].mxu1 }
 0x228   : > { %v5649_v20 = vadd.f32 %v5563_v11, %v7022_v24  ;;  %v3842_v15 = vpop.f32.mrb[21].mxu0  ;;  %4346 = vst.msk [vmem:[%s7050_s7 + $0xb8] sm:$0xff] %vm3933_vm4, %v5616_v13  ;;  %v4274_v17 = vpop.f32.mrb[55].mxu1 }
 0x229   : > { %v5650_v23 = vadd.f32 %v3842_v15, %v7024_v49  ;;  %4345 = vst.msk [vmem:[%s7050_s7 + $0xb0] sm:$0xff] %vm3933_vm4, %v4274_v17 }
 0x22a   : > { %3955 = vst.msk [vmem:[%s7060_s11 + $0xa8] sm:$0xff] %vm3933_vm4, %v5649_v20 }
 0x22b   : > { %3954 = vst.msk [vmem:[%s7060_s11 + $0xa0] sm:$0xff] %vm3933_vm4, %v5650_v23  ;;  %v5566_v19 = vpop.f32.mrb[22].mxu0  ;;  %v5619_v48 = vpop.f32.mrb[56].mxu1 }
 0x22c   : > { %v5651_v24 = vadd.f32 %v5566_v19, %v7026_v46  ;;  %v3852_v22 = vpop.f32.mrb[23].mxu0  ;;  %4348 = vst.msk [vmem:[%s7050_s7 + $0xc8] sm:$0xff] %vm3933_vm4, %v5619_v48  ;;  %v4284_v43 = vpop.f32.mrb[57].mxu1 }
 0x22d   : > { %v5652_v49 = vadd.f32 %v3852_v22, %v7028_v44  ;;  %4347 = vst.msk [vmem:[%s7050_s7 + $0xc0] sm:$0xff] %vm3933_vm4, %v4284_v43 }
 0x22e   : > { %3957 = vst.msk [vmem:[%s7060_s11 + $0xb8] sm:$0xff] %vm3933_vm4, %v5651_v24 }
 0x22f   : > { %3956 = vst.msk [vmem:[%s7060_s11 + $0xb0] sm:$0xff] %vm3933_vm4, %v5652_v49  ;;  %v5569_v45 = vpop.f32.mrb[24].mxu0  ;;  %v5622_v39 = vpop.f32.mrb[58].mxu1 }
 0x230   : > { %v5653_v46 = vadd.f32 %v5569_v45, %v7030_v42  ;;  %v3862_v41 = vpop.f32.mrb[25].mxu0  ;;  %4350 = vst.msk [vmem:[%s7050_s7 + $0xd8] sm:$0xff] %vm3933_vm4, %v5622_v39  ;;  %v4294_v37 = vpop.f32.mrb[59].mxu1 }
 0x231   : > { %v5654_v44 = vadd.f32 %v3862_v41, %v7032_v40  ;;  %4349 = vst.msk [vmem:[%s7050_s7 + $0xd0] sm:$0xff] %vm3933_vm4, %v4294_v37 }
 0x232   : > { %3959 = vst.msk [vmem:[%s7060_s11 + $0xc8] sm:$0xff] %vm3933_vm4, %v5653_v46 }
 0x233   : > { %3958 = vst.msk [vmem:[%s7060_s11 + $0xc0] sm:$0xff] %vm3933_vm4, %v5654_v44  ;;  %v5572_v35 = vpop.f32.mrb[26].mxu0  ;;  %v5625_v5 = vpop.f32.mrb[60].mxu1 }
 0x234   : > { %v5655_v42 = vadd.f32 %v5572_v35, %v7034_v38  ;;  %v3872_v25 = vpop.f32.mrb[27].mxu0  ;;  %4352 = vst.msk [vmem:[%s7050_s7 + $0xe8] sm:$0xff] %vm3933_vm4, %v5625_v5  ;;  %v4304_v33 = vpop.f32.mrb[61].mxu1 }
 0x235   : > { %v5656_v40 = vadd.f32 %v3872_v25, %v7036_v36  ;;  %4351 = vst.msk [vmem:[%s7050_s7 + $0xe0] sm:$0xff] %vm3933_vm4, %v4304_v33 }
 0x236   : > { %3961 = vst.msk [vmem:[%s7060_s11 + $0xd8] sm:$0xff] %vm3933_vm4, %v5655_v42 }
 0x237   : > { %3960 = vst.msk [vmem:[%s7060_s11 + $0xd0] sm:$0xff] %vm3933_vm4, %v5656_v40  ;;  %v5575_v30 = vpop.f32.mrb[28].mxu0  ;;  %v5628_v3 = vpop.f32.mrb[62].mxu1 }
 0x238   : > { %v5657_v38 = vadd.f32 %v5575_v30, %v7038_v34  ;;  %v3882_v51 = vpop.f32.mrb[29].mxu0  ;;  %4354 = vst.msk [vmem:[%s7050_s7 + $0xf8] sm:$0xff] %vm3933_vm4, %v5628_v3  ;;  %v4314_v52 = vpop.f32.mrb[63].mxu1 }
 0x239   : > { %v5658_v53 = vadd.f32 %v3882_v51, %v7040_v31  ;;  %4353 = vst.msk [vmem:[%s7050_s7 + $0xf0] sm:$0xff] %vm3933_vm4, %v4314_v52 }
 0x23a   : > { %3963 = vst.msk [vmem:[%s7060_s11 + $0xe8] sm:$0xff] %vm3933_vm4, %v5657_v38 }
 0x23b   : > { %3962 = vst.msk [vmem:[%s7060_s11 + $0xe0] sm:$0xff] %vm3933_vm4, %v5658_v53  ;;  %v5578_v36 = vpop.f32.mrb[30].mxu0 }
 0x23c   : > { %v5659_v57 = vadd.f32 %v5578_v36, %v7042_v47  ;;  %v3892_v54 = vpop.f32.mrb[31].mxu0 }
 0x23d   : > { %v5660_v50 = vadd.f32 %v3892_v54, %v7044_v29 }
 0x23e   : > { %3965 = vst.msk [vmem:[%s7060_s11 + $0xf8] sm:$0xff] %vm3933_vm4, %v5659_v57 }
 0x23f   : > { %3964 = vst.msk [vmem:[%s7060_s11 + $0xf0] sm:$0xff] %vm3933_vm4, %v5660_v50 }
 0x240 PF: > { %s17_s21 = sadd.s32 1, %s5900_s21  }
 0x241   : > { %p14_p4 = scmp.ge.s32.totalorder %s17_s21, 4  }
 0x243   :  { %16 = sbr.rel (!%p14_p4) target bundleno = 1 (0x1), region = 93 }

</bundles_post_ra>
